<compile_context>
chip_gen: v7x
topology: tpu7x:2x2x1
jax: 0.10.0
libtpu: 0.0.40
codegen_flags: <defaults>
</compile_context>

<pallas_src>
import functools

import jax
import jax.numpy as jnp
from jax.experimental import pallas as pl
from jax.experimental.pallas import tpu as pltpu


# -----------------------------------------------------------------------------
# Model configuration (mirrors the PyTorch model_configs dict, small shapes)
# -----------------------------------------------------------------------------
MODEL_CONFIGS = {
    "conv": {
        "0": {"in_channels": 4, "out_channels": 8, "kernel_size": 3, "stride": 1,
              "padding": 1, "batch_norm": True, "relu": True,
              "max_pool": {"kernel_size": 2, "stride": 2}},
        "1": {"in_channels": 8, "out_channels": 16, "kernel_size": 3, "stride": 1,
              "padding": 1, "relu": True,
              "max_pool": {"kernel_size": 2, "stride": 2}},
    },
    "fully_connected": {
        "0": {"in_features": 16 * 4 * 4, "out_features": 64,
              "drop_out": 0.5, "relu": True},
        "1": {"in_features": 64, "out_features": 10},
    },
}

BN_EPS = 1e-5


def _conv_cfgs(configs):
    return [configs["conv"][str(n)] for n in range(len(configs["conv"]))]


def _fc_cfgs(configs):
    return [configs["fully_connected"][str(n)]
            for n in range(len(configs["fully_connected"]))]


# -----------------------------------------------------------------------------
# Static shape plan for the fused kernel
# -----------------------------------------------------------------------------
def _build_plan(configs, height, width):
    """Per-conv-block static shapes + VMEM scratch layout (H, W, C) list."""
    convs = _conv_cfgs(configs)
    plan, scratch_hwc = [], []
    h, w = height, width
    for n, c in enumerate(convs):
        k, s, p = c["kernel_size"], c["stride"], c["padding"]
        hp, wp = h + 2 * p, w + 2 * p                       # padded tap source
        ho, wo = (hp - k) // s + 1, (wp - k) // s + 1
        blk = {"k": k, "s": s, "cin": c["in_channels"], "cout": c["out_channels"],
               "ho": ho, "wo": wo, "relu": bool(c.get("relu")),
               "pool": None, "act_idx": None, "next_idx": None, "next_pad": 0}
        h2, w2 = ho, wo
        if "max_pool" in c:
            pk, ps = c["max_pool"]["kernel_size"], c["max_pool"]["stride"]
            hpo, wpo = (ho - pk) // ps + 1, (wo - pk) // ps + 1
            blk["pool"] = (pk, ps, hpo, wpo)
            blk["act_idx"] = len(scratch_hwc)
            scratch_hwc.append((ho, wo, blk["cout"]))       # pre-pool conv out
            h2, w2 = hpo, wpo
        next_pad = convs[n + 1]["padding"] if n + 1 < len(convs) else 0
        blk["next_pad"] = next_pad
        blk["next_idx"] = len(scratch_hwc)
        scratch_hwc.append((h2 + 2 * next_pad, w2 + 2 * next_pad, blk["cout"]))
        plan.append(blk)
        h, w = h2, w2
    feat = {"h": h, "w": w, "c": plan[-1]["cout"]}
    return plan, scratch_hwc, feat


# -----------------------------------------------------------------------------
# Fused forward kernel
# -----------------------------------------------------------------------------
def _win(off, size, stride):
    """Static window along one ref axis (strided only when needed)."""
    return pl.ds(off, size) if stride == 1 else pl.ds(off, size, stride)


def _make_fused_kernel(plan, fcs, feat, batch, n_inputs):
    def kernel(*refs):
        in_refs = refs[:n_inputs]
        out_ref = refs[n_inputs]
        scratch = refs[n_inputs + 1:]

        it = iter(in_refs)
        x_ref = next(it)
        conv_params = [(next(it), next(it)) for _ in plan]
        fc_params = [(next(it), next(it)) for _ in fcs]

        # ------------------------- conv blocks -------------------------
        src = x_ref                                   # padded NHWC tap source
        for blk, (w_ref, b_ref) in zip(plan, conv_params):
            k, s = blk["k"], blk["s"]
            ho, wo, cin, cout = blk["ho"], blk["wo"], blk["cin"], blk["cout"]
            m = batch * ho * wo

            # conv = sum of k*k shifted-window matmuls (bf16 operands, f32 acc)
            acc = jnp.zeros((m, cout), jnp.float32)
            for i in range(k):
                for j in range(k):
                    tap = src[:, _win(i, ho, s), _win(j, wo, s), :]
                    tap2d = tap.reshape(m, cin).astype(jnp.bfloat16)
                    acc = acc + jnp.dot(tap2d, w_ref[i, j],
                                        preferred_element_type=jnp.float32)
            y = acc + b_ref[...]                      # BN+bias already folded
            if blk["relu"]:
                y = jnp.maximum(y, 0.0)
            y4 = y.reshape(batch, ho, wo, cout)

            if blk["pool"] is not None:
                pk, ps, hpo, wpo = blk["pool"]
                act_ref = scratch[blk["act_idx"]]
                act_ref[...] = y4
                out4 = None
                for dh in range(pk):                  # max over k*k strided windows
                    for dw in range(pk):
                        win = act_ref[:, _win(dh, hpo, ps), _win(dw, wpo, ps), :]
                        out4 = win if out4 is None else jnp.maximum(out4, win)
                h2, w2 = hpo, wpo
            else:
                out4, h2, w2 = y4, ho, wo

            # stage block output (zero-padded for the next conv if needed)
            nxt = scratch[blk["next_idx"]]
            p = blk["next_pad"]
            if p > 0:
                nxt[...] = jnp.zeros(nxt.shape, nxt.dtype)
                nxt[:, p:p + h2, p:p + w2, :] = out4
            else:
                nxt[...] = out4
            src = nxt

        # ------------------------- dense stack -------------------------
        # TODO(synk): nn.Dropout layers are identity here (eval mode).
        hf, wf = feat["h"], feat["w"]
        w0_ref, b0_ref = fc_params[0]
        # FC0 weights are pre-permuted to (Hf, Wf, Cf, out), so the NCHW
        # torch.flatten(x, 1) semantics reduce to a per-pixel matmul sum.
        acc = jnp.zeros((batch, fcs[0]["out_features"]), jnp.float32)
        for h in range(hf):
            for w in range(wf):
                pix = src[:, h, w, :].astype(jnp.bfloat16)          # (B, Cf)
                acc = acc + jnp.dot(pix, w0_ref[h, w],
                                    preferred_element_type=jnp.float32)
        x = acc + b0_ref[...]
        if fcs[0].get("relu"):
            x = jnp.maximum(x, 0.0)

        for cfg, (w_ref, b_ref) in zip(fcs[1:], fc_params[1:]):
            x = jnp.dot(x.astype(jnp.bfloat16), w_ref[...],
                        preferred_element_type=jnp.float32) + b_ref[...]
            if cfg.get("relu"):
                x = jnp.maximum(x, 0.0)

        # softmax(dim=1)
        mx = jnp.max(x, axis=1, keepdims=True)
        e = jnp.exp(x - mx)
        denom = jnp.sum(e, axis=1, keepdims=True)
        out_ref[...] = (e * pl.reciprocal(denom, approx=True)).astype(out_ref.dtype)

    return kernel


# -----------------------------------------------------------------------------
# Parameter init (PyTorch-like layouts) + one-time packing for the kernel
# -----------------------------------------------------------------------------
def init_params(configs, key):
    params = {"conv": [], "fc": []}
    for c in _conv_cfgs(configs):
        key, k1, k2 = jax.random.split(key, 3)
        w = 0.1 * jax.random.normal(
            k1, (c["out_channels"], c["in_channels"],
                 c["kernel_size"], c["kernel_size"]), jnp.float32)
        b = 0.1 * jax.random.normal(k2, (c["out_channels"],), jnp.float32)
        p = {"w": w, "b": b}
        if c.get("batch_norm"):
            p["gamma"] = jnp.ones((c["out_channels"],), jnp.float32)
            p["beta"] = jnp.zeros((c["out_channels"],), jnp.float32)
            p["running_mean"] = jnp.zeros((c["out_channels"],), jnp.float32)
            p["running_var"] = jnp.ones((c["out_channels"],), jnp.float32)
        params["conv"].append(p)
    for c in _fc_cfgs(configs):
        key, k1, k2 = jax.random.split(key, 3)
        w = 0.1 * jax.random.normal(
            k1, (c["out_features"], c["in_features"]), jnp.float32)  # (out, in)
        b = 0.1 * jax.random.normal(k2, (c["out_features"],), jnp.float32)
        params["fc"].append({"w": w, "b": b})
    return params


def pack_params(params, configs, height, width):
    """One-time weight repack outside the hot path."""
    _, _, feat = _build_plan(configs, height, width)
    packed = []
    for c, p in zip(_conv_cfgs(configs), params["conv"]):
        w, b = p["w"], p["b"]
        if c.get("batch_norm"):
            # TODO(synk): BatchNorm uses eval-mode running statistics; the
            # training-mode batch-statistics update is not reproduced.
            scale = p["gamma"] / jnp.sqrt(p["running_var"] + BN_EPS)
            shift = p["beta"] + (b - p["running_mean"]) * scale
        else:
            scale = jnp.ones_like(b)
            shift = b
        # (Cout,Cin,kh,kw) -> (kh,kw,Cin,Cout), BN scale folded into columns.
        taps = jnp.transpose(w, (2, 3, 1, 0)) * scale[None, None, None, :]
        packed.append(taps.astype(jnp.bfloat16))
        packed.append(shift.reshape(1, -1).astype(jnp.float32))

    fcs = _fc_cfgs(configs)
    hf, wf, cf = feat["h"], feat["w"], feat["c"]
    for n, (c, p) in enumerate(zip(fcs, params["fc"])):
        w, b = p["w"], p["b"]
        if n == 0:
            # torch flatten order is (C,H,W); repack rows to per-pixel (H,W,C,out).
            w = w.reshape(c["out_features"], cf, hf, wf).transpose(2, 3, 1, 0)
        else:
            w = w.T                                    # (in, out)
        packed.append(w.astype(jnp.bfloat16))
        packed.append(b.reshape(1, -1).astype(jnp.float32))
    return packed


# -----------------------------------------------------------------------------
# Forward builder
# -----------------------------------------------------------------------------
def _full_spec(shape):
    nd = len(shape)
    return pl.BlockSpec(shape, lambda i, _nd=nd: (0,) * _nd)


def make_forward(configs, batch, height, width):
    plan, scratch_hwc, feat = _build_plan(configs, height, width)
    fcs = _fc_cfgs(configs)
    pad0 = _conv_cfgs(configs)[0]["padding"]
    num_classes = fcs[-1]["out_features"]

    def forward(packed, x_nchw):
        # NCHW -> NHWC + spatial padding for the first conv (tiny, one-time).
        x = jnp.transpose(x_nchw, (0, 2, 3, 1)).astype(jnp.float32)
        if pad0:
            x = jnp.pad(x, ((0, 0), (pad0, pad0), (pad0, pad0), (0, 0)))
        inputs = [x] + list(packed)
        kernel = _make_fused_kernel(plan, fcs, feat, batch, len(inputs))
        return pl.pallas_call(
            kernel,
            out_shape=jax.ShapeDtypeStruct((batch, num_classes), jnp.float32),
            grid=(1,),
            in_specs=[_full_spec(a.shape) for a in inputs],
            out_specs=_full_spec((batch, num_classes)),
            scratch_shapes=[pltpu.VMEM((batch,) + hwc, jnp.float32)
                            for hwc in scratch_hwc],
            compiler_params=pltpu.CompilerParams(
                dimension_semantics=("arbitrary",)),
        )(*inputs)

    return forward


if __name__ == "__main__":
    key = jax.random.PRNGKey(0)
    key, pkey, xkey = jax.random.split(key, 3)
    params = init_params(MODEL_CONFIGS, pkey)

    # Input matching the first conv layer: NCHW (batch=2, channels=4, 16x16).
    B, C, H, W = 2, 4, 16, 16
    x = jax.random.normal(xkey, (B, C, H, W), jnp.float32)

    packed = pack_params(params, MODEL_CONFIGS, H, W)   # one-time, outside jit
    fwd = jax.jit(make_forward(MODEL_CONFIGS, B, H, W))
    out = jax.block_until_ready(fwd(packed, x))

    assert out.shape == (B, MODEL_CONFIGS["fully_connected"]["1"]["out_features"])
    assert bool(jnp.all(jnp.isfinite(out)))
    row_sums = jnp.sum(out, axis=1)
    # bf16 matmul operands + approx reciprocal in softmax -> loose tolerance.
    assert bool(jnp.all(jnp.abs(row_sums - 1.0) < 1e-2)), row_sums

    print("KERNEL_OK")
</pallas_src>

<mosaic_0001>
module attributes {stable_mosaic.version = 11 : i64} {
  func.func @kernel(%arg0: i32, %arg1: memref<2x18x18x4xf32, #tpu.memory_space<vmem>>, %arg2: memref<3x3x4x8xbf16, #tpu.memory_space<vmem>>, %arg3: memref<1x8xf32, #tpu.memory_space<vmem>>, %arg4: memref<3x3x8x16xbf16, #tpu.memory_space<vmem>>, %arg5: memref<1x16xf32, #tpu.memory_space<vmem>>, %arg6: memref<4x4x16x64xbf16, #tpu.memory_space<vmem>>, %arg7: memref<1x64xf32, #tpu.memory_space<vmem>>, %arg8: memref<64x10xbf16, #tpu.memory_space<vmem>>, %arg9: memref<1x10xf32, #tpu.memory_space<vmem>>, %arg10: memref<2x10xf32, #tpu.memory_space<vmem>>, %arg11: memref<2x16x16x8xf32, #tpu.memory_space<vmem>>, %arg12: memref<2x10x10x8xf32, #tpu.memory_space<vmem>>, %arg13: memref<2x8x8x16xf32, #tpu.memory_space<vmem>>, %arg14: memref<2x4x4x16xf32, #tpu.memory_space<vmem>>) attributes {dimension_semantics = [#tpu.dimension_semantics<arbitrary>], iteration_bounds = array<i64: 1>, scalar_prefetch = 0 : i64, scratch_operands = 4 : i64, tpu.core_type = #tpu.core_type<tc>, window_params = [{pipeline_mode = #tpu.pipeline_mode<synchronous>, transform_indices = @transform_0, window_bounds = array<i64: 2, 18, 18, 4>}, {pipeline_mode = #tpu.pipeline_mode<synchronous>, transform_indices = @transform_1, window_bounds = array<i64: 3, 3, 4, 8>}, {pipeline_mode = #tpu.pipeline_mode<synchronous>, transform_indices = @transform_2, window_bounds = array<i64: 1, 8>}, {pipeline_mode = #tpu.pipeline_mode<synchronous>, transform_indices = @transform_3, window_bounds = array<i64: 3, 3, 8, 16>}, {pipeline_mode = #tpu.pipeline_mode<synchronous>, transform_indices = @transform_4, window_bounds = array<i64: 1, 16>}, {pipeline_mode = #tpu.pipeline_mode<synchronous>, transform_indices = @transform_5, window_bounds = array<i64: 4, 4, 16, 64>}, {pipeline_mode = #tpu.pipeline_mode<synchronous>, transform_indices = @transform_6, window_bounds = array<i64: 1, 64>}, {pipeline_mode = #tpu.pipeline_mode<synchronous>, transform_indices = @transform_7, window_bounds = array<i64: 64, 10>}, {pipeline_mode = #tpu.pipeline_mode<synchronous>, transform_indices = @transform_8, window_bounds = array<i64: 1, 10>}, {pipeline_mode = #tpu.pipeline_mode<synchronous>, transform_indices = @transform_9, window_bounds = array<i64: 2, 10>}]} {
    %cst = arith.constant 0.000000e+00 : f32
    %0 = vector.broadcast %cst : f32 to vector<512x8xf32>
    %c0 = arith.constant 0 : index
    %c0_0 = arith.constant 0 : index
    %c0_1 = arith.constant 0 : index
    %c0_2 = arith.constant 0 : index
    %1 = vector.load %arg1[%c0, %c0_0, %c0_1, %c0_2] : memref<2x18x18x4xf32, #tpu.memory_space<vmem>>, vector<2x16x16x4xf32>
    %2 = vector.shape_cast %1 : vector<2x16x16x4xf32> to vector<512x4xf32>
    %3 = arith.truncf %2 : vector<512x4xf32> to vector<512x4xbf16>
    %c0_3 = arith.constant 0 : index
    %c0_4 = arith.constant 0 : index
    %c0_5 = arith.constant 0 : index
    %c0_6 = arith.constant 0 : index
    %4 = vector.load %arg2[%c0_3, %c0_4, %c0_5, %c0_6] : memref<3x3x4x8xbf16, #tpu.memory_space<vmem>>, vector<1x1x4x8xbf16>
    %5 = vector.shape_cast %4 : vector<1x1x4x8xbf16> to vector<4x8xbf16>
    %cst_7 = arith.constant dense<0.000000e+00> : vector<512x8xf32>
    %6 = tpu.matmul %3, %5, %cst_7 {dimension_numbers = #tpu.dot_dimension_numbers<[1], [0], [0], [1], [0, 0, 1, 1], [], []>} : vector<512x4xbf16>, vector<4x8xbf16>, vector<512x8xf32> -> vector<512x8xf32>
    %7 = arith.addf %0, %6 : vector<512x8xf32>
    %c0_8 = arith.constant 0 : index
    %c0_9 = arith.constant 0 : index
    %c1 = arith.constant 1 : index
    %c0_10 = arith.constant 0 : index
    %8 = vector.load %arg1[%c0_8, %c0_9, %c1, %c0_10] : memref<2x18x18x4xf32, #tpu.memory_space<vmem>>, vector<2x16x16x4xf32>
    %9 = vector.shape_cast %8 : vector<2x16x16x4xf32> to vector<512x4xf32>
    %10 = arith.truncf %9 : vector<512x4xf32> to vector<512x4xbf16>
    %c0_11 = arith.constant 0 : index
    %c1_12 = arith.constant 1 : index
    %c0_13 = arith.constant 0 : index
    %c0_14 = arith.constant 0 : index
    %11 = vector.load %arg2[%c0_11, %c1_12, %c0_13, %c0_14] : memref<3x3x4x8xbf16, #tpu.memory_space<vmem>>, vector<1x1x4x8xbf16>
    %12 = vector.shape_cast %11 : vector<1x1x4x8xbf16> to vector<4x8xbf16>
    %cst_15 = arith.constant dense<0.000000e+00> : vector<512x8xf32>
    %13 = tpu.matmul %10, %12, %cst_15 {dimension_numbers = #tpu.dot_dimension_numbers<[1], [0], [0], [1], [0, 0, 1, 1], [], []>} : vector<512x4xbf16>, vector<4x8xbf16>, vector<512x8xf32> -> vector<512x8xf32>
    %14 = arith.addf %7, %13 : vector<512x8xf32>
    %c0_16 = arith.constant 0 : index
    %c0_17 = arith.constant 0 : index
    %c2 = arith.constant 2 : index
    %c0_18 = arith.constant 0 : index
    %15 = vector.load %arg1[%c0_16, %c0_17, %c2, %c0_18] : memref<2x18x18x4xf32, #tpu.memory_space<vmem>>, vector<2x16x16x4xf32>
    %16 = vector.shape_cast %15 : vector<2x16x16x4xf32> to vector<512x4xf32>
    %17 = arith.truncf %16 : vector<512x4xf32> to vector<512x4xbf16>
    %c0_19 = arith.constant 0 : index
    %c2_20 = arith.constant 2 : index
    %c0_21 = arith.constant 0 : index
    %c0_22 = arith.constant 0 : index
    %18 = vector.load %arg2[%c0_19, %c2_20, %c0_21, %c0_22] : memref<3x3x4x8xbf16, #tpu.memory_space<vmem>>, vector<1x1x4x8xbf16>
    %19 = vector.shape_cast %18 : vector<1x1x4x8xbf16> to vector<4x8xbf16>
    %cst_23 = arith.constant dense<0.000000e+00> : vector<512x8xf32>
    %20 = tpu.matmul %17, %19, %cst_23 {dimension_numbers = #tpu.dot_dimension_numbers<[1], [0], [0], [1], [0, 0, 1, 1], [], []>} : vector<512x4xbf16>, vector<4x8xbf16>, vector<512x8xf32> -> vector<512x8xf32>
    %21 = arith.addf %14, %20 : vector<512x8xf32>
    %c0_24 = arith.constant 0 : index
    %c1_25 = arith.constant 1 : index
    %c0_26 = arith.constant 0 : index
    %c0_27 = arith.constant 0 : index
    %22 = vector.load %arg1[%c0_24, %c1_25, %c0_26, %c0_27] : memref<2x18x18x4xf32, #tpu.memory_space<vmem>>, vector<2x16x16x4xf32>
    %23 = vector.shape_cast %22 : vector<2x16x16x4xf32> to vector<512x4xf32>
    %24 = arith.truncf %23 : vector<512x4xf32> to vector<512x4xbf16>
    %c1_28 = arith.constant 1 : index
    %c0_29 = arith.constant 0 : index
    %c0_30 = arith.constant 0 : index
    %c0_31 = arith.constant 0 : index
    %25 = vector.load %arg2[%c1_28, %c0_29, %c0_30, %c0_31] : memref<3x3x4x8xbf16, #tpu.memory_space<vmem>>, vector<1x1x4x8xbf16>
    %26 = vector.shape_cast %25 : vector<1x1x4x8xbf16> to vector<4x8xbf16>
    %cst_32 = arith.constant dense<0.000000e+00> : vector<512x8xf32>
    %27 = tpu.matmul %24, %26, %cst_32 {dimension_numbers = #tpu.dot_dimension_numbers<[1], [0], [0], [1], [0, 0, 1, 1], [], []>} : vector<512x4xbf16>, vector<4x8xbf16>, vector<512x8xf32> -> vector<512x8xf32>
    %28 = arith.addf %21, %27 : vector<512x8xf32>
    %c0_33 = arith.constant 0 : index
    %c1_34 = arith.constant 1 : index
    %c1_35 = arith.constant 1 : index
    %c0_36 = arith.constant 0 : index
    %29 = vector.load %arg1[%c0_33, %c1_34, %c1_35, %c0_36] : memref<2x18x18x4xf32, #tpu.memory_space<vmem>>, vector<2x16x16x4xf32>
    %30 = vector.shape_cast %29 : vector<2x16x16x4xf32> to vector<512x4xf32>
    %31 = arith.truncf %30 : vector<512x4xf32> to vector<512x4xbf16>
    %c1_37 = arith.constant 1 : index
    %c1_38 = arith.constant 1 : index
    %c0_39 = arith.constant 0 : index
    %c0_40 = arith.constant 0 : index
    %32 = vector.load %arg2[%c1_37, %c1_38, %c0_39, %c0_40] : memref<3x3x4x8xbf16, #tpu.memory_space<vmem>>, vector<1x1x4x8xbf16>
    %33 = vector.shape_cast %32 : vector<1x1x4x8xbf16> to vector<4x8xbf16>
    %cst_41 = arith.constant dense<0.000000e+00> : vector<512x8xf32>
    %34 = tpu.matmul %31, %33, %cst_41 {dimension_numbers = #tpu.dot_dimension_numbers<[1], [0], [0], [1], [0, 0, 1, 1], [], []>} : vector<512x4xbf16>, vector<4x8xbf16>, vector<512x8xf32> -> vector<512x8xf32>
    %35 = arith.addf %28, %34 : vector<512x8xf32>
    %c0_42 = arith.constant 0 : index
    %c1_43 = arith.constant 1 : index
    %c2_44 = arith.constant 2 : index
    %c0_45 = arith.constant 0 : index
    %36 = vector.load %arg1[%c0_42, %c1_43, %c2_44, %c0_45] : memref<2x18x18x4xf32, #tpu.memory_space<vmem>>, vector<2x16x16x4xf32>
    %37 = vector.shape_cast %36 : vector<2x16x16x4xf32> to vector<512x4xf32>
    %38 = arith.truncf %37 : vector<512x4xf32> to vector<512x4xbf16>
    %c1_46 = arith.constant 1 : index
    %c2_47 = arith.constant 2 : index
    %c0_48 = arith.constant 0 : index
    %c0_49 = arith.constant 0 : index
    %39 = vector.load %arg2[%c1_46, %c2_47, %c0_48, %c0_49] : memref<3x3x4x8xbf16, #tpu.memory_space<vmem>>, vector<1x1x4x8xbf16>
    %40 = vector.shape_cast %39 : vector<1x1x4x8xbf16> to vector<4x8xbf16>
    %cst_50 = arith.constant dense<0.000000e+00> : vector<512x8xf32>
    %41 = tpu.matmul %38, %40, %cst_50 {dimension_numbers = #tpu.dot_dimension_numbers<[1], [0], [0], [1], [0, 0, 1, 1], [], []>} : vector<512x4xbf16>, vector<4x8xbf16>, vector<512x8xf32> -> vector<512x8xf32>
    %42 = arith.addf %35, %41 : vector<512x8xf32>
    %c0_51 = arith.constant 0 : index
    %c2_52 = arith.constant 2 : index
    %c0_53 = arith.constant 0 : index
    %c0_54 = arith.constant 0 : index
    %43 = vector.load %arg1[%c0_51, %c2_52, %c0_53, %c0_54] : memref<2x18x18x4xf32, #tpu.memory_space<vmem>>, vector<2x16x16x4xf32>
    %44 = vector.shape_cast %43 : vector<2x16x16x4xf32> to vector<512x4xf32>
    %45 = arith.truncf %44 : vector<512x4xf32> to vector<512x4xbf16>
    %c2_55 = arith.constant 2 : index
    %c0_56 = arith.constant 0 : index
    %c0_57 = arith.constant 0 : index
    %c0_58 = arith.constant 0 : index
    %46 = vector.load %arg2[%c2_55, %c0_56, %c0_57, %c0_58] : memref<3x3x4x8xbf16, #tpu.memory_space<vmem>>, vector<1x1x4x8xbf16>
    %47 = vector.shape_cast %46 : vector<1x1x4x8xbf16> to vector<4x8xbf16>
    %cst_59 = arith.constant dense<0.000000e+00> : vector<512x8xf32>
    %48 = tpu.matmul %45, %47, %cst_59 {dimension_numbers = #tpu.dot_dimension_numbers<[1], [0], [0], [1], [0, 0, 1, 1], [], []>} : vector<512x4xbf16>, vector<4x8xbf16>, vector<512x8xf32> -> vector<512x8xf32>
    %49 = arith.addf %42, %48 : vector<512x8xf32>
    %c0_60 = arith.constant 0 : index
    %c2_61 = arith.constant 2 : index
    %c1_62 = arith.constant 1 : index
    %c0_63 = arith.constant 0 : index
    %50 = vector.load %arg1[%c0_60, %c2_61, %c1_62, %c0_63] : memref<2x18x18x4xf32, #tpu.memory_space<vmem>>, vector<2x16x16x4xf32>
    %51 = vector.shape_cast %50 : vector<2x16x16x4xf32> to vector<512x4xf32>
    %52 = arith.truncf %51 : vector<512x4xf32> to vector<512x4xbf16>
    %c2_64 = arith.constant 2 : index
    %c1_65 = arith.constant 1 : index
    %c0_66 = arith.constant 0 : index
    %c0_67 = arith.constant 0 : index
    %53 = vector.load %arg2[%c2_64, %c1_65, %c0_66, %c0_67] : memref<3x3x4x8xbf16, #tpu.memory_space<vmem>>, vector<1x1x4x8xbf16>
    %54 = vector.shape_cast %53 : vector<1x1x4x8xbf16> to vector<4x8xbf16>
    %cst_68 = arith.constant dense<0.000000e+00> : vector<512x8xf32>
    %55 = tpu.matmul %52, %54, %cst_68 {dimension_numbers = #tpu.dot_dimension_numbers<[1], [0], [0], [1], [0, 0, 1, 1], [], []>} : vector<512x4xbf16>, vector<4x8xbf16>, vector<512x8xf32> -> vector<512x8xf32>
    %56 = arith.addf %49, %55 : vector<512x8xf32>
    %c0_69 = arith.constant 0 : index
    %c2_70 = arith.constant 2 : index
    %c2_71 = arith.constant 2 : index
    %c0_72 = arith.constant 0 : index
    %57 = vector.load %arg1[%c0_69, %c2_70, %c2_71, %c0_72] : memref<2x18x18x4xf32, #tpu.memory_space<vmem>>, vector<2x16x16x4xf32>
    %58 = vector.shape_cast %57 : vector<2x16x16x4xf32> to vector<512x4xf32>
    %59 = arith.truncf %58 : vector<512x4xf32> to vector<512x4xbf16>
    %c2_73 = arith.constant 2 : index
    %c2_74 = arith.constant 2 : index
    %c0_75 = arith.constant 0 : index
    %c0_76 = arith.constant 0 : index
    %60 = vector.load %arg2[%c2_73, %c2_74, %c0_75, %c0_76] : memref<3x3x4x8xbf16, #tpu.memory_space<vmem>>, vector<1x1x4x8xbf16>
    %61 = vector.shape_cast %60 : vector<1x1x4x8xbf16> to vector<4x8xbf16>
    %cst_77 = arith.constant dense<0.000000e+00> : vector<512x8xf32>
    %62 = tpu.matmul %59, %61, %cst_77 {dimension_numbers = #tpu.dot_dimension_numbers<[1], [0], [0], [1], [0, 0, 1, 1], [], []>} : vector<512x4xbf16>, vector<4x8xbf16>, vector<512x8xf32> -> vector<512x8xf32>
    %63 = arith.addf %56, %62 : vector<512x8xf32>
    %c0_78 = arith.constant 0 : index
    %c0_79 = arith.constant 0 : index
    %64 = vector.load %arg3[%c0_78, %c0_79] : memref<1x8xf32, #tpu.memory_space<vmem>>, vector<1x8xf32>
    %65 = vector.broadcast %64 : vector<1x8xf32> to vector<512x8xf32>
    %66 = arith.addf %63, %65 : vector<512x8xf32>
    %cst_80 = arith.constant 0.000000e+00 : f32
    %67 = vector.broadcast %cst_80 : f32 to vector<512x8xf32>
    %68 = arith.maximumf %66, %67 : vector<512x8xf32>
    %69 = vector.shape_cast %68 : vector<512x8xf32> to vector<2x16x16x8xf32>
    %c0_81 = arith.constant 0 : index
    %c0_82 = arith.constant 0 : index
    %c0_83 = arith.constant 0 : index
    %c0_84 = arith.constant 0 : index
    %70 = vector.load %arg11[%c0_81, %c0_82, %c0_83, %c0_84] : memref<2x16x16x8xf32, #tpu.memory_space<vmem>>, vector<2x16x16x8xf32>
    tpu.vector_store %arg11[%c0_81, %c0_82, %c0_83, %c0_84], %69 {strides = array<i32>} : memref<2x16x16x8xf32, #tpu.memory_space<vmem>>, vector<2x16x16x8xf32>,
    %c0_85 = arith.constant 0 : index
    %c0_86 = arith.constant 0 : index
    %c0_87 = arith.constant 0 : index
    %c0_88 = arith.constant 0 : index
    %71 = tpu.strided_load %arg11[%c0_85, %c0_86, %c0_87, %c0_88] {strides = array<i32: 1, 2, 2, 1>} : memref<2x16x16x8xf32, #tpu.memory_space<vmem>>, vector<2x8x8x8xf32>
    %c0_89 = arith.constant 0 : index
    %c0_90 = arith.constant 0 : index
    %c1_91 = arith.constant 1 : index
    %c0_92 = arith.constant 0 : index
    %72 = tpu.strided_load %arg11[%c0_89, %c0_90, %c1_91, %c0_92] {strides = array<i32: 1, 2, 2, 1>} : memref<2x16x16x8xf32, #tpu.memory_space<vmem>>, vector<2x8x8x8xf32>
    %73 = arith.maximumf %71, %72 : vector<2x8x8x8xf32>
    %c0_93 = arith.constant 0 : index
    %c1_94 = arith.constant 1 : index
    %c0_95 = arith.constant 0 : index
    %c0_96 = arith.constant 0 : index
    %74 = tpu.strided_load %arg11[%c0_93, %c1_94, %c0_95, %c0_96] {strides = array<i32: 1, 2, 2, 1>} : memref<2x16x16x8xf32, #tpu.memory_space<vmem>>, vector<2x8x8x8xf32>
    %75 = arith.maximumf %73, %74 : vector<2x8x8x8xf32>
    %c0_97 = arith.constant 0 : index
    %c1_98 = arith.constant 1 : index
    %c1_99 = arith.constant 1 : index
    %c0_100 = arith.constant 0 : index
    %76 = tpu.strided_load %arg11[%c0_97, %c1_98, %c1_99, %c0_100] {strides = array<i32: 1, 2, 2, 1>} : memref<2x16x16x8xf32, #tpu.memory_space<vmem>>, vector<2x8x8x8xf32>
    %77 = arith.maximumf %75, %76 : vector<2x8x8x8xf32>
    %cst_101 = arith.constant 0.000000e+00 : f32
    %78 = vector.broadcast %cst_101 : f32 to vector<2x10x10x8xf32>
    %c0_102 = arith.constant 0 : index
    %c0_103 = arith.constant 0 : index
    %c0_104 = arith.constant 0 : index
    %c0_105 = arith.constant 0 : index
    %79 = vector.load %arg12[%c0_102, %c0_103, %c0_104, %c0_105] : memref<2x10x10x8xf32, #tpu.memory_space<vmem>>, vector<2x10x10x8xf32>
    tpu.vector_store %arg12[%c0_102, %c0_103, %c0_104, %c0_105], %78 {strides = array<i32>} : memref<2x10x10x8xf32, #tpu.memory_space<vmem>>, vector<2x10x10x8xf32>,
    %c0_106 = arith.constant 0 : index
    %c1_107 = arith.constant 1 : index
    %c1_108 = arith.constant 1 : index
    %c0_109 = arith.constant 0 : index
    %80 = vector.load %arg12[%c0_106, %c1_107, %c1_108, %c0_109] : memref<2x10x10x8xf32, #tpu.memory_space<vmem>>, vector<2x8x8x8xf32>
    tpu.vector_store %arg12[%c0_106, %c1_107, %c1_108, %c0_109], %77 {strides = array<i32>} : memref<2x10x10x8xf32, #tpu.memory_space<vmem>>, vector<2x8x8x8xf32>,
    %cst_110 = arith.constant 0.000000e+00 : f32
    %81 = vector.broadcast %cst_110 : f32 to vector<128x16xf32>
    %c0_111 = arith.constant 0 : index
    %c0_112 = arith.constant 0 : index
    %c0_113 = arith.constant 0 : index
    %c0_114 = arith.constant 0 : index
    %82 = vector.load %arg12[%c0_111, %c0_112, %c0_113, %c0_114] : memref<2x10x10x8xf32, #tpu.memory_space<vmem>>, vector<2x8x8x8xf32>
    %83 = vector.shape_cast %82 : vector<2x8x8x8xf32> to vector<128x8xf32>
    %84 = arith.truncf %83 : vector<128x8xf32> to vector<128x8xbf16>
    %c0_115 = arith.constant 0 : index
    %c0_116 = arith.constant 0 : index
    %c0_117 = arith.constant 0 : index
    %c0_118 = arith.constant 0 : index
    %85 = vector.load %arg4[%c0_115, %c0_116, %c0_117, %c0_118] : memref<3x3x8x16xbf16, #tpu.memory_space<vmem>>, vector<1x1x8x16xbf16>
    %86 = vector.shape_cast %85 : vector<1x1x8x16xbf16> to vector<8x16xbf16>
    %cst_119 = arith.constant dense<0.000000e+00> : vector<128x16xf32>
    %87 = tpu.matmul %84, %86, %cst_119 {dimension_numbers = #tpu.dot_dimension_numbers<[1], [0], [0], [1], [0, 0, 1, 1], [], []>} : vector<128x8xbf16>, vector<8x16xbf16>, vector<128x16xf32> -> vector<128x16xf32>
    %88 = arith.addf %81, %87 : vector<128x16xf32>
    %c0_120 = arith.constant 0 : index
    %c0_121 = arith.constant 0 : index
    %c1_122 = arith.constant 1 : index
    %c0_123 = arith.constant 0 : index
    %89 = vector.load %arg12[%c0_120, %c0_121, %c1_122, %c0_123] : memref<2x10x10x8xf32, #tpu.memory_space<vmem>>, vector<2x8x8x8xf32>
    %90 = vector.shape_cast %89 : vector<2x8x8x8xf32> to vector<128x8xf32>
    %91 = arith.truncf %90 : vector<128x8xf32> to vector<128x8xbf16>
    %c0_124 = arith.constant 0 : index
    %c1_125 = arith.constant 1 : index
    %c0_126 = arith.constant 0 : index
    %c0_127 = arith.constant 0 : index
    %92 = vector.load %arg4[%c0_124, %c1_125, %c0_126, %c0_127] : memref<3x3x8x16xbf16, #tpu.memory_space<vmem>>, vector<1x1x8x16xbf16>
    %93 = vector.shape_cast %92 : vector<1x1x8x16xbf16> to vector<8x16xbf16>
    %cst_128 = arith.constant dense<0.000000e+00> : vector<128x16xf32>
    %94 = tpu.matmul %91, %93, %cst_128 {dimension_numbers = #tpu.dot_dimension_numbers<[1], [0], [0], [1], [0, 0, 1, 1], [], []>} : vector<128x8xbf16>, vector<8x16xbf16>, vector<128x16xf32> -> vector<128x16xf32>
    %95 = arith.addf %88, %94 : vector<128x16xf32>
    %c0_129 = arith.constant 0 : index
    %c0_130 = arith.constant 0 : index
    %c2_131 = arith.constant 2 : index
    %c0_132 = arith.constant 0 : index
    %96 = vector.load %arg12[%c0_129, %c0_130, %c2_131, %c0_132] : memref<2x10x10x8xf32, #tpu.memory_space<vmem>>, vector<2x8x8x8xf32>
    %97 = vector.shape_cast %96 : vector<2x8x8x8xf32> to vector<128x8xf32>
    %98 = arith.truncf %97 : vector<128x8xf32> to vector<128x8xbf16>
    %c0_133 = arith.constant 0 : index
    %c2_134 = arith.constant 2 : index
    %c0_135 = arith.constant 0 : index
    %c0_136 = arith.constant 0 : index
    %99 = vector.load %arg4[%c0_133, %c2_134, %c0_135, %c0_136] : memref<3x3x8x16xbf16, #tpu.memory_space<vmem>>, vector<1x1x8x16xbf16>
    %100 = vector.shape_cast %99 : vector<1x1x8x16xbf16> to vector<8x16xbf16>
    %cst_137 = arith.constant dense<0.000000e+00> : vector<128x16xf32>
    %101 = tpu.matmul %98, %100, %cst_137 {dimension_numbers = #tpu.dot_dimension_numbers<[1], [0], [0], [1], [0, 0, 1, 1], [], []>} : vector<128x8xbf16>, vector<8x16xbf16>, vector<128x16xf32> -> vector<128x16xf32>
    %102 = arith.addf %95, %101 : vector<128x16xf32>
    %c0_138 = arith.constant 0 : index
    %c1_139 = arith.constant 1 : index
    %c0_140 = arith.constant 0 : index
    %c0_141 = arith.constant 0 : index
    %103 = vector.load %arg12[%c0_138, %c1_139, %c0_140, %c0_141] : memref<2x10x10x8xf32, #tpu.memory_space<vmem>>, vector<2x8x8x8xf32>
    %104 = vector.shape_cast %103 : vector<2x8x8x8xf32> to vector<128x8xf32>
    %105 = arith.truncf %104 : vector<128x8xf32> to vector<128x8xbf16>
    %c1_142 = arith.constant 1 : index
    %c0_143 = arith.constant 0 : index
    %c0_144 = arith.constant 0 : index
    %c0_145 = arith.constant 0 : index
    %106 = vector.load %arg4[%c1_142, %c0_143, %c0_144, %c0_145] : memref<3x3x8x16xbf16, #tpu.memory_space<vmem>>, vector<1x1x8x16xbf16>
    %107 = vector.shape_cast %106 : vector<1x1x8x16xbf16> to vector<8x16xbf16>
    %cst_146 = arith.constant dense<0.000000e+00> : vector<128x16xf32>
    %108 = tpu.matmul %105, %107, %cst_146 {dimension_numbers = #tpu.dot_dimension_numbers<[1], [0], [0], [1], [0, 0, 1, 1], [], []>} : vector<128x8xbf16>, vector<8x16xbf16>, vector<128x16xf32> -> vector<128x16xf32>
    %109 = arith.addf %102, %108 : vector<128x16xf32>
    %c0_147 = arith.constant 0 : index
    %c1_148 = arith.constant 1 : index
    %c1_149 = arith.constant 1 : index
    %c0_150 = arith.constant 0 : index
    %110 = vector.load %arg12[%c0_147, %c1_148, %c1_149, %c0_150] : memref<2x10x10x8xf32, #tpu.memory_space<vmem>>, vector<2x8x8x8xf32>
    %111 = vector.shape_cast %110 : vector<2x8x8x8xf32> to vector<128x8xf32>
    %112 = arith.truncf %111 : vector<128x8xf32> to vector<128x8xbf16>
    %c1_151 = arith.constant 1 : index
    %c1_152 = arith.constant 1 : index
    %c0_153 = arith.constant 0 : index
    %c0_154 = arith.constant 0 : index
    %113 = vector.load %arg4[%c1_151, %c1_152, %c0_153, %c0_154] : memref<3x3x8x16xbf16, #tpu.memory_space<vmem>>, vector<1x1x8x16xbf16>
    %114 = vector.shape_cast %113 : vector<1x1x8x16xbf16> to vector<8x16xbf16>
    %cst_155 = arith.constant dense<0.000000e+00> : vector<128x16xf32>
    %115 = tpu.matmul %112, %114, %cst_155 {dimension_numbers = #tpu.dot_dimension_numbers<[1], [0], [0], [1], [0, 0, 1, 1], [], []>} : vector<128x8xbf16>, vector<8x16xbf16>, vector<128x16xf32> -> vector<128x16xf32>
    %116 = arith.addf %109, %115 : vector<128x16xf32>
    %c0_156 = arith.constant 0 : index
    %c1_157 = arith.constant 1 : index
    %c2_158 = arith.constant 2 : index
    %c0_159 = arith.constant 0 : index
    %117 = vector.load %arg12[%c0_156, %c1_157, %c2_158, %c0_159] : memref<2x10x10x8xf32, #tpu.memory_space<vmem>>, vector<2x8x8x8xf32>
    %118 = vector.shape_cast %117 : vector<2x8x8x8xf32> to vector<128x8xf32>
    %119 = arith.truncf %118 : vector<128x8xf32> to vector<128x8xbf16>
    %c1_160 = arith.constant 1 : index
    %c2_161 = arith.constant 2 : index
    %c0_162 = arith.constant 0 : index
    %c0_163 = arith.constant 0 : index
    %120 = vector.load %arg4[%c1_160, %c2_161, %c0_162, %c0_163] : memref<3x3x8x16xbf16, #tpu.memory_space<vmem>>, vector<1x1x8x16xbf16>
    %121 = vector.shape_cast %120 : vector<1x1x8x16xbf16> to vector<8x16xbf16>
    %cst_164 = arith.constant dense<0.000000e+00> : vector<128x16xf32>
    %122 = tpu.matmul %119, %121, %cst_164 {dimension_numbers = #tpu.dot_dimension_numbers<[1], [0], [0], [1], [0, 0, 1, 1], [], []>} : vector<128x8xbf16>, vector<8x16xbf16>, vector<128x16xf32> -> vector<128x16xf32>
    %123 = arith.addf %116, %122 : vector<128x16xf32>
    %c0_165 = arith.constant 0 : index
    %c2_166 = arith.constant 2 : index
    %c0_167 = arith.constant 0 : index
    %c0_168 = arith.constant 0 : index
    %124 = vector.load %arg12[%c0_165, %c2_166, %c0_167, %c0_168] : memref<2x10x10x8xf32, #tpu.memory_space<vmem>>, vector<2x8x8x8xf32>
    %125 = vector.shape_cast %124 : vector<2x8x8x8xf32> to vector<128x8xf32>
    %126 = arith.truncf %125 : vector<128x8xf32> to vector<128x8xbf16>
    %c2_169 = arith.constant 2 : index
    %c0_170 = arith.constant 0 : index
    %c0_171 = arith.constant 0 : index
    %c0_172 = arith.constant 0 : index
    %127 = vector.load %arg4[%c2_169, %c0_170, %c0_171, %c0_172] : memref<3x3x8x16xbf16, #tpu.memory_space<vmem>>, vector<1x1x8x16xbf16>
    %128 = vector.shape_cast %127 : vector<1x1x8x16xbf16> to vector<8x16xbf16>
    %cst_173 = arith.constant dense<0.000000e+00> : vector<128x16xf32>
    %129 = tpu.matmul %126, %128, %cst_173 {dimension_numbers = #tpu.dot_dimension_numbers<[1], [0], [0], [1], [0, 0, 1, 1], [], []>} : vector<128x8xbf16>, vector<8x16xbf16>, vector<128x16xf32> -> vector<128x16xf32>
    %130 = arith.addf %123, %129 : vector<128x16xf32>
    %c0_174 = arith.constant 0 : index
    %c2_175 = arith.constant 2 : index
    %c1_176 = arith.constant 1 : index
    %c0_177 = arith.constant 0 : index
    %131 = vector.load %arg12[%c0_174, %c2_175, %c1_176, %c0_177] : memref<2x10x10x8xf32, #tpu.memory_space<vmem>>, vector<2x8x8x8xf32>
    %132 = vector.shape_cast %131 : vector<2x8x8x8xf32> to vector<128x8xf32>
    %133 = arith.truncf %132 : vector<128x8xf32> to vector<128x8xbf16>
    %c2_178 = arith.constant 2 : index
    %c1_179 = arith.constant 1 : index
    %c0_180 = arith.constant 0 : index
    %c0_181 = arith.constant 0 : index
    %134 = vector.load %arg4[%c2_178, %c1_179, %c0_180, %c0_181] : memref<3x3x8x16xbf16, #tpu.memory_space<vmem>>, vector<1x1x8x16xbf16>
    %135 = vector.shape_cast %134 : vector<1x1x8x16xbf16> to vector<8x16xbf16>
    %cst_182 = arith.constant dense<0.000000e+00> : vector<128x16xf32>
    %136 = tpu.matmul %133, %135, %cst_182 {dimension_numbers = #tpu.dot_dimension_numbers<[1], [0], [0], [1], [0, 0, 1, 1], [], []>} : vector<128x8xbf16>, vector<8x16xbf16>, vector<128x16xf32> -> vector<128x16xf32>
    %137 = arith.addf %130, %136 : vector<128x16xf32>
    %c0_183 = arith.constant 0 : index
    %c2_184 = arith.constant 2 : index
    %c2_185 = arith.constant 2 : index
    %c0_186 = arith.constant 0 : index
    %138 = vector.load %arg12[%c0_183, %c2_184, %c2_185, %c0_186] : memref<2x10x10x8xf32, #tpu.memory_space<vmem>>, vector<2x8x8x8xf32>
    %139 = vector.shape_cast %138 : vector<2x8x8x8xf32> to vector<128x8xf32>
    %140 = arith.truncf %139 : vector<128x8xf32> to vector<128x8xbf16>
    %c2_187 = arith.constant 2 : index
    %c2_188 = arith.constant 2 : index
    %c0_189 = arith.constant 0 : index
    %c0_190 = arith.constant 0 : index
    %141 = vector.load %arg4[%c2_187, %c2_188, %c0_189, %c0_190] : memref<3x3x8x16xbf16, #tpu.memory_space<vmem>>, vector<1x1x8x16xbf16>
    %142 = vector.shape_cast %141 : vector<1x1x8x16xbf16> to vector<8x16xbf16>
    %cst_191 = arith.constant dense<0.000000e+00> : vector<128x16xf32>
    %143 = tpu.matmul %140, %142, %cst_191 {dimension_numbers = #tpu.dot_dimension_numbers<[1], [0], [0], [1], [0, 0, 1, 1], [], []>} : vector<128x8xbf16>, vector<8x16xbf16>, vector<128x16xf32> -> vector<128x16xf32>
    %144 = arith.addf %137, %143 : vector<128x16xf32>
    %c0_192 = arith.constant 0 : index
    %c0_193 = arith.constant 0 : index
    %145 = vector.load %arg5[%c0_192, %c0_193] : memref<1x16xf32, #tpu.memory_space<vmem>>, vector<1x16xf32>
    %146 = vector.broadcast %145 : vector<1x16xf32> to vector<128x16xf32>
    %147 = arith.addf %144, %146 : vector<128x16xf32>
    %cst_194 = arith.constant 0.000000e+00 : f32
    %148 = vector.broadcast %cst_194 : f32 to vector<128x16xf32>
    %149 = arith.maximumf %147, %148 : vector<128x16xf32>
    %150 = vector.shape_cast %149 : vector<128x16xf32> to vector<2x8x8x16xf32>
    %c0_195 = arith.constant 0 : index
    %c0_196 = arith.constant 0 : index
    %c0_197 = arith.constant 0 : index
    %c0_198 = arith.constant 0 : index
    %151 = vector.load %arg13[%c0_195, %c0_196, %c0_197, %c0_198] : memref<2x8x8x16xf32, #tpu.memory_space<vmem>>, vector<2x8x8x16xf32>
    tpu.vector_store %arg13[%c0_195, %c0_196, %c0_197, %c0_198], %150 {strides = array<i32>} : memref<2x8x8x16xf32, #tpu.memory_space<vmem>>, vector<2x8x8x16xf32>,
    %c0_199 = arith.constant 0 : index
    %c0_200 = arith.constant 0 : index
    %c0_201 = arith.constant 0 : index
    %c0_202 = arith.constant 0 : index
    %152 = tpu.strided_load %arg13[%c0_199, %c0_200, %c0_201, %c0_202] {strides = array<i32: 1, 2, 2, 1>} : memref<2x8x8x16xf32, #tpu.memory_space<vmem>>, vector<2x4x4x16xf32>
    %c0_203 = arith.constant 0 : index
    %c0_204 = arith.constant 0 : index
    %c1_205 = arith.constant 1 : index
    %c0_206 = arith.constant 0 : index
    %153 = tpu.strided_load %arg13[%c0_203, %c0_204, %c1_205, %c0_206] {strides = array<i32: 1, 2, 2, 1>} : memref<2x8x8x16xf32, #tpu.memory_space<vmem>>, vector<2x4x4x16xf32>
    %154 = arith.maximumf %152, %153 : vector<2x4x4x16xf32>
    %c0_207 = arith.constant 0 : index
    %c1_208 = arith.constant 1 : index
    %c0_209 = arith.constant 0 : index
    %c0_210 = arith.constant 0 : index
    %155 = tpu.strided_load %arg13[%c0_207, %c1_208, %c0_209, %c0_210] {strides = array<i32: 1, 2, 2, 1>} : memref<2x8x8x16xf32, #tpu.memory_space<vmem>>, vector<2x4x4x16xf32>
    %156 = arith.maximumf %154, %155 : vector<2x4x4x16xf32>
    %c0_211 = arith.constant 0 : index
    %c1_212 = arith.constant 1 : index
    %c1_213 = arith.constant 1 : index
    %c0_214 = arith.constant 0 : index
    %157 = tpu.strided_load %arg13[%c0_211, %c1_212, %c1_213, %c0_214] {strides = array<i32: 1, 2, 2, 1>} : memref<2x8x8x16xf32, #tpu.memory_space<vmem>>, vector<2x4x4x16xf32>
    %158 = arith.maximumf %156, %157 : vector<2x4x4x16xf32>
    %c0_215 = arith.constant 0 : index
    %c0_216 = arith.constant 0 : index
    %c0_217 = arith.constant 0 : index
    %c0_218 = arith.constant 0 : index
    %159 = vector.load %arg14[%c0_215, %c0_216, %c0_217, %c0_218] : memref<2x4x4x16xf32, #tpu.memory_space<vmem>>, vector<2x4x4x16xf32>
    tpu.vector_store %arg14[%c0_215, %c0_216, %c0_217, %c0_218], %158 {strides = array<i32>} : memref<2x4x4x16xf32, #tpu.memory_space<vmem>>, vector<2x4x4x16xf32>,
    %cst_219 = arith.constant 0.000000e+00 : f32
    %160 = vector.broadcast %cst_219 : f32 to vector<2x64xf32>
    %c0_220 = arith.constant 0 : index
    %c0_221 = arith.constant 0 : index
    %c0_222 = arith.constant 0 : index
    %c0_223 = arith.constant 0 : index
    %161 = vector.load %arg14[%c0_220, %c0_221, %c0_222, %c0_223] : memref<2x4x4x16xf32, #tpu.memory_space<vmem>>, vector<2x1x1x16xf32>
    %162 = vector.shape_cast %161 : vector<2x1x1x16xf32> to vector<2x16xf32>
    %163 = arith.truncf %162 : vector<2x16xf32> to vector<2x16xbf16>
    %c0_224 = arith.constant 0 : index
    %c0_225 = arith.constant 0 : index
    %c0_226 = arith.constant 0 : index
    %c0_227 = arith.constant 0 : index
    %164 = vector.load %arg6[%c0_224, %c0_225, %c0_226, %c0_227] : memref<4x4x16x64xbf16, #tpu.memory_space<vmem>>, vector<1x1x16x64xbf16>
    %165 = vector.shape_cast %164 : vector<1x1x16x64xbf16> to vector<16x64xbf16>
    %cst_228 = arith.constant dense<0.000000e+00> : vector<2x64xf32>
    %166 = tpu.matmul %163, %165, %cst_228 {dimension_numbers = #tpu.dot_dimension_numbers<[1], [0], [0], [1], [0, 0, 1, 1], [], []>} : vector<2x16xbf16>, vector<16x64xbf16>, vector<2x64xf32> -> vector<2x64xf32>
    %167 = arith.addf %160, %166 : vector<2x64xf32>
    %c0_229 = arith.constant 0 : index
    %c0_230 = arith.constant 0 : index
    %c1_231 = arith.constant 1 : index
    %c0_232 = arith.constant 0 : index
    %168 = vector.load %arg14[%c0_229, %c0_230, %c1_231, %c0_232] : memref<2x4x4x16xf32, #tpu.memory_space<vmem>>, vector<2x1x1x16xf32>
    %169 = vector.shape_cast %168 : vector<2x1x1x16xf32> to vector<2x16xf32>
    %170 = arith.truncf %169 : vector<2x16xf32> to vector<2x16xbf16>
    %c0_233 = arith.constant 0 : index
    %c1_234 = arith.constant 1 : index
    %c0_235 = arith.constant 0 : index
    %c0_236 = arith.constant 0 : index
    %171 = vector.load %arg6[%c0_233, %c1_234, %c0_235, %c0_236] : memref<4x4x16x64xbf16, #tpu.memory_space<vmem>>, vector<1x1x16x64xbf16>
    %172 = vector.shape_cast %171 : vector<1x1x16x64xbf16> to vector<16x64xbf16>
    %cst_237 = arith.constant dense<0.000000e+00> : vector<2x64xf32>
    %173 = tpu.matmul %170, %172, %cst_237 {dimension_numbers = #tpu.dot_dimension_numbers<[1], [0], [0], [1], [0, 0, 1, 1], [], []>} : vector<2x16xbf16>, vector<16x64xbf16>, vector<2x64xf32> -> vector<2x64xf32>
    %174 = arith.addf %167, %173 : vector<2x64xf32>
    %c0_238 = arith.constant 0 : index
    %c0_239 = arith.constant 0 : index
    %c2_240 = arith.constant 2 : index
    %c0_241 = arith.constant 0 : index
    %175 = vector.load %arg14[%c0_238, %c0_239, %c2_240, %c0_241] : memref<2x4x4x16xf32, #tpu.memory_space<vmem>>, vector<2x1x1x16xf32>
    %176 = vector.shape_cast %175 : vector<2x1x1x16xf32> to vector<2x16xf32>
    %177 = arith.truncf %176 : vector<2x16xf32> to vector<2x16xbf16>
    %c0_242 = arith.constant 0 : index
    %c2_243 = arith.constant 2 : index
    %c0_244 = arith.constant 0 : index
    %c0_245 = arith.constant 0 : index
    %178 = vector.load %arg6[%c0_242, %c2_243, %c0_244, %c0_245] : memref<4x4x16x64xbf16, #tpu.memory_space<vmem>>, vector<1x1x16x64xbf16>
    %179 = vector.shape_cast %178 : vector<1x1x16x64xbf16> to vector<16x64xbf16>
    %cst_246 = arith.constant dense<0.000000e+00> : vector<2x64xf32>
    %180 = tpu.matmul %177, %179, %cst_246 {dimension_numbers = #tpu.dot_dimension_numbers<[1], [0], [0], [1], [0, 0, 1, 1], [], []>} : vector<2x16xbf16>, vector<16x64xbf16>, vector<2x64xf32> -> vector<2x64xf32>
    %181 = arith.addf %174, %180 : vector<2x64xf32>
    %c0_247 = arith.constant 0 : index
    %c0_248 = arith.constant 0 : index
    %c3 = arith.constant 3 : index
    %c0_249 = arith.constant 0 : index
    %182 = vector.load %arg14[%c0_247, %c0_248, %c3, %c0_249] : memref<2x4x4x16xf32, #tpu.memory_space<vmem>>, vector<2x1x1x16xf32>
    %183 = vector.shape_cast %182 : vector<2x1x1x16xf32> to vector<2x16xf32>
    %184 = arith.truncf %183 : vector<2x16xf32> to vector<2x16xbf16>
    %c0_250 = arith.constant 0 : index
    %c3_251 = arith.constant 3 : index
    %c0_252 = arith.constant 0 : index
    %c0_253 = arith.constant 0 : index
    %185 = vector.load %arg6[%c0_250, %c3_251, %c0_252, %c0_253] : memref<4x4x16x64xbf16, #tpu.memory_space<vmem>>, vector<1x1x16x64xbf16>
    %186 = vector.shape_cast %185 : vector<1x1x16x64xbf16> to vector<16x64xbf16>
    %cst_254 = arith.constant dense<0.000000e+00> : vector<2x64xf32>
    %187 = tpu.matmul %184, %186, %cst_254 {dimension_numbers = #tpu.dot_dimension_numbers<[1], [0], [0], [1], [0, 0, 1, 1], [], []>} : vector<2x16xbf16>, vector<16x64xbf16>, vector<2x64xf32> -> vector<2x64xf32>
    %188 = arith.addf %181, %187 : vector<2x64xf32>
    %c0_255 = arith.constant 0 : index
    %c1_256 = arith.constant 1 : index
    %c0_257 = arith.constant 0 : index
    %c0_258 = arith.constant 0 : index
    %189 = vector.load %arg14[%c0_255, %c1_256, %c0_257, %c0_258] : memref<2x4x4x16xf32, #tpu.memory_space<vmem>>, vector<2x1x1x16xf32>
    %190 = vector.shape_cast %189 : vector<2x1x1x16xf32> to vector<2x16xf32>
    %191 = arith.truncf %190 : vector<2x16xf32> to vector<2x16xbf16>
    %c1_259 = arith.constant 1 : index
    %c0_260 = arith.constant 0 : index
    %c0_261 = arith.constant 0 : index
    %c0_262 = arith.constant 0 : index
    %192 = vector.load %arg6[%c1_259, %c0_260, %c0_261, %c0_262] : memref<4x4x16x64xbf16, #tpu.memory_space<vmem>>, vector<1x1x16x64xbf16>
    %193 = vector.shape_cast %192 : vector<1x1x16x64xbf16> to vector<16x64xbf16>
    %cst_263 = arith.constant dense<0.000000e+00> : vector<2x64xf32>
    %194 = tpu.matmul %191, %193, %cst_263 {dimension_numbers = #tpu.dot_dimension_numbers<[1], [0], [0], [1], [0, 0, 1, 1], [], []>} : vector<2x16xbf16>, vector<16x64xbf16>, vector<2x64xf32> -> vector<2x64xf32>
    %195 = arith.addf %188, %194 : vector<2x64xf32>
    %c0_264 = arith.constant 0 : index
    %c1_265 = arith.constant 1 : index
    %c1_266 = arith.constant 1 : index
    %c0_267 = arith.constant 0 : index
    %196 = vector.load %arg14[%c0_264, %c1_265, %c1_266, %c0_267] : memref<2x4x4x16xf32, #tpu.memory_space<vmem>>, vector<2x1x1x16xf32>
    %197 = vector.shape_cast %196 : vector<2x1x1x16xf32> to vector<2x16xf32>
    %198 = arith.truncf %197 : vector<2x16xf32> to vector<2x16xbf16>
    %c1_268 = arith.constant 1 : index
    %c1_269 = arith.constant 1 : index
    %c0_270 = arith.constant 0 : index
    %c0_271 = arith.constant 0 : index
    %199 = vector.load %arg6[%c1_268, %c1_269, %c0_270, %c0_271] : memref<4x4x16x64xbf16, #tpu.memory_space<vmem>>, vector<1x1x16x64xbf16>
    %200 = vector.shape_cast %199 : vector<1x1x16x64xbf16> to vector<16x64xbf16>
    %cst_272 = arith.constant dense<0.000000e+00> : vector<2x64xf32>
    %201 = tpu.matmul %198, %200, %cst_272 {dimension_numbers = #tpu.dot_dimension_numbers<[1], [0], [0], [1], [0, 0, 1, 1], [], []>} : vector<2x16xbf16>, vector<16x64xbf16>, vector<2x64xf32> -> vector<2x64xf32>
    %202 = arith.addf %195, %201 : vector<2x64xf32>
    %c0_273 = arith.constant 0 : index
    %c1_274 = arith.constant 1 : index
    %c2_275 = arith.constant 2 : index
    %c0_276 = arith.constant 0 : index
    %203 = vector.load %arg14[%c0_273, %c1_274, %c2_275, %c0_276] : memref<2x4x4x16xf32, #tpu.memory_space<vmem>>, vector<2x1x1x16xf32>
    %204 = vector.shape_cast %203 : vector<2x1x1x16xf32> to vector<2x16xf32>
    %205 = arith.truncf %204 : vector<2x16xf32> to vector<2x16xbf16>
    %c1_277 = arith.constant 1 : index
    %c2_278 = arith.constant 2 : index
    %c0_279 = arith.constant 0 : index
    %c0_280 = arith.constant 0 : index
    %206 = vector.load %arg6[%c1_277, %c2_278, %c0_279, %c0_280] : memref<4x4x16x64xbf16, #tpu.memory_space<vmem>>, vector<1x1x16x64xbf16>
    %207 = vector.shape_cast %206 : vector<1x1x16x64xbf16> to vector<16x64xbf16>
    %cst_281 = arith.constant dense<0.000000e+00> : vector<2x64xf32>
    %208 = tpu.matmul %205, %207, %cst_281 {dimension_numbers = #tpu.dot_dimension_numbers<[1], [0], [0], [1], [0, 0, 1, 1], [], []>} : vector<2x16xbf16>, vector<16x64xbf16>, vector<2x64xf32> -> vector<2x64xf32>
    %209 = arith.addf %202, %208 : vector<2x64xf32>
    %c0_282 = arith.constant 0 : index
    %c1_283 = arith.constant 1 : index
    %c3_284 = arith.constant 3 : index
    %c0_285 = arith.constant 0 : index
    %210 = vector.load %arg14[%c0_282, %c1_283, %c3_284, %c0_285] : memref<2x4x4x16xf32, #tpu.memory_space<vmem>>, vector<2x1x1x16xf32>
    %211 = vector.shape_cast %210 : vector<2x1x1x16xf32> to vector<2x16xf32>
    %212 = arith.truncf %211 : vector<2x16xf32> to vector<2x16xbf16>
    %c1_286 = arith.constant 1 : index
    %c3_287 = arith.constant 3 : index
    %c0_288 = arith.constant 0 : index
    %c0_289 = arith.constant 0 : index
    %213 = vector.load %arg6[%c1_286, %c3_287, %c0_288, %c0_289] : memref<4x4x16x64xbf16, #tpu.memory_space<vmem>>, vector<1x1x16x64xbf16>
    %214 = vector.shape_cast %213 : vector<1x1x16x64xbf16> to vector<16x64xbf16>
    %cst_290 = arith.constant dense<0.000000e+00> : vector<2x64xf32>
    %215 = tpu.matmul %212, %214, %cst_290 {dimension_numbers = #tpu.dot_dimension_numbers<[1], [0], [0], [1], [0, 0, 1, 1], [], []>} : vector<2x16xbf16>, vector<16x64xbf16>, vector<2x64xf32> -> vector<2x64xf32>
    %216 = arith.addf %209, %215 : vector<2x64xf32>
    %c0_291 = arith.constant 0 : index
    %c2_292 = arith.constant 2 : index
    %c0_293 = arith.constant 0 : index
    %c0_294 = arith.constant 0 : index
    %217 = vector.load %arg14[%c0_291, %c2_292, %c0_293, %c0_294] : memref<2x4x4x16xf32, #tpu.memory_space<vmem>>, vector<2x1x1x16xf32>
    %218 = vector.shape_cast %217 : vector<2x1x1x16xf32> to vector<2x16xf32>
    %219 = arith.truncf %218 : vector<2x16xf32> to vector<2x16xbf16>
    %c2_295 = arith.constant 2 : index
    %c0_296 = arith.constant 0 : index
    %c0_297 = arith.constant 0 : index
    %c0_298 = arith.constant 0 : index
    %220 = vector.load %arg6[%c2_295, %c0_296, %c0_297, %c0_298] : memref<4x4x16x64xbf16, #tpu.memory_space<vmem>>, vector<1x1x16x64xbf16>
    %221 = vector.shape_cast %220 : vector<1x1x16x64xbf16> to vector<16x64xbf16>
    %cst_299 = arith.constant dense<0.000000e+00> : vector<2x64xf32>
    %222 = tpu.matmul %219, %221, %cst_299 {dimension_numbers = #tpu.dot_dimension_numbers<[1], [0], [0], [1], [0, 0, 1, 1], [], []>} : vector<2x16xbf16>, vector<16x64xbf16>, vector<2x64xf32> -> vector<2x64xf32>
    %223 = arith.addf %216, %222 : vector<2x64xf32>
    %c0_300 = arith.constant 0 : index
    %c2_301 = arith.constant 2 : index
    %c1_302 = arith.constant 1 : index
    %c0_303 = arith.constant 0 : index
    %224 = vector.load %arg14[%c0_300, %c2_301, %c1_302, %c0_303] : memref<2x4x4x16xf32, #tpu.memory_space<vmem>>, vector<2x1x1x16xf32>
    %225 = vector.shape_cast %224 : vector<2x1x1x16xf32> to vector<2x16xf32>
    %226 = arith.truncf %225 : vector<2x16xf32> to vector<2x16xbf16>
    %c2_304 = arith.constant 2 : index
    %c1_305 = arith.constant 1 : index
    %c0_306 = arith.constant 0 : index
    %c0_307 = arith.constant 0 : index
    %227 = vector.load %arg6[%c2_304, %c1_305, %c0_306, %c0_307] : memref<4x4x16x64xbf16, #tpu.memory_space<vmem>>, vector<1x1x16x64xbf16>
    %228 = vector.shape_cast %227 : vector<1x1x16x64xbf16> to vector<16x64xbf16>
    %cst_308 = arith.constant dense<0.000000e+00> : vector<2x64xf32>
    %229 = tpu.matmul %226, %228, %cst_308 {dimension_numbers = #tpu.dot_dimension_numbers<[1], [0], [0], [1], [0, 0, 1, 1], [], []>} : vector<2x16xbf16>, vector<16x64xbf16>, vector<2x64xf32> -> vector<2x64xf32>
    %230 = arith.addf %223, %229 : vector<2x64xf32>
    %c0_309 = arith.constant 0 : index
    %c2_310 = arith.constant 2 : index
    %c2_311 = arith.constant 2 : index
    %c0_312 = arith.constant 0 : index
    %231 = vector.load %arg14[%c0_309, %c2_310, %c2_311, %c0_312] : memref<2x4x4x16xf32, #tpu.memory_space<vmem>>, vector<2x1x1x16xf32>
    %232 = vector.shape_cast %231 : vector<2x1x1x16xf32> to vector<2x16xf32>
    %233 = arith.truncf %232 : vector<2x16xf32> to vector<2x16xbf16>
    %c2_313 = arith.constant 2 : index
    %c2_314 = arith.constant 2 : index
    %c0_315 = arith.constant 0 : index
    %c0_316 = arith.constant 0 : index
    %234 = vector.load %arg6[%c2_313, %c2_314, %c0_315, %c0_316] : memref<4x4x16x64xbf16, #tpu.memory_space<vmem>>, vector<1x1x16x64xbf16>
    %235 = vector.shape_cast %234 : vector<1x1x16x64xbf16> to vector<16x64xbf16>
    %cst_317 = arith.constant dense<0.000000e+00> : vector<2x64xf32>
    %236 = tpu.matmul %233, %235, %cst_317 {dimension_numbers = #tpu.dot_dimension_numbers<[1], [0], [0], [1], [0, 0, 1, 1], [], []>} : vector<2x16xbf16>, vector<16x64xbf16>, vector<2x64xf32> -> vector<2x64xf32>
    %237 = arith.addf %230, %236 : vector<2x64xf32>
    %c0_318 = arith.constant 0 : index
    %c2_319 = arith.constant 2 : index
    %c3_320 = arith.constant 3 : index
    %c0_321 = arith.constant 0 : index
    %238 = vector.load %arg14[%c0_318, %c2_319, %c3_320, %c0_321] : memref<2x4x4x16xf32, #tpu.memory_space<vmem>>, vector<2x1x1x16xf32>
    %239 = vector.shape_cast %238 : vector<2x1x1x16xf32> to vector<2x16xf32>
    %240 = arith.truncf %239 : vector<2x16xf32> to vector<2x16xbf16>
    %c2_322 = arith.constant 2 : index
    %c3_323 = arith.constant 3 : index
    %c0_324 = arith.constant 0 : index
    %c0_325 = arith.constant 0 : index
    %241 = vector.load %arg6[%c2_322, %c3_323, %c0_324, %c0_325] : memref<4x4x16x64xbf16, #tpu.memory_space<vmem>>, vector<1x1x16x64xbf16>
    %242 = vector.shape_cast %241 : vector<1x1x16x64xbf16> to vector<16x64xbf16>
    %cst_326 = arith.constant dense<0.000000e+00> : vector<2x64xf32>
    %243 = tpu.matmul %240, %242, %cst_326 {dimension_numbers = #tpu.dot_dimension_numbers<[1], [0], [0], [1], [0, 0, 1, 1], [], []>} : vector<2x16xbf16>, vector<16x64xbf16>, vector<2x64xf32> -> vector<2x64xf32>
    %244 = arith.addf %237, %243 : vector<2x64xf32>
    %c0_327 = arith.constant 0 : index
    %c3_328 = arith.constant 3 : index
    %c0_329 = arith.constant 0 : index
    %c0_330 = arith.constant 0 : index
    %245 = vector.load %arg14[%c0_327, %c3_328, %c0_329, %c0_330] : memref<2x4x4x16xf32, #tpu.memory_space<vmem>>, vector<2x1x1x16xf32>
    %246 = vector.shape_cast %245 : vector<2x1x1x16xf32> to vector<2x16xf32>
    %247 = arith.truncf %246 : vector<2x16xf32> to vector<2x16xbf16>
    %c3_331 = arith.constant 3 : index
    %c0_332 = arith.constant 0 : index
    %c0_333 = arith.constant 0 : index
    %c0_334 = arith.constant 0 : index
    %248 = vector.load %arg6[%c3_331, %c0_332, %c0_333, %c0_334] : memref<4x4x16x64xbf16, #tpu.memory_space<vmem>>, vector<1x1x16x64xbf16>
    %249 = vector.shape_cast %248 : vector<1x1x16x64xbf16> to vector<16x64xbf16>
    %cst_335 = arith.constant dense<0.000000e+00> : vector<2x64xf32>
    %250 = tpu.matmul %247, %249, %cst_335 {dimension_numbers = #tpu.dot_dimension_numbers<[1], [0], [0], [1], [0, 0, 1, 1], [], []>} : vector<2x16xbf16>, vector<16x64xbf16>, vector<2x64xf32> -> vector<2x64xf32>
    %251 = arith.addf %244, %250 : vector<2x64xf32>
    %c0_336 = arith.constant 0 : index
    %c3_337 = arith.constant 3 : index
    %c1_338 = arith.constant 1 : index
    %c0_339 = arith.constant 0 : index
    %252 = vector.load %arg14[%c0_336, %c3_337, %c1_338, %c0_339] : memref<2x4x4x16xf32, #tpu.memory_space<vmem>>, vector<2x1x1x16xf32>
    %253 = vector.shape_cast %252 : vector<2x1x1x16xf32> to vector<2x16xf32>
    %254 = arith.truncf %253 : vector<2x16xf32> to vector<2x16xbf16>
    %c3_340 = arith.constant 3 : index
    %c1_341 = arith.constant 1 : index
    %c0_342 = arith.constant 0 : index
    %c0_343 = arith.constant 0 : index
    %255 = vector.load %arg6[%c3_340, %c1_341, %c0_342, %c0_343] : memref<4x4x16x64xbf16, #tpu.memory_space<vmem>>, vector<1x1x16x64xbf16>
    %256 = vector.shape_cast %255 : vector<1x1x16x64xbf16> to vector<16x64xbf16>
    %cst_344 = arith.constant dense<0.000000e+00> : vector<2x64xf32>
    %257 = tpu.matmul %254, %256, %cst_344 {dimension_numbers = #tpu.dot_dimension_numbers<[1], [0], [0], [1], [0, 0, 1, 1], [], []>} : vector<2x16xbf16>, vector<16x64xbf16>, vector<2x64xf32> -> vector<2x64xf32>
    %258 = arith.addf %251, %257 : vector<2x64xf32>
    %c0_345 = arith.constant 0 : index
    %c3_346 = arith.constant 3 : index
    %c2_347 = arith.constant 2 : index
    %c0_348 = arith.constant 0 : index
    %259 = vector.load %arg14[%c0_345, %c3_346, %c2_347, %c0_348] : memref<2x4x4x16xf32, #tpu.memory_space<vmem>>, vector<2x1x1x16xf32>
    %260 = vector.shape_cast %259 : vector<2x1x1x16xf32> to vector<2x16xf32>
    %261 = arith.truncf %260 : vector<2x16xf32> to vector<2x16xbf16>
    %c3_349 = arith.constant 3 : index
    %c2_350 = arith.constant 2 : index
    %c0_351 = arith.constant 0 : index
    %c0_352 = arith.constant 0 : index
    %262 = vector.load %arg6[%c3_349, %c2_350, %c0_351, %c0_352] : memref<4x4x16x64xbf16, #tpu.memory_space<vmem>>, vector<1x1x16x64xbf16>
    %263 = vector.shape_cast %262 : vector<1x1x16x64xbf16> to vector<16x64xbf16>
    %cst_353 = arith.constant dense<0.000000e+00> : vector<2x64xf32>
    %264 = tpu.matmul %261, %263, %cst_353 {dimension_numbers = #tpu.dot_dimension_numbers<[1], [0], [0], [1], [0, 0, 1, 1], [], []>} : vector<2x16xbf16>, vector<16x64xbf16>, vector<2x64xf32> -> vector<2x64xf32>
    %265 = arith.addf %258, %264 : vector<2x64xf32>
    %c0_354 = arith.constant 0 : index
    %c3_355 = arith.constant 3 : index
    %c3_356 = arith.constant 3 : index
    %c0_357 = arith.constant 0 : index
    %266 = vector.load %arg14[%c0_354, %c3_355, %c3_356, %c0_357] : memref<2x4x4x16xf32, #tpu.memory_space<vmem>>, vector<2x1x1x16xf32>
    %267 = vector.shape_cast %266 : vector<2x1x1x16xf32> to vector<2x16xf32>
    %268 = arith.truncf %267 : vector<2x16xf32> to vector<2x16xbf16>
    %c3_358 = arith.constant 3 : index
    %c3_359 = arith.constant 3 : index
    %c0_360 = arith.constant 0 : index
    %c0_361 = arith.constant 0 : index
    %269 = vector.load %arg6[%c3_358, %c3_359, %c0_360, %c0_361] : memref<4x4x16x64xbf16, #tpu.memory_space<vmem>>, vector<1x1x16x64xbf16>
    %270 = vector.shape_cast %269 : vector<1x1x16x64xbf16> to vector<16x64xbf16>
    %cst_362 = arith.constant dense<0.000000e+00> : vector<2x64xf32>
    %271 = tpu.matmul %268, %270, %cst_362 {dimension_numbers = #tpu.dot_dimension_numbers<[1], [0], [0], [1], [0, 0, 1, 1], [], []>} : vector<2x16xbf16>, vector<16x64xbf16>, vector<2x64xf32> -> vector<2x64xf32>
    %272 = arith.addf %265, %271 : vector<2x64xf32>
    %c0_363 = arith.constant 0 : index
    %c0_364 = arith.constant 0 : index
    %273 = vector.load %arg7[%c0_363, %c0_364] : memref<1x64xf32, #tpu.memory_space<vmem>>, vector<1x64xf32>
    %274 = vector.broadcast %273 : vector<1x64xf32> to vector<2x64xf32>
    %275 = arith.addf %272, %274 : vector<2x64xf32>
    %cst_365 = arith.constant 0.000000e+00 : f32
    %276 = vector.broadcast %cst_365 : f32 to vector<2x64xf32>
    %277 = arith.maximumf %275, %276 : vector<2x64xf32>
    %278 = arith.truncf %277 : vector<2x64xf32> to vector<2x64xbf16>
    %c0_366 = arith.constant 0 : index
    %c0_367 = arith.constant 0 : index
    %279 = vector.load %arg8[%c0_366, %c0_367] : memref<64x10xbf16, #tpu.memory_space<vmem>>, vector<64x10xbf16>
    %cst_368 = arith.constant dense<0.000000e+00> : vector<2x10xf32>
    %280 = tpu.matmul %278, %279, %cst_368 {dimension_numbers = #tpu.dot_dimension_numbers<[1], [0], [0], [1], [0, 0, 1, 1], [], []>} : vector<2x64xbf16>, vector<64x10xbf16>, vector<2x10xf32> -> vector<2x10xf32>
    %c0_369 = arith.constant 0 : index
    %c0_370 = arith.constant 0 : index
    %281 = vector.load %arg9[%c0_369, %c0_370] : memref<1x10xf32, #tpu.memory_space<vmem>>, vector<1x10xf32>
    %282 = vector.broadcast %281 : vector<1x10xf32> to vector<2x10xf32>
    %283 = arith.addf %280, %282 : vector<2x10xf32>
    %cst_371 = arith.constant dense<0xFF800000> : vector<2xf32>
    %284 = vector.multi_reduction <maximumf>, %283, %cst_371 [1] : vector<2x10xf32> to vector<2xf32>
    %285 = vector.shape_cast %284 : vector<2xf32> to vector<2x1xf32>
    %286 = vector.broadcast %285 : vector<2x1xf32> to vector<2x10xf32>
    %287 = arith.subf %283, %286 : vector<2x10xf32>
    %288 = math.exp %287 : vector<2x10xf32>
    %cst_372 = arith.constant dense<0.000000e+00> : vector<2xf32>
    %289 = vector.multi_reduction <add>, %288, %cst_372 [1] : vector<2x10xf32> to vector<2xf32>
    %290 = vector.shape_cast %289 : vector<2xf32> to vector<2x1xf32>
    %291 = tpu.reciprocal %290 {approx = true} : vector<2x1xf32> -> vector<2x1xf32>
    %292 = vector.broadcast %291 : vector<2x1xf32> to vector<2x10xf32>
    %293 = arith.mulf %288, %292 : vector<2x10xf32>
    %c0_373 = arith.constant 0 : index
    %c0_374 = arith.constant 0 : index
    %294 = vector.load %arg10[%c0_373, %c0_374] : memref<2x10xf32, #tpu.memory_space<vmem>>, vector<2x10xf32>
    tpu.vector_store %arg10[%c0_373, %c0_374], %293 {strides = array<i32>} : memref<2x10xf32, #tpu.memory_space<vmem>>, vector<2x10xf32>,
    return
  }
  func.func @transform_0(%arg0: i32) -> (i32, i32, i32, i32) {
    %c0_i32 = arith.constant 0 : i32
    %c0_i32_0 = arith.constant 0 : i32
    %c0_i32_1 = arith.constant 0 : i32
    %c0_i32_2 = arith.constant 0 : i32
    %c0_i32_3 = arith.constant 0 : i32
    return %c0_i32, %c0_i32_0, %c0_i32_1, %c0_i32_2 : i32, i32, i32, i32
  }
  func.func @transform_1(%arg0: i32) -> (i32, i32, i32, i32) {
    %c0_i32 = arith.constant 0 : i32
    %c0_i32_0 = arith.constant 0 : i32
    %c0_i32_1 = arith.constant 0 : i32
    %c0_i32_2 = arith.constant 0 : i32
    %c0_i32_3 = arith.constant 0 : i32
    return %c0_i32, %c0_i32_0, %c0_i32_1, %c0_i32_2 : i32, i32, i32, i32
  }
  func.func @transform_2(%arg0: i32) -> (i32, i32) {
    %c0_i32 = arith.constant 0 : i32
    %c0_i32_0 = arith.constant 0 : i32
    %c0_i32_1 = arith.constant 0 : i32
    return %c0_i32, %c0_i32_0 : i32, i32
  }
  func.func @transform_3(%arg0: i32) -> (i32, i32, i32, i32) {
    %c0_i32 = arith.constant 0 : i32
    %c0_i32_0 = arith.constant 0 : i32
    %c0_i32_1 = arith.constant 0 : i32
    %c0_i32_2 = arith.constant 0 : i32
    %c0_i32_3 = arith.constant 0 : i32
    return %c0_i32, %c0_i32_0, %c0_i32_1, %c0_i32_2 : i32, i32, i32, i32
  }
  func.func @transform_4(%arg0: i32) -> (i32, i32) {
    %c0_i32 = arith.constant 0 : i32
    %c0_i32_0 = arith.constant 0 : i32
    %c0_i32_1 = arith.constant 0 : i32
    return %c0_i32, %c0_i32_0 : i32, i32
  }
  func.func @transform_5(%arg0: i32) -> (i32, i32, i32, i32) {
    %c0_i32 = arith.constant 0 : i32
    %c0_i32_0 = arith.constant 0 : i32
    %c0_i32_1 = arith.constant 0 : i32
    %c0_i32_2 = arith.constant 0 : i32
    %c0_i32_3 = arith.constant 0 : i32
    return %c0_i32, %c0_i32_0, %c0_i32_1, %c0_i32_2 : i32, i32, i32, i32
  }
  func.func @transform_6(%arg0: i32) -> (i32, i32) {
    %c0_i32 = arith.constant 0 : i32
    %c0_i32_0 = arith.constant 0 : i32
    %c0_i32_1 = arith.constant 0 : i32
    return %c0_i32, %c0_i32_0 : i32, i32
  }
  func.func @transform_7(%arg0: i32) -> (i32, i32) {
    %c0_i32 = arith.constant 0 : i32
    %c0_i32_0 = arith.constant 0 : i32
    %c0_i32_1 = arith.constant 0 : i32
    return %c0_i32, %c0_i32_0 : i32, i32
  }
  func.func @transform_8(%arg0: i32) -> (i32, i32) {
    %c0_i32 = arith.constant 0 : i32
    %c0_i32_0 = arith.constant 0 : i32
    %c0_i32_1 = arith.constant 0 : i32
    return %c0_i32, %c0_i32_0 : i32, i32
  }
  func.func @transform_9(%arg0: i32) -> (i32, i32) {
    %c0_i32 = arith.constant 0 : i32
    %c0_i32_0 = arith.constant 0 : i32
    %c0_i32_1 = arith.constant 0 : i32
    return %c0_i32, %c0_i32_0 : i32, i32
  }
}

</mosaic_0001>

<bundles_post_ra>
// kernel: forward.1
= control target key start
LH: loop header
LB: loop body
LE: loop exit
PB: predicated region body
PF: predicated region fallthrough
CT: control target
= control target key end

     0   :  { %vm326_vm0 = vcmask 1041408   ;;  %vm229_vm1 = vcmask 31744   ;;  %s13752_s0 = inlined_call_operand.vmem [shape: f32[2,18,18,4], index: 0, kind: input, shape index: {}]   ;;  %s13753_s1 = inlined_call_operand.vmem [shape: bf16[3,3,4,8], index: 1, kind: input, shape index: {}]   ;;  %s13754_s2 = inlined_call_operand.vmem [shape: f32[1,8], index: 2, kind: input, shape index: {}]   ;;  %s13755_s3 = inlined_call_operand.vmem [shape: bf16[3,3,8,16], index: 3, kind: input, shape index: {}]   ;;  %s13756_s4 = inlined_call_operand.vmem [shape: f32[1,16], index: 4, kind: input, shape index: {}]   ;;  %s13757_s5 = inlined_call_operand.vmem [shape: bf16[4,4,16,64], index: 5, kind: input, shape index: {}]   ;;  %s13758_s6 = inlined_call_operand.vmem [shape: f32[1,64], index: 6, kind: input, shape index: {}]   ;;  %s13759_s7 = inlined_call_operand.vmem [shape: bf16[64,10], index: 7, kind: input, shape index: {}]   ;;  %s13760_s8 = inlined_call_operand.vmem [shape: f32[1,10], index: 8, kind: input, shape index: {}]   ;;  %s13761_s9 = inlined_call_operand.hbm [shape: f32[2,10], index: 9, kind: output, shape index: {}]  }
   0x1   :  { %v10976_v0 = vld [vmem:[%s13753_s1 + $0x4] sm:$0x3]  ;;  %v1008_v2 = vld [vmem:[%s13752_s0 + $0xa] sm:$0xff]  ;;  %v1009_v5 = vld [vmem:[%s13752_s0 + $0x1a] sm:$0xff] }
   0x2   :  { %v1007_v1 = vld [vmem:[%s13752_s0 + $0x2] sm:$0xff]  ;;  %10852 = vmatprep.subr.msk.bf16.mxu0 %vm326_vm0, %v10976_v0  ;;  %v10988_v3 = vsel %vm326_vm0, %v10976_v0, 0  ;;  %v1011_v9 = vld [vmem:[%s13752_s0 + $0x32] sm:$0xff]  ;;  %v1012_v10 = vld [vmem:[%s13752_s0 + $0x3a] sm:$0xff] }
   0x3   :  { %v1071_v4 = vpack.c.bf16 %v1008_v2, %v1007_v1  ;;  %v1010_v6 = vld [vmem:[%s13752_s0 + $0x22] sm:$0xff]  ;;  %9477 = vmatpush3.bf16.msra.mxu0 %v10988_v3  ;;  %v11011_v12 = vpack.c.bf16 %v1012_v10, %v1011_v9  ;;  %v1013_v13 = vld [vmem:[%s13752_s0 + $0x4a] sm:$0xff]  ;;  %v1014_v14 = vld [vmem:[%s13752_s0 + $0x52] sm:$0xff] }
   0x4   :  { %v8260_v7 = vld [vmem:[%s13753_s1 + $0x6] sm:$0x3]  ;;  %v11000_v8 = vpack.c.bf16 %v1010_v6, %v1009_v5  ;;  %v8357_v15 = vld [vmem:[%s13753_s1 + $0x8] sm:$0x3]  ;;  %v1016_v17 = vld [vmem:[%s13752_s0 + $0x6a] sm:$0xff]  ;;  %v11033_v18 = vpack.c.bf16 %v1014_v14, %v1013_v13 }
   0x5   :  { %9478 = vmatprep.mubr.msk.bf16.mxu0 %vm229_vm1, %v1071_v4  ;;  %10854 = vmatprep.subr.msk.bf16.mxu0 %vm326_vm0, %v8260_v7  ;;  %v1753_v11 = vsel %vm326_vm0, %v8260_v7, 0  ;;  %v1015_v16 = vld [vmem:[%s13752_s0 + $0x62] sm:$0xff]  ;;  %v1017_v20 = vld [vmem:[%s13752_s0 + $0x7a] sm:$0xff]  ;;  %v8198_v26 = vld [vmem:[%s13752_s0 + $0x30] sm:$0xff]  ;;  %v2303_v32 = vsel %vm326_vm0, %v8357_v15, 0 }
   0x6   :  { %9479 = vmatmul.mubr.msk.bf16.vlgmr.msra.gmra.mrb[0].mxu0 %vm229_vm1, %v11000_v8  ;;  %v11035_v19 = vpack.c.bf16 %v1016_v17, %v1015_v16  ;;  %v1018_v21 = vld [vmem:[%s13752_s0 + $0x82] sm:$0xff]  ;;  %v8196_v22 = vld [vmem:[%s13752_s0 + $0x18] sm:$0xff]  ;;  %v8201_v29 = vld [vmem:[%s13752_s0 + $0x50] sm:$0xff] }
   0x7   :  { %9543 = vmatpush3.bf16.msra.mxu0 %v1753_v11  ;;  %9482 = vmatprep.mubr.msk.bf16.mxu0 %vm229_vm1, %v11011_v12  ;;  %v8197_v23 = vld [vmem:[%s13752_s0 + $0x20] sm:$0xff]  ;;  %v11053_v24 = vpack.c.bf16 %v1018_v21, %v1017_v20  ;;  %v8199_v27 = vld [vmem:[%s13752_s0 + $0x38] sm:$0xff]  ;;  %v8200_v28 = vld [vmem:[%s13752_s0 + $0x48] sm:$0xff] }
   0x8   :  { %10855 = vmatprep.subr.msk.bf16.mxu0 %vm326_vm0, %v8357_v15  ;;  %v11055_v25 = vpack.c.bf16 %v8197_v23, %v8196_v22  ;;  %v11073_v30 = vpack.c.bf16 %v8199_v27, %v8198_v26  ;;  %v11075_v31 = vpack.c.bf16 %v8201_v29, %v8200_v28  ;;  %v11083_v33 = vld [vmem:[%s13753_s1 + $0xa] sm:$0x3]  ;;  %v8202_v34 = vld [vmem:[%s13752_s0 + $0x60] sm:$0xff]  ;;  %v8204_v36 = vld [vmem:[%s13752_s0 + $0x78] sm:$0xff] }
   0x9   :  { %v8203_v35 = vld [vmem:[%s13752_s0 + $0x68] sm:$0xff]  ;;  %v8205_v37 = vld [vmem:[%s13752_s0 + $0x80] sm:$0xff]  ;;  %v8206_v40 = vld [vmem:[%s13752_s0 + $0x90] sm:$0xff] }
   0xa   :  { %v11101_v38 = vpack.c.bf16 %v8203_v35, %v8202_v34  ;;  %v11103_v39 = vpack.c.bf16 %v8205_v37, %v8204_v36  ;;  %v8207_v41 = vld [vmem:[%s13752_s0 + $0x98] sm:$0xff]  ;;  %v8208_v42 = vld [vmem:[%s13752_s0 + $0xa8] sm:$0xff]  ;;  %v8209_v43 = vld [vmem:[%s13752_s0 + $0xb0] sm:$0xff] }
   0xb   :  { %v11121_v44 = vpack.c.bf16 %v8207_v41, %v8206_v40  ;;  %v11123_v45 = vpack.c.bf16 %v8209_v43, %v8208_v42 }
   0xe   :  { %9483 = vmatmul.mubr.msk.bf16.gmra.mrb[4].mxu0 %vm229_vm1, %v11033_v18 }
   0xf   :  { %9486 = vmatprep.mubr.msk.bf16.mxu0 %vm229_vm1, %v11035_v19 }
  0x16   :  { %9487 = vmatmul.mubr.msk.bf16.gmra.mrb[8].mxu0 %vm229_vm1, %v11053_v24 }
  0x17   :  { %9544 = vmatprep.mubr.msk.bf16.mxu0 %vm229_vm1, %v11055_v25 }
  0x1e   :  { %9545 = vmatmul.mubr.msk.bf16.vlgmr.msra.gmra.mrb[0].mxu0 %vm229_vm1, %v11073_v30 }
  0x1f   :  { %9609 = vmatpush3.bf16.msra.mxu0 %v2303_v32  ;;  %9548 = vmatprep.mubr.msk.bf16.mxu0 %vm229_vm1, %v11075_v31 }
  0x20   :  { %10856 = vmatprep.subr.msk.bf16.mxu0 %vm326_vm0, %v11083_v33 }
  0x26   :  { %9549 = vmatmul.mubr.msk.bf16.gmra.mrb[4].mxu0 %vm229_vm1, %v11101_v38 }
  0x27   :  { %9552 = vmatprep.mubr.msk.bf16.mxu0 %vm229_vm1, %v11103_v39 }
  0x28   :  { %14 = vsyncpa [#allocation7], 0  ;;  %v8210_v46 = vld [vmem:[%s13752_s0 + $0xc0] sm:$0xff]  ;;  %v8211_v47 = vld [vmem:[%s13752_s0 + $0xc8] sm:$0xff]  ;;  %vm4994_vm2 = vcmask 64512   ;;  %vm5235_vm3 = vcmask 58368  }
  0x29   :  { %v8212_v48 = vld [vmem:[%s13752_s0 + $0xd8] sm:$0xff]  ;;  %v8213_v49 = vld [vmem:[%s13752_s0 + $0xe0] sm:$0xff]  ;;  %v11141_v50 = vpack.c.bf16 %v8211_v47, %v8210_v46  ;;  %v8214_v52 = vld [vmem:[%s13752_s0 + $0xf0] sm:$0xff]  ;;  %vm5367_vm4 = vcmask 1043456   ;;  %vm10921_vm5 = vmmov 0   ;;  %vm6794_vm6 = vcmask 130048  }
  0x2a   :  { %v11143_v51 = vpack.c.bf16 %v8213_v49, %v8212_v48  ;;  %v8215_v53 = vld [vmem:[%s13752_s0 + $0xf8] sm:$0xff]  ;;  %v8216_v54 = vld [vmem:[%s13752_s0 + $0x108] sm:$0xff]  ;;  %v8217_v55 = vld [vmem:[%s13752_s0 + $0x110] sm:$0xff]  ;;  %vm6898_vm7 = vcmask 125952   ;;  %vm6925_vm8 = vcmask 1041409   ;;  %vm7981_vm9 = vcmask 523264  }
  0x2b   :  { %v11161_v56 = vpack.c.bf16 %v8215_v53, %v8214_v52  ;;  %v11163_v57 = vpack.c.bf16 %v8217_v55, %v8216_v54  ;;  %v8218_v58 = vld [vmem:[%s13752_s0 + $0x120] sm:$0xff]  ;;  %v8219_v59 = vld [vmem:[%s13752_s0 + $0x128] sm:$0xff]  ;;  %v8220_v60 = vld [vmem:[%s13752_s0 + $0x138] sm:$0xff]  ;;  %vm8025_vm10 = vcmask 74752  }
  0x2c   :  { %v8221_v61 = vld [vmem:[%s13752_s0 + $0x140] sm:$0xff]  ;;  %v11181_v62 = vpack.c.bf16 %v8219_v59, %v8218_v58  ;;  %v8222_v1 = vld [vmem:[%s13752_s0 + $0x150] sm:$0xff]  ;;  %v8223_v9 = vld [vmem:[%s13752_s0 + $0x158] sm:$0xff] }
  0x2d   :  { %v11183_v63 = vpack.c.bf16 %v8221_v61, %v8220_v60  ;;  %v8293_v2 = vld [vmem:[%s13752_s0 + $0x19] sm:$0xff]  ;;  %v8294_v4 = vld [vmem:[%s13752_s0 + $0x21] sm:$0xff]  ;;  %v132_v7 = vld [vmem:[%s13752_s0 + $0x9] sm:$0xff]  ;;  %v11227_v20 = vpack.c.bf16 %v8223_v9, %v8222_v1 }
  0x2e   :  { %9553 = vmatmul.mubr.msk.bf16.gmra.mrb[8].mxu0 %vm229_vm1, %v11121_v44  ;;  %v8098_v5 = vld [vmem:[%s13753_s1 + $0x2] sm:$0x3]  ;;  %v8295_v10 = vld [vmem:[%s13752_s0 + $0x31] sm:$0xff]  ;;  %v8296_v11 = vld [vmem:[%s13752_s0 + $0x39] sm:$0xff]  ;;  %v11224_v17 = vpack.c.bf16 %v8294_v4, %v8293_v2 }
  0x2f   :  { %9556 = vmatprep.mubr.msk.bf16.mxu0 %vm229_vm1, %v11123_v45  ;;  %v131_v6 = vld [vmem:[%s13752_s0 + $0x1] sm:$0xff]  ;;  %10850 = vmatprep.subr.msk.bf16.mxu1 %vm326_vm0, %v8098_v5  ;;  %v328_v13 = vsel %vm326_vm0, %v8098_v5, 0  ;;  %v8225_v16 = vld [vmem:[%s13752_s0 + $0x170] sm:$0xff]  ;;  %v11229_v21 = vpack.c.bf16 %v8296_v11, %v8295_v10  ;;  %v8301_v43 = vld [vmem:[%s13752_s0 + $0x79] sm:$0xff] }
  0x30   :  { %v195_v14 = vpack.c.bf16 %v132_v7, %v131_v6  ;;  %v8224_v15 = vld [vmem:[%s13752_s0 + $0x168] sm:$0xff]  ;;  %9345 = vmatpush3.bf16.msra.mxu1 %v328_v13  ;;  %v8226_v23 = vld [vmem:[%s13752_s0 + $0x180] sm:$0xff]  ;;  %v8298_v27 = vld [vmem:[%s13752_s0 + $0x51] sm:$0xff] }
  0x31   :  { %v11231_v22 = vpack.c.bf16 %v8225_v16, %v8224_v15  ;;  %v8297_v26 = vld [vmem:[%s13752_s0 + $0x49] sm:$0xff]  ;;  %v8299_v29 = vld [vmem:[%s13752_s0 + $0x61] sm:$0xff]  ;;  %v8303_v48 = vld [vmem:[%s13752_s0 + $0x91] sm:$0xff] }
  0x32   :  { %9346 = vmatprep.mubr.msk.bf16.mxu1 %vm229_vm1, %v195_v14  ;;  %v8227_v28 = vld [vmem:[%s13752_s0 + $0x188] sm:$0xff]  ;;  %v8229_v35 = vld [vmem:[%s13752_s0 + $0x1d0] sm:$0xff]  ;;  %v11265_v36 = vpack.c.bf16 %v8298_v27, %v8297_v26  ;;  %v8230_v42 = vld [vmem:[%s13752_s0 + $0x1e0] sm:$0xff] }
  0x33   :  { %9347 = vmatmul.mubr.msk.bf16.vlgmr.msra.gmra.mrb[0].mxu1 %vm229_vm1, %v11224_v17  ;;  %v8300_v32 = vld [vmem:[%s13752_s0 + $0x69] sm:$0xff]  ;;  %v1637_v37 = vpack.c.bf16 %v8227_v28, %v8226_v23  ;;  %v8302_v46 = vld [vmem:[%s13752_s0 + $0x81] sm:$0xff]  ;;  %v8304_v49 = vld [vmem:[%s13752_s0 + $0x99] sm:$0xff] }
  0x34   :  { %9350 = vmatprep.mubr.msk.bf16.mxu1 %vm229_vm1, %v11229_v21  ;;  %v8228_v34 = vld [vmem:[%s13752_s0 + $0x1c8] sm:$0xff]  ;;  %v11267_v40 = vpack.c.bf16 %v8300_v32, %v8299_v29  ;;  %v8232_v52 = vld [vmem:[%s13752_s0 + $0x1f8] sm:$0xff]  ;;  %v8233_v53 = vld [vmem:[%s13752_s0 + $0x200] sm:$0xff]  ;;  %v11299_v54 = vpack.c.bf16 %v8302_v46, %v8301_v43  ;;  %v11301_v58 = vpack.c.bf16 %v8304_v49, %v8303_v48 }
  0x35   :  { %v1638_v41 = vpack.c.bf16 %v8229_v35, %v8228_v34  ;;  %v8231_v47 = vld [vmem:[%s13752_s0 + $0x1e8] sm:$0xff]  ;;  %v1640_v59 = vpack.c.bf16 %v8233_v53, %v8232_v52  ;;  %v8234_v60 = vld [vmem:[%s13752_s0 + $0x210] sm:$0xff]  ;;  %v8235_v2 = vld [vmem:[%s13752_s0 + $0x218] sm:$0xff] }
  0x36   :  { %9557 = vmatmul.mubr.msk.bf16.gmra.mrb[12].mxu0 %vm229_vm1, %v11141_v50  ;;  %v1639_v55 = vpack.c.bf16 %v8231_v47, %v8230_v42  ;;  %v8305_v61 = vld [vmem:[%s13752_s0 + $0xa9] sm:$0xff]  ;;  %v8306_v1 = vld [vmem:[%s13752_s0 + $0xb1] sm:$0xff]  ;;  %v8307_v4 = vld [vmem:[%s13752_s0 + $0xc1] sm:$0xff]  ;;  %v1641_v10 = vpack.c.bf16 %v8235_v2, %v8234_v60 }
  0x37   :  { %9560 = vmatprep.mubr.msk.bf16.mxu0 %vm229_vm1, %v11143_v51  ;;  %v8308_v5 = vld [vmem:[%s13752_s0 + $0xc9] sm:$0xff]  ;;  %v11333_v9 = vpack.c.bf16 %v8306_v1, %v8305_v61  ;;  %v8238_v14 = vld [vmem:[%s13752_s0 + $0x240] sm:$0xff]  ;;  %v8311_v26 = vld [vmem:[%s13752_s0 + $0xf1] sm:$0xff] }
  0x38   :  { %v8236_v6 = vld [vmem:[%s13752_s0 + $0x228] sm:$0xff]  ;;  %v8237_v7 = vld [vmem:[%s13752_s0 + $0x230] sm:$0xff]  ;;  %v11335_v11 = vpack.c.bf16 %v8308_v5, %v8307_v4  ;;  %v8309_v15 = vld [vmem:[%s13752_s0 + $0xd9] sm:$0xff] }
  0x39   :  { %v1642_v13 = vpack.c.bf16 %v8237_v7, %v8236_v6  ;;  %v8310_v16 = vld [vmem:[%s13752_s0 + $0xe1] sm:$0xff]  ;;  %v8312_v27 = vld [vmem:[%s13752_s0 + $0xf9] sm:$0xff]  ;;  %v8313_v42 = vld [vmem:[%s13752_s0 + $0x109] sm:$0xff] }
  0x3a   :  { %v8239_v23 = vld [vmem:[%s13752_s0 + $0x248] sm:$0xff]  ;;  %v8240_v28 = vld [vmem:[%s13752_s0 + $0x258] sm:$0xff]  ;;  %v8241_v29 = vld [vmem:[%s13752_s0 + $0x260] sm:$0xff]  ;;  %v11367_v32 = vpack.c.bf16 %v8310_v16, %v8309_v15  ;;  %v11369_v35 = vpack.c.bf16 %v8312_v27, %v8311_v26 }
  0x3b   :  { %9351 = vmatmul.mubr.msk.bf16.gmra.mrb[4].mxu1 %vm229_vm1, %v11265_v36  ;;  %v1643_v34 = vpack.c.bf16 %v8239_v23, %v8238_v14  ;;  %v8314_v43 = vld [vmem:[%s13752_s0 + $0x111] sm:$0xff]  ;;  %v8315_v47 = vld [vmem:[%s13752_s0 + $0x121] sm:$0xff]  ;;  %v8316_v48 = vld [vmem:[%s13752_s0 + $0x129] sm:$0xff] }
  0x3c   :  { %9354 = vmatprep.mubr.msk.bf16.mxu1 %vm229_vm1, %v11267_v40  ;;  %v8243_v46 = vld [vmem:[%s13752_s0 + $0x278] sm:$0xff]  ;;  %v8244_v49 = vld [vmem:[%s13752_s0 + $0x288] sm:$0xff]  ;;  %v8245_v52 = vld [vmem:[%s13752_s0 + $0x290] sm:$0xff]  ;;  %v11401_v53 = vpack.c.bf16 %v8314_v43, %v8313_v42 }
  0x3d   :  { %v1646_v60 = vpack.c.bf16 %v8245_v52, %v8244_v49  ;;  %v8246_v61 = vld [vmem:[%s13752_s0 + $0x2a0] sm:$0xff]  ;;  %v8247_v4 = vld [vmem:[%s13752_s0 + $0x2a8] sm:$0xff]  ;;  %v8319_v5 = vld [vmem:[%s13752_s0 + $0x151] sm:$0xff] }
  0x3e   :  { %9561 = vmatmul.mubr.msk.bf16.gmra.mrb[16].mxu0 %vm229_vm1, %v11161_v56  ;;  %v8317_v1 = vld [vmem:[%s13752_s0 + $0x139] sm:$0xff]  ;;  %v8318_v2 = vld [vmem:[%s13752_s0 + $0x141] sm:$0xff]  ;;  %v1647_v14 = vpack.c.bf16 %v8247_v4, %v8246_v61  ;;  %v8321_v23 = vld [vmem:[%s13752_s0 + $0x169] sm:$0xff] }
  0x3f   :  { %9564 = vmatprep.mubr.msk.bf16.mxu0 %vm229_vm1, %v11163_v57  ;;  %v8320_v6 = vld [vmem:[%s13752_s0 + $0x159] sm:$0xff]  ;;  %v8322_v26 = vld [vmem:[%s13752_s0 + $0x171] sm:$0xff]  ;;  %v8255_v52 = vld [vmem:[%s13752_s0 + $0x308] sm:$0xff] }
  0x40   :  { %v8248_v7 = vld [vmem:[%s13752_s0 + $0x2b8] sm:$0xff]  ;;  %v11437_v15 = vpack.c.bf16 %v8320_v6, %v8319_v5  ;;  %v8250_v27 = vld [vmem:[%s13752_s0 + $0x2d0] sm:$0xff]  ;;  %v8254_v43 = vld [vmem:[%s13752_s0 + $0x300] sm:$0xff] }
  0x41   :  { %v164_v49 = vld [vmem:[%s13752_s0 + $0x1b9] sm:$0xff]  ;;  %v1651_v5 = vpack.c.bf16 %v8255_v52, %v8254_v43  ;;  %v8335_v43 = vld [vmem:[%s13752_s0 + $0x241] sm:$0xff] }
  0x42   :  { %v8338_v52 = vld [vmem:[%s13752_s0 + $0x261] sm:$0xff] }
  0x43   :  { %9355 = vmatmul.mubr.msk.bf16.gmra.mrb[8].mxu1 %vm229_vm1, %v11299_v54 }
  0x44   :  { %9358 = vmatprep.mubr.msk.bf16.mxu1 %vm229_vm1, %v11301_v58 }
  0x46   :  { %9565 = vmatmul.mubr.msk.bf16.gmra.mrb[20].mxu0 %vm229_vm1, %v11181_v62 }
  0x47   :  { %9568 = vmatprep.mubr.msk.bf16.mxu0 %vm229_vm1, %v11183_v63 }
  0x4b   :  { %9359 = vmatmul.mubr.msk.bf16.gmra.mrb[12].mxu1 %vm229_vm1, %v11333_v9 }
  0x4c   :  { %9362 = vmatprep.mubr.msk.bf16.mxu1 %vm229_vm1, %v11335_v11 }
  0x4e   :  { %9569 = vmatmul.mubr.msk.bf16.gmra.mrb[24].mxu0 %vm229_vm1, %v11227_v20 }
  0x4f   :  { %9572 = vmatprep.mubr.msk.bf16.mxu0 %vm229_vm1, %v11231_v22 }
  0x53   :  { %9363 = vmatmul.mubr.msk.bf16.gmra.mrb[16].mxu1 %vm229_vm1, %v11367_v32 }
  0x54   :  { %9366 = vmatprep.mubr.msk.bf16.mxu1 %vm229_vm1, %v11369_v35 }
  0x56   :  { %9573 = vmatmul.mubr.msk.bf16.gmra.mrb[28].mxu0 %vm229_vm1, %v1637_v37  ;;  %v1644_v37 = vpack.c.bf16 %v8241_v29, %v8240_v28  ;;  %v8251_v28 = vld [vmem:[%s13752_s0 + $0x2d8] sm:$0xff]  ;;  %v8252_v29 = vld [vmem:[%s13752_s0 + $0x2e8] sm:$0xff] }
  0x57   :  { %9576 = vmatprep.mubr.msk.bf16.mxu0 %vm229_vm1, %v1638_v41  ;;  %v8242_v41 = vld [vmem:[%s13752_s0 + $0x270] sm:$0xff] }
  0x5b   :  { %9367 = vmatmul.mubr.msk.bf16.gmra.mrb[20].mxu1 %vm229_vm1, %v11401_v53 }
  0x5e   :  { %9577 = vmatmul.mubr.msk.bf16.gmra.mrb[32].mxu0 %vm229_vm1, %v1639_v55  ;;  %v1645_v55 = vpack.c.bf16 %v8243_v46, %v8242_v41  ;;  %v1649_v41 = vpack.c.bf16 %v8251_v28, %v8250_v27  ;;  %v8325_v46 = vld [vmem:[%s13752_s0 + $0x1c9] sm:$0xff]  ;;  %v8332_v27 = vld [vmem:[%s13752_s0 + $0x219] sm:$0xff] }
  0x5f   :  { %9580 = vmatprep.mubr.msk.bf16.mxu0 %vm229_vm1, %v1640_v59  ;;  %v11403_v59 = vpack.c.bf16 %v8316_v48, %v8315_v47  ;;  %v8326_v47 = vld [vmem:[%s13752_s0 + $0x1d1] sm:$0xff] }
  0x60   :  { %v163_v48 = vld [vmem:[%s13752_s0 + $0x1b1] sm:$0xff]  ;;  %v11499_v4 = vpack.c.bf16 %v8326_v47, %v8325_v46  ;;  %v8336_v46 = vld [vmem:[%s13752_s0 + $0x249] sm:$0xff] }
  0x61   :  { %9370 = vmatprep.mubr.msk.bf16.mxu1 %vm229_vm1, %v11403_v59  ;;  %v211_v61 = vpack.c.bf16 %v164_v49, %v163_v48  ;;  %v11553_v48 = vpack.c.bf16 %v8336_v46, %v8335_v43  ;;  %v2853_v49 = vsel %vm326_vm0, %v11083_v33, 0  ;;  %v8339_v33 = vld [vmem:[%s13752_s0 + $0x271] sm:$0xff]  ;;  %v34_v46 = vld [vmem:[%s13752_s0] sm:$0xff] }
  0x66   :  { %9581 = vmatmul.mubr.msk.bf16.gmra.mrb[36].mxu0 %vm229_vm1, %v1641_v10  ;;  %v8249_v10 = vld [vmem:[%s13752_s0 + $0x2c0] sm:$0xff] }
  0x67   :  { %9584 = vmatprep.mubr.msk.bf16.mxu0 %vm229_vm1, %v1642_v13  ;;  %v11435_v13 = vpack.c.bf16 %v8318_v2, %v8317_v1  ;;  %v1648_v16 = vpack.c.bf16 %v8249_v10, %v8248_v7  ;;  %v8256_v1 = vld [vmem:[%s13752_s0 + $0x318] sm:$0xff]  ;;  %v8257_v2 = vld [vmem:[%s13752_s0 + $0x320] sm:$0xff]  ;;  %v8258_v10 = vld [vmem:[%s13752_s0 + $0x330] sm:$0xff] }
  0x68   :  { %v1652_v7 = vpack.c.bf16 %v8257_v2, %v8256_v1  ;;  %v8342_v1 = vld [vmem:[%s13752_s0 + $0x291] sm:$0xff]  ;;  %v8343_v2 = vld [vmem:[%s13752_s0 + $0x2a1] sm:$0xff] }
  0x69   :  { %9371 = vmatmul.mubr.msk.bf16.gmra.mrb[24].mxu1 %vm229_vm1, %v11435_v13 }
  0x6a   :  { %9374 = vmatprep.mubr.msk.bf16.mxu1 %vm229_vm1, %v11437_v15 }
  0x6e   :  { %9585 = vmatmul.mubr.msk.bf16.gmra.mrb[40].mxu0 %vm229_vm1, %v1643_v34  ;;  %v8253_v34 = vld [vmem:[%s13752_s0 + $0x2f0] sm:$0xff] }
  0x6f   :  { %9588 = vmatprep.mubr.msk.bf16.mxu0 %vm229_vm1, %v1644_v37  ;;  %v11463_v37 = vpack.c.bf16 %v8322_v26, %v8321_v23  ;;  %v1650_v42 = vpack.c.bf16 %v8253_v34, %v8252_v29  ;;  %v8259_v23 = vld [vmem:[%s13752_s0 + $0x338] sm:$0xff] }
  0x70   :  { %v8331_v26 = vld [vmem:[%s13752_s0 + $0x211] sm:$0xff]  ;;  %v1653_v29 = vpack.c.bf16 %v8259_v23, %v8258_v10  ;;  %v8346_v10 = vld [vmem:[%s13752_s0 + $0x2c1] sm:$0xff] }
  0x71   :  { %9375 = vmatmul.mubr.msk.bf16.gmra.mrb[28].mxu1 %vm229_vm1, %v11463_v37  ;;  %v11530_v34 = vpack.c.bf16 %v8332_v27, %v8331_v26  ;;  %v8350_v26 = vld [vmem:[%s13752_s0 + $0x2f1] sm:$0xff]  ;;  %v8351_v27 = vld [vmem:[%s13752_s0 + $0x301] sm:$0xff] }
  0x72   :  { %9378 = vmatprep.mubr.msk.bf16.mxu1 %vm229_vm1, %v211_v61 }
  0x76   :  { %9589 = vmatmul.mubr.msk.bf16.gmra.mrb[44].mxu0 %vm229_vm1, %v1645_v55  ;;  %v8327_v55 = vld [vmem:[%s13752_s0 + $0x1e1] sm:$0xff] }
  0x77   :  { %9592 = vmatprep.mubr.msk.bf16.mxu0 %vm229_vm1, %v1646_v60  ;;  %v8328_v60 = vld [vmem:[%s13752_s0 + $0x1e9] sm:$0xff] }
  0x78   :  { %v11502_v6 = vpack.c.bf16 %v8328_v60, %v8327_v55  ;;  %v11572_v55 = vld [vmem:[%s13753_s1 + $0xc] sm:$0x3] }
  0x79   :  { %9379 = vmatmul.mubr.msk.bf16.gmra.mrb[32].mxu1 %vm229_vm1, %v11499_v4 }
  0x7a   :  { %9382 = vmatprep.mubr.msk.bf16.mxu1 %vm229_vm1, %v11502_v6 }
  0x7e   :  { %9593 = vmatmul.mubr.msk.bf16.gmra.mrb[48].mxu0 %vm229_vm1, %v1647_v14  ;;  %v8329_v14 = vld [vmem:[%s13752_s0 + $0x1f9] sm:$0xff] }
  0x7f   :  { %9596 = vmatprep.mubr.msk.bf16.mxu0 %vm229_vm1, %v1648_v16  ;;  %v8330_v16 = vld [vmem:[%s13752_s0 + $0x201] sm:$0xff] }
  0x80   :  { %v11528_v28 = vpack.c.bf16 %v8330_v16, %v8329_v14  ;;  %v8347_v14 = vld [vmem:[%s13752_s0 + $0x2d1] sm:$0xff]  ;;  %v8348_v16 = vld [vmem:[%s13752_s0 + $0x2d9] sm:$0xff] }
  0x81   :  { %v11632_v23 = vpack.c.bf16 %v8348_v16, %v8347_v14  ;;  %v88_v14 = vld [vmem:[%s13752_s0 + $0x2b8] sm:$0xff]  ;;  %v8404_v16 = vld [vmem:[%s13752_s0 + $0xc2] sm:$0xff] }
  0x82   :  { %9383 = vmatmul.mubr.msk.bf16.gmra.mrb[36].mxu1 %vm229_vm1, %v11528_v28 }
  0x83   :  { %9386 = vmatprep.mubr.msk.bf16.mxu1 %vm229_vm1, %v11530_v34 }
  0x86   :  { %9597 = vmatmul.mubr.msk.bf16.gmra.mrb[52].mxu0 %vm229_vm1, %v1649_v41  ;;  %v8333_v41 = vld [vmem:[%s13752_s0 + $0x229] sm:$0xff] }
  0x87   :  { %9600 = vmatprep.mubr.msk.bf16.mxu0 %vm229_vm1, %v1650_v42  ;;  %v8334_v42 = vld [vmem:[%s13752_s0 + $0x231] sm:$0xff] }
  0x88   :  { %v11551_v47 = vpack.c.bf16 %v8334_v42, %v8333_v41  ;;  %v8354_v42 = vld [vmem:[%s13752_s0 + $0x321] sm:$0xff] }
  0x8a   :  { %9387 = vmatmul.mubr.msk.bf16.gmra.mrb[40].mxu1 %vm229_vm1, %v11551_v47 }
  0x8b   :  { %9390 = vmatprep.mubr.msk.bf16.mxu1 %vm229_vm1, %v11553_v48 }
  0x8e   :  { %9601 = vmatmul.mubr.msk.bf16.gmra.mrb[56].mxu0 %vm229_vm1, %v1651_v5  ;;  %v8344_v5 = vld [vmem:[%s13752_s0 + $0x2a9] sm:$0xff] }
  0x8f   :  { %9604 = vmatprep.mubr.msk.bf16.mxu0 %vm229_vm1, %v1652_v7  ;;  %v11610_v7 = vpack.c.bf16 %v8344_v5, %v8343_v2  ;;  %v8402_v2 = vld [vmem:[%s13752_s0 + $0xaa] sm:$0xff] }
  0x96   :  { %9605 = vmatmul.mubr.msk.bf16.gmra.mrb[60].mxu0 %vm229_vm1, %v1653_v29  ;;  %v8352_v29 = vld [vmem:[%s13752_s0 + $0x309] sm:$0xff] }
  0x97   :  { %9610 = vmatprep.mubr.msk.bf16.mxu0 %vm229_vm1, %v11224_v17  ;;  %v8337_v17 = vld [vmem:[%s13752_s0 + $0x259] sm:$0xff]  ;;  %v11653_v41 = vpack.c.bf16 %v8352_v29, %v8351_v27  ;;  %v8407_v27 = vld [vmem:[%s13752_s0 + $0xe2] sm:$0xff] }
  0x98   :  { %v11584_v60 = vpack.c.bf16 %v8338_v52, %v8337_v17  ;;  %v79_v17 = vld [vmem:[%s13752_s0 + $0x248] sm:$0xff] }
  0x9a   :  { %9391 = vmatmul.mubr.msk.bf16.gmra.mrb[44].mxu1 %vm229_vm1, %v11584_v60 }
  0x9e   :  { %9611 = vmatmul.mubr.msk.bf16.vlgmr.msra.gmra.mrb[0].mxu0 %vm229_vm1, %v11229_v21  ;;  %v8340_v21 = vld [vmem:[%s13752_s0 + $0x279] sm:$0xff] }
  0x9f   :  { %9675 = vmatpush3.bf16.msra.mxu0 %v2853_v49  ;;  %9614 = vmatprep.mubr.msk.bf16.mxu0 %vm229_vm1, %v11265_v36  ;;  %v11586_v61 = vpack.c.bf16 %v8340_v21, %v8339_v33  ;;  %v8341_v36 = vld [vmem:[%s13752_s0 + $0x289] sm:$0xff]  ;;  %v83_v21 = vld [vmem:[%s13752_s0 + $0x278] sm:$0xff] }
  0xa0   :  { %10857 = vmatprep.subr.msk.bf16.mxu0 %vm326_vm0, %v11572_v55  ;;  %v35_v49 = vld [vmem:[%s13752_s0 + $0x8] sm:$0xff]  ;;  %v82_v33 = vld [vmem:[%s13752_s0 + $0x270] sm:$0xff] }
  0xa1   :  { %9394 = vmatprep.mubr.msk.bf16.mxu1 %vm229_vm1, %v11586_v61 }
  0xa6   :  { %9615 = vmatmul.mubr.msk.bf16.gmra.mrb[4].mxu0 %vm229_vm1, %v11267_v40  ;;  %v11608_v40 = vpack.c.bf16 %v8342_v1, %v8341_v36  ;;  %v11871_v36 = vpack.c.bf16 %v83_v21, %v82_v33  ;;  %v85_v1 = vld [vmem:[%s13752_s0 + $0x290] sm:$0xff] }
  0xa7   :  { %9618 = vmatprep.mubr.msk.bf16.mxu0 %vm229_vm1, %v11299_v54  ;;  %v8345_v54 = vld [vmem:[%s13752_s0 + $0x2b9] sm:$0xff] }
  0xa8   :  { %9395 = vmatmul.mubr.msk.bf16.gmra.mrb[48].mxu1 %vm229_vm1, %v11608_v40  ;;  %v8423_v33 = vld [vmem:[%s13752_s0 + $0x1d2] sm:$0xff] }
  0xa9   :  { %9398 = vmatprep.mubr.msk.bf16.mxu1 %vm229_vm1, %v11610_v7 }
  0xae   :  { %9619 = vmatmul.mubr.msk.bf16.gmra.mrb[8].mxu0 %vm229_vm1, %v11301_v58  ;;  %v2198_v58 = vpack.c.bf16 %v8346_v10, %v8345_v54  ;;  %v86_v54 = vld [vmem:[%s13752_s0 + $0x2a0] sm:$0xff]  ;;  %v87_v10 = vld [vmem:[%s13752_s0 + $0x2a8] sm:$0xff] }
  0xaf   :  { %9622 = vmatprep.mubr.msk.bf16.mxu0 %vm229_vm1, %v11333_v9  ;;  %v8349_v9 = vld [vmem:[%s13752_s0 + $0x2e9] sm:$0xff] }
  0xb0   :  { %9399 = vmatmul.mubr.msk.bf16.gmra.mrb[52].mxu1 %vm229_vm1, %v2198_v58 }
  0xb1   :  { %9402 = vmatprep.mubr.msk.bf16.mxu1 %vm229_vm1, %v11632_v23 }
  0xb6   :  { %9623 = vmatmul.mubr.msk.bf16.gmra.mrb[12].mxu0 %vm229_vm1, %v11335_v11  ;;  %v2200_v11 = vpack.c.bf16 %v8350_v26, %v8349_v9  ;;  %v89_v9 = vld [vmem:[%s13752_s0 + $0x2c0] sm:$0xff] }
  0xb7   :  { %9626 = vmatprep.mubr.msk.bf16.mxu0 %vm229_vm1, %v11367_v32  ;;  %v8353_v32 = vld [vmem:[%s13752_s0 + $0x319] sm:$0xff]  ;;  %v11916_v29 = vpack.c.bf16 %v89_v9, %v88_v14  ;;  %v8432_v9 = vld [vmem:[%s13752_s0 + $0x242] sm:$0xff] }
  0xb8   :  { %9403 = vmatmul.mubr.msk.bf16.gmra.mrb[56].mxu1 %vm229_vm1, %v2200_v11  ;;  %v2202_v43 = vpack.c.bf16 %v8354_v42, %v8353_v32  ;;  %v8406_v26 = vld [vmem:[%s13752_s0 + $0xda] sm:$0xff]  ;;  %v90_v32 = vld [vmem:[%s13752_s0 + $0x2d0] sm:$0xff] }
  0xb9   :  { %9406 = vmatprep.mubr.msk.bf16.mxu1 %vm229_vm1, %v11653_v41  ;;  %v91_v42 = vld [vmem:[%s13752_s0 + $0x2d8] sm:$0xff] }
  0xba   :  { %v8431_v14 = vld [vmem:[%s13752_s0 + $0x232] sm:$0xff] }
  0xbe   :  { %9627 = vmatmul.mubr.msk.bf16.gmra.mrb[16].mxu0 %vm229_vm1, %v11369_v35  ;;  %v130_v35 = vld [vmem:[%s13753_s1] sm:$0x3] }
  0xbf   :  { %9630 = vmatprep.mubr.msk.bf16.mxu0 %vm229_vm1, %v11401_v53  ;;  %10851 = vmatprep.subr.msk.bf16.mxu1 %vm326_vm0, %v130_v35  ;;  %v716_v53 = vsel %vm326_vm0, %v130_v35, 0  ;;  %v8408_v35 = vld [vmem:[%s13752_s0 + $0xf2] sm:$0xff] }
  0xc0   :  { %9407 = vmatmul.mubr.msk.bf16.gmra.mrb[60].mxu1 %vm229_vm1, %v2202_v43 }
  0xc1   :  { %9411 = vmatpush3.bf16.msra.mxu1 %v716_v53  ;;  %v93_v53 = vld [vmem:[%s13752_s0 + $0x2f0] sm:$0xff] }
  0xc2   :  { %10853 = vmatprep.subr.msk.bf16.mxu1 %vm326_vm0, %v10976_v0  ;;  %v8324_v0 = vld [vmem:[%s13752_s0 + $0x189] sm:$0xff] }
  0xc6   :  { %9631 = vmatmul.mubr.msk.bf16.gmra.mrb[20].mxu0 %vm229_vm1, %v11403_v59  ;;  %v98_v59 = vpack.c.bf16 %v35_v49, %v34_v46  ;;  %v8409_v46 = vld [vmem:[%s13752_s0 + $0xfa] sm:$0xff]  ;;  %v11939_v49 = vpack.c.bf16 %v91_v42, %v90_v32  ;;  %v1039_v42 = vld [vmem:[%s13752_s0 + $0x1b2] sm:$0xff] }
  0xc7   :  { %9634 = vmatprep.mubr.msk.bf16.mxu0 %vm229_vm1, %v11435_v13  ;;  %v8323_v13 = vld [vmem:[%s13752_s0 + $0x181] sm:$0xff] }
  0xc8   :  { %9412 = vmatprep.mubr.msk.bf16.mxu1 %vm229_vm1, %v98_v59  ;;  %v8410_v59 = vld [vmem:[%s13752_s0 + $0x10a] sm:$0xff] }
  0xc9   :  { %9413 = vmatmul.mubr.msk.bf16.vlgmr.msra.gmra.mrb[0].mxu1 %vm229_vm1, %v11055_v25  ;;  %v2187_v25 = vpack.c.bf16 %v8324_v0, %v8323_v13  ;;  %v8411_v13 = vld [vmem:[%s13752_s0 + $0x112] sm:$0xff] }
  0xca   :  { %9416 = vmatprep.mubr.msk.bf16.mxu1 %vm229_vm1, %v11073_v30  ;;  %10209 = vmatpush3.bf16.msra.mxu1 %v10988_v3  ;;  %v66_v3 = vld [vmem:[%s13752_s0 + $0x1b0] sm:$0xff]  ;;  %v67_v30 = vld [vmem:[%s13752_s0 + $0x1b8] sm:$0xff] }
  0xce   :  { %9635 = vmatmul.mubr.msk.bf16.gmra.mrb[24].mxu0 %vm229_vm1, %v11437_v15  ;;  %v74_v15 = vld [vmem:[%s13752_s0 + $0x210] sm:$0xff] }
  0xcf   :  { %9638 = vmatprep.mubr.msk.bf16.mxu0 %vm229_vm1, %v11463_v37  ;;  %v75_v37 = vld [vmem:[%s13752_s0 + $0x218] sm:$0xff] }
  0xd1   :  { %9417 = vmatmul.mubr.msk.bf16.gmra.mrb[4].mxu1 %vm229_vm1, %v11075_v31  ;;  %v68_v31 = vld [vmem:[%s13752_s0 + $0x1c8] sm:$0xff] }
  0xd2   :  { %9420 = vmatprep.mubr.msk.bf16.mxu1 %vm229_vm1, %v11101_v38  ;;  %v114_v38 = vpack.c.bf16 %v67_v30, %v66_v3  ;;  %v2732_v3 = vpack.c.bf16 %v8411_v13, %v8410_v59  ;;  %v94_v30 = vld [vmem:[%s13752_s0 + $0x300] sm:$0xff]  ;;  %v8438_v59 = vld [vmem:[%s13752_s0 + $0x28a] sm:$0xff]  ;;  %v8439_v13 = vld [vmem:[%s13752_s0 + $0x292] sm:$0xff] }
  0xd6   :  { %9639 = vmatmul.mubr.msk.bf16.gmra.mrb[28].mxu0 %vm229_vm1, %v2187_v25  ;;  %v2731_v25 = vpack.c.bf16 %v8409_v46, %v8408_v35  ;;  %v8436_v35 = vld [vmem:[%s13752_s0 + $0x272] sm:$0xff]  ;;  %v8437_v46 = vld [vmem:[%s13752_s0 + $0x27a] sm:$0xff] }
  0xd7   :  { %9642 = vmatprep.mubr.msk.bf16.mxu0 %vm229_vm1, %v11499_v4  ;;  %v76_v4 = vld [vmem:[%s13752_s0 + $0x228] sm:$0xff] }
  0xd9   :  { %9421 = vmatmul.mubr.msk.bf16.gmra.mrb[8].mxu1 %vm229_vm1, %v11103_v39  ;;  %v69_v39 = vld [vmem:[%s13752_s0 + $0x1d0] sm:$0xff] }
  0xda   :  { %9424 = vmatprep.mubr.msk.bf16.mxu1 %vm229_vm1, %v11121_v44  ;;  %v115_v44 = vpack.c.bf16 %v69_v39, %v68_v31  ;;  %v95_v31 = vld [vmem:[%s13752_s0 + $0x308] sm:$0xff] }
  0xdb   :  { %v8412_v39 = vld [vmem:[%s13752_s0 + $0x122] sm:$0xff] }
  0xde   :  { %9643 = vmatmul.mubr.msk.bf16.gmra.mrb[32].mxu0 %vm229_vm1, %v11502_v6  ;;  %v11808_v6 = vpack.c.bf16 %v75_v37, %v74_v15  ;;  %v8416_v15 = vld [vmem:[%s13752_s0 + $0x152] sm:$0xff]  ;;  %v8417_v37 = vld [vmem:[%s13752_s0 + $0x15a] sm:$0xff] }
  0xdf   :  { %9646 = vmatprep.mubr.msk.bf16.mxu0 %vm229_vm1, %v11528_v28  ;;  %v77_v28 = vld [vmem:[%s13752_s0 + $0x230] sm:$0xff] }
  0xe1   :  { %9425 = vmatmul.mubr.msk.bf16.gmra.mrb[12].mxu1 %vm229_vm1, %v11123_v45  ;;  %v70_v45 = vld [vmem:[%s13752_s0 + $0x1e0] sm:$0xff] }
  0xe2   :  { %9428 = vmatprep.mubr.msk.bf16.mxu1 %vm229_vm1, %v11141_v50  ;;  %v71_v50 = vld [vmem:[%s13752_s0 + $0x1e8] sm:$0xff] }
  0xe6   :  { %9647 = vmatmul.mubr.msk.bf16.gmra.mrb[36].mxu0 %vm229_vm1, %v11530_v34  ;;  %v11813_v34 = vpack.c.bf16 %v77_v28, %v76_v4  ;;  %v8418_v4 = vld [vmem:[%s13752_s0 + $0x16a] sm:$0xff]  ;;  %v8419_v28 = vld [vmem:[%s13752_s0 + $0x172] sm:$0xff] }
  0xe7   :  { %9650 = vmatprep.mubr.msk.bf16.mxu0 %vm229_vm1, %v11551_v47  ;;  %v3404_v47 = vsel %vm326_vm0, %v11572_v55, 0 }
  0xe9   :  { %9429 = vmatmul.mubr.msk.bf16.gmra.mrb[16].mxu1 %vm229_vm1, %v11143_v51  ;;  %v72_v51 = vld [vmem:[%s13752_s0 + $0x1f8] sm:$0xff] }
  0xea   :  { %9432 = vmatprep.mubr.msk.bf16.mxu1 %vm229_vm1, %v11161_v56  ;;  %v8355_v56 = vld [vmem:[%s13752_s0 + $0x331] sm:$0xff] }
  0xee   :  { %9651 = vmatmul.mubr.msk.bf16.gmra.mrb[40].mxu0 %vm229_vm1, %v11553_v48  ;;  %v78_v48 = vld [vmem:[%s13752_s0 + $0x240] sm:$0xff] }
  0xef   :  { %9654 = vmatprep.mubr.msk.bf16.mxu0 %vm229_vm1, %v11584_v60  ;;  %v11841_v52 = vpack.c.bf16 %v79_v17, %v78_v48  ;;  %v84_v60 = vld [vmem:[%s13752_s0 + $0x288] sm:$0xff]  ;;  %v2736_v48 = vpack.c.bf16 %v8419_v28, %v8418_v4 }
  0xf0   :  { %v11882_v5 = vpack.c.bf16 %v85_v1, %v84_v60  ;;  %v8420_v17 = vld [vmem:[%s13752_s0 + $0x182] sm:$0xff]  ;;  %v8426_v1 = vld [vmem:[%s13752_s0 + $0x1fa] sm:$0xff]  ;;  %v8449_v28 = vld [vmem:[%s13752_s0 + $0x30a] sm:$0xff] }
  0xf1   :  { %9433 = vmatmul.mubr.msk.bf16.gmra.mrb[20].mxu1 %vm229_vm1, %v11163_v57  ;;  %v8356_v57 = vld [vmem:[%s13752_s0 + $0x339] sm:$0xff]  ;;  %v8448_v4 = vld [vmem:[%s13752_s0 + $0x302] sm:$0xff] }
  0xf2   :  { %9436 = vmatprep.mubr.msk.bf16.mxu1 %vm229_vm1, %v11181_v62  ;;  %v11785_v62 = vpack.c.bf16 %v71_v50, %v70_v45  ;;  %v11973_v45 = vpack.c.bf16 %v95_v31, %v94_v30  ;;  %v97_v50 = vld [vmem:[%s13752_s0 + $0x320] sm:$0xff]  ;;  %v8441_v31 = vld [vmem:[%s13752_s0 + $0x2aa] sm:$0xff] }
  0xf3   :  { %v8440_v30 = vld [vmem:[%s13752_s0 + $0x2a2] sm:$0xff] }
  0xf6   :  { %9655 = vmatmul.mubr.msk.bf16.gmra.mrb[44].mxu0 %vm229_vm1, %v11586_v61  ;;  %v8400_v61 = vld [vmem:[%s13752_s0 + $0x92] sm:$0xff] }
  0xf7   :  { %9658 = vmatprep.mubr.msk.bf16.mxu0 %vm229_vm1, %v11608_v40 }
  0xf9   :  { %9437 = vmatmul.mubr.msk.bf16.gmra.mrb[24].mxu1 %vm229_vm1, %v11183_v63  ;;  %v73_v63 = vld [vmem:[%s13752_s0 + $0x200] sm:$0xff] }
  0xfa   :  { %9440 = vmatprep.mubr.msk.bf16.mxu1 %vm229_vm1, %v11227_v20  ;;  %v11790_v20 = vpack.c.bf16 %v73_v63, %v72_v51  ;;  %v8414_v51 = vld [vmem:[%s13752_s0 + $0x13a] sm:$0xff] }
  0xfe   :  { %9659 = vmatmul.mubr.msk.bf16.gmra.mrb[48].mxu0 %vm229_vm1, %v11610_v7 }
  0xff   :  { %9662 = vmatprep.mubr.msk.bf16.mxu0 %vm229_vm1, %v2198_v58  ;;  %v8405_v58 = vld [vmem:[%s13752_s0 + $0xca] sm:$0xff] }
 0x101   :  { %9441 = vmatmul.mubr.msk.bf16.gmra.mrb[28].mxu1 %vm229_vm1, %v11231_v22  ;;  %v2203_v22 = vpack.c.bf16 %v8356_v57, %v8355_v56  ;;  %v8415_v56 = vld [vmem:[%s13752_s0 + $0x142] sm:$0xff] }
 0x102   :  { %9444 = vmatprep.mubr.msk.bf16.mxu1 %vm229_vm1, %v114_v38  ;;  %v96_v38 = vld [vmem:[%s13752_s0 + $0x318] sm:$0xff] }
 0x103   :  { %v11984_v57 = vpack.c.bf16 %v97_v50, %v96_v38  ;;  %v8442_v38 = vld [vmem:[%s13752_s0 + $0x2ba] sm:$0xff] }
 0x106   :  { %9663 = vmatmul.mubr.msk.bf16.gmra.mrb[52].mxu0 %vm229_vm1, %v11632_v23  ;;  %v11905_v23 = vpack.c.bf16 %v87_v10, %v86_v54  ;;  %v8429_v54 = vld [vmem:[%s13752_s0 + $0x21a] sm:$0xff]  ;;  %v8430_v10 = vld [vmem:[%s13752_s0 + $0x22a] sm:$0xff] }
 0x107   :  { %9666 = vmatprep.mubr.msk.bf16.mxu0 %vm229_vm1, %v2200_v11  ;;  %v2729_v11 = vpack.c.bf16 %v8405_v58, %v8404_v16  ;;  %v2742_v58 = vpack.c.bf16 %v8431_v14, %v8430_v10  ;;  %v12179_v14 = vld [vmem:[%s13753_s1 + $0x10] sm:$0x3] }
 0x109   :  { %9445 = vmatmul.mubr.msk.bf16.gmra.mrb[32].mxu1 %vm229_vm1, %v115_v44  ;;  %v8413_v44 = vld [vmem:[%s13752_s0 + $0x12a] sm:$0xff] }
 0x10a   :  { %9448 = vmatprep.mubr.msk.bf16.mxu1 %vm229_vm1, %v11785_v62  ;;  %v2733_v63 = vpack.c.bf16 %v8413_v44, %v8412_v39  ;;  %v8443_v39 = vld [vmem:[%s13752_s0 + $0x2c2] sm:$0xff]  ;;  %v2747_v44 = vpack.c.bf16 %v8441_v31, %v8440_v30  ;;  %v8506_v31 = vld [vmem:[%s13752_s0 + $0x110] sm:$0xff] }
 0x10b   :  { %v2748_v50 = vpack.c.bf16 %v8443_v39, %v8442_v38  ;;  %v8505_v30 = vld [vmem:[%s13752_s0 + $0x108] sm:$0xff]  ;;  %v8507_v38 = vld [vmem:[%s13752_s0 + $0x120] sm:$0xff] }
 0x10c   :  { %v8508_v39 = vld [vmem:[%s13752_s0 + $0x128] sm:$0xff] }
 0x10e   :  { %9667 = vmatmul.mubr.msk.bf16.gmra.mrb[56].mxu0 %vm229_vm1, %v11653_v41  ;;  %v2730_v41 = vpack.c.bf16 %v8407_v27, %v8406_v26  ;;  %v8433_v26 = vld [vmem:[%s13752_s0 + $0x24a] sm:$0xff]  ;;  %v8434_v27 = vld [vmem:[%s13752_s0 + $0x25a] sm:$0xff] }
 0x10f   :  { %9670 = vmatprep.mubr.msk.bf16.mxu0 %vm229_vm1, %v2202_v43  ;;  %v92_v43 = vld [vmem:[%s13752_s0 + $0x2e8] sm:$0xff] }
 0x110   :  { %v11950_v0 = vpack.c.bf16 %v93_v53, %v92_v43  ;;  %v1040_v43 = vld [vmem:[%s13752_s0 + $0x1ba] sm:$0xff] }
 0x111   :  { %9449 = vmatmul.mubr.msk.bf16.gmra.mrb[36].mxu1 %vm229_vm1, %v11790_v20  ;;  %v1087_v53 = vpack.c.bf16 %v1040_v43, %v1039_v42  ;;  %v8500_v42 = vld [vmem:[%s13752_s0 + $0xc8] sm:$0xff] }
 0x112   :  { %9452 = vmatprep.mubr.msk.bf16.mxu1 %vm229_vm1, %v11808_v6 }
 0x116   :  { %9671 = vmatmul.mubr.msk.bf16.gmra.mrb[60].mxu0 %vm229_vm1, %v2203_v22  ;;  %v2734_v22 = vpack.c.bf16 %v8415_v56, %v8414_v51  ;;  %v8444_v51 = vld [vmem:[%s13752_s0 + $0x2d2] sm:$0xff]  ;;  %v8445_v56 = vld [vmem:[%s13752_s0 + $0x2da] sm:$0xff] }
 0x117   :  { %9676 = vmatprep.mubr.msk.bf16.mxu0 %vm229_vm1, %v11000_v8  ;;  %v11826_v8 = vld [vmem:[%s13753_s1 + $0xe] sm:$0x3] }
 0x118   :  { %v3954_v10 = vsel %vm326_vm0, %v11826_v8, 0 }
 0x119   :  { %9453 = vmatmul.mubr.msk.bf16.gmra.mrb[40].mxu1 %vm229_vm1, %v11813_v34 }
 0x11a   :  { %9456 = vmatprep.mubr.msk.bf16.mxu1 %vm229_vm1, %v11841_v52 }
 0x11e   :  { %9677 = vmatmul.mubr.msk.bf16.vlgmr.msra.gmra.mrb[0].mxu0 %vm229_vm1, %v11011_v12  ;;  %v80_v12 = vld [vmem:[%s13752_s0 + $0x258] sm:$0xff] }
 0x11f   :  { %9741 = vmatpush3.bf16.msra.mxu0 %v3404_v47  ;;  %9680 = vmatprep.mubr.msk.bf16.mxu0 %vm229_vm1, %v11033_v18  ;;  %v81_v18 = vld [vmem:[%s13752_s0 + $0x260] sm:$0xff]  ;;  %v2735_v47 = vpack.c.bf16 %v8417_v37, %v8416_v15  ;;  %v2749_v15 = vpack.c.bf16 %v8445_v56, %v8444_v51  ;;  %v8509_v51 = vld [vmem:[%s13752_s0 + $0x138] sm:$0xff] }
 0x120   :  { %10858 = vmatprep.subr.msk.bf16.mxu0 %vm326_vm0, %v11826_v8  ;;  %v11846_v55 = vpack.c.bf16 %v81_v18, %v80_v12  ;;  %v8421_v12 = vld [vmem:[%s13752_s0 + $0x18a] sm:$0xff]  ;;  %v8494_v8 = vld [vmem:[%s13752_s0 + $0x80] sm:$0xff] }
 0x121   :  { %v8422_v18 = vld [vmem:[%s13752_s0 + $0x1ca] sm:$0xff]  ;;  %v2737_v21 = vpack.c.bf16 %v8421_v12, %v8420_v17  ;;  %v2751_v17 = vpack.c.bf16 %v8449_v28, %v8448_v4  ;;  %v8510_v56 = vld [vmem:[%s13752_s0 + $0x140] sm:$0xff] }
 0x122   :  { %9457 = vmatmul.mubr.msk.bf16.gmra.mrb[44].mxu1 %vm229_vm1, %v11846_v55  ;;  %v2738_v60 = vpack.c.bf16 %v8423_v33, %v8422_v18  ;;  %v8452_v18 = vld [vmem:[%s13752_s0 + $0x332] sm:$0xff]  ;;  %v8453_v33 = vld [vmem:[%s13752_s0 + $0x33a] sm:$0xff]  ;;  %v8513_v4 = vld [vmem:[%s13752_s0 + $0x168] sm:$0xff] }
 0x123   :  { %9460 = vmatprep.mubr.msk.bf16.mxu1 %vm229_vm1, %v11871_v36  ;;  %v8514_v28 = vld [vmem:[%s13752_s0 + $0x170] sm:$0xff] }
 0x126   :  { %9681 = vmatmul.mubr.msk.bf16.gmra.mrb[4].mxu0 %vm229_vm1, %v11035_v19  ;;  %v8401_v19 = vld [vmem:[%s13752_s0 + $0x9a] sm:$0xff] }
 0x127   :  { %9684 = vmatprep.mubr.msk.bf16.mxu0 %vm229_vm1, %v11053_v24  ;;  %v8403_v24 = vld [vmem:[%s13752_s0 + $0xb2] sm:$0xff]  ;;  %v2727_v40 = vpack.c.bf16 %v8401_v19, %v8400_v61  ;;  %v8424_v61 = vld [vmem:[%s13752_s0 + $0x1e2] sm:$0xff]  ;;  %v8425_v19 = vld [vmem:[%s13752_s0 + $0x1ea] sm:$0xff] }
 0x128   :  { %v2728_v7 = vpack.c.bf16 %v8403_v24, %v8402_v2  ;;  %v8427_v2 = vld [vmem:[%s13752_s0 + $0x202] sm:$0xff]  ;;  %v2739_v24 = vpack.c.bf16 %v8425_v19, %v8424_v61  ;;  %v2753_v61 = vpack.c.bf16 %v8453_v33, %v8452_v18  ;;  %v8517_v18 = vld [vmem:[%s13752_s0 + $0x198] sm:$0xff] }
 0x129   :  { %v8518_v33 = vld [vmem:[%s13752_s0 + $0x1a0] sm:$0xff] }
 0x12a   :  { %9461 = vmatmul.mubr.msk.bf16.gmra.mrb[48].mxu1 %vm229_vm1, %v11882_v5 }
 0x12b   :  { %9464 = vmatprep.mubr.msk.bf16.mxu1 %vm229_vm1, %v11905_v23 }
 0x12e   :  { %9685 = vmatmul.mubr.msk.bf16.gmra.mrb[8].mxu0 %vm229_vm1, %v2727_v40 }
 0x12f   :  { %9688 = vmatprep.mubr.msk.bf16.mxu0 %vm229_vm1, %v2728_v7 }
 0x132   :  { %9465 = vmatmul.mubr.msk.bf16.gmra.mrb[52].mxu1 %vm229_vm1, %v11916_v29 }
 0x133   :  { %9468 = vmatprep.mubr.msk.bf16.mxu1 %vm229_vm1, %v11939_v49 }
 0x136   :  { %9689 = vmatmul.mubr.msk.bf16.gmra.mrb[12].mxu0 %vm229_vm1, %v2729_v11 }
 0x137   :  { %9692 = vmatprep.mubr.msk.bf16.mxu0 %vm229_vm1, %v2730_v41 }
 0x13a   :  { %9469 = vmatmul.mubr.msk.bf16.gmra.mrb[56].mxu1 %vm229_vm1, %v11950_v0 }
 0x13b   :  { %9472 = vmatprep.mubr.msk.bf16.mxu1 %vm229_vm1, %v11973_v45 }
 0x13e   :  { %9693 = vmatmul.mubr.msk.bf16.gmra.mrb[16].mxu0 %vm229_vm1, %v2731_v25 }
 0x13f   :  { %9696 = vmatprep.mubr.msk.bf16.mxu0 %vm229_vm1, %v2732_v3 }
 0x142   :  { %9473 = vmatmul.mubr.msk.bf16.gmra.mrb[60].mxu1 %vm229_vm1, %v11984_v57 }
 0x143   :  { %9490 = vmatprep.mubr.msk.bf16.mxu1 %vm229_vm1, %v2727_v40  ;;  %v2740_v40 = vpack.c.bf16 %v8427_v2, %v8426_v1  ;;  %v8489_v1 = vld [vmem:[%s13752_s0 + $0x48] sm:$0xff]  ;;  %v8490_v2 = vld [vmem:[%s13752_s0 + $0x50] sm:$0xff] }
 0x146   :  { %9697 = vmatmul.mubr.msk.bf16.gmra.mrb[20].mxu0 %vm229_vm1, %v2733_v63 }
 0x147   :  { %9700 = vmatprep.mubr.msk.bf16.mxu0 %vm229_vm1, %v2734_v22 }
 0x14a   :  { %9491 = vmatmul.mubr.msk.bf16.vlgmr.msra.gmra.mrb[12].mxu1 %vm229_vm1, %v2728_v7  ;;  %v8428_v7 = vld [vmem:[%s13752_s0 + $0x212] sm:$0xff] }
 0x14b   :  { %9494 = vmatprep.mubr.msk.bf16.mxu1 %vm229_vm1, %v2729_v11  ;;  %v2741_v16 = vpack.c.bf16 %v8429_v54, %v8428_v7  ;;  %v8435_v11 = vld [vmem:[%s13752_s0 + $0x262] sm:$0xff]  ;;  %v3274_v7 = vpack.c.bf16 %v8490_v2, %v8489_v1 }
 0x14c   :  { %v2744_v32 = vpack.c.bf16 %v8435_v11, %v8434_v27  ;;  %v8497_v11 = vld [vmem:[%s13752_s0 + $0xa8] sm:$0xff] }
 0x14d   :  { %v8586_v2 = vld [vmem:[%s13752_s0 + $0x49] sm:$0xff] }
 0x14e   :  { %9701 = vmatmul.mubr.msk.bf16.gmra.mrb[24].mxu0 %vm229_vm1, %v2735_v47 }
 0x14f   :  { %9704 = vmatprep.mubr.msk.bf16.mxu0 %vm229_vm1, %v2736_v48 }
 0x152   :  { %9495 = vmatmul.mubr.msk.bf16.gmra.mrb[16].mxu1 %vm229_vm1, %v2730_v41  ;;  %v2743_v41 = vpack.c.bf16 %v8433_v26, %v8432_v9  ;;  %v8496_v9 = vld [vmem:[%s13752_s0 + $0x98] sm:$0xff] }
 0x153   :  { %9498 = vmatprep.mubr.msk.bf16.mxu1 %vm229_vm1, %v2731_v25  ;;  %v2745_v25 = vpack.c.bf16 %v8437_v46, %v8436_v35  ;;  %v8501_v46 = vld [vmem:[%s13752_s0 + $0xd8] sm:$0xff] }
 0x156   :  { %9705 = vmatmul.mubr.msk.bf16.gmra.mrb[28].mxu0 %vm229_vm1, %v2737_v21  ;;  %v8487_v21 = vld [vmem:[%s13752_s0 + $0x30] sm:$0xff] }
 0x157   :  { %9708 = vmatprep.mubr.msk.bf16.mxu0 %vm229_vm1, %v2738_v60 }
 0x15a   :  { %9499 = vmatmul.mubr.msk.bf16.gmra.mrb[20].mxu1 %vm229_vm1, %v2732_v3  ;;  %v2746_v3 = vpack.c.bf16 %v8439_v13, %v8438_v59  ;;  %v8503_v59 = vld [vmem:[%s13752_s0 + $0xf0] sm:$0xff]  ;;  %v8504_v13 = vld [vmem:[%s13752_s0 + $0xf8] sm:$0xff] }
 0x15b   :  { %9502 = vmatprep.mubr.msk.bf16.mxu1 %vm229_vm1, %v2733_v63  ;;  %v8446_v63 = vld [vmem:[%s13752_s0 + $0x2ea] sm:$0xff] }
 0x15e   :  { %9709 = vmatmul.mubr.msk.bf16.gmra.mrb[32].mxu0 %vm229_vm1, %v2739_v24 }
 0x15f   :  { %9712 = vmatprep.mubr.msk.bf16.mxu0 %vm229_vm1, %v2740_v40 }
 0x162   :  { %9503 = vmatmul.mubr.msk.bf16.gmra.mrb[24].mxu1 %vm229_vm1, %v2734_v22  ;;  %v8447_v22 = vld [vmem:[%s13752_s0 + $0x2f2] sm:$0xff] }
 0x163   :  { %9506 = vmatprep.mubr.msk.bf16.mxu1 %vm229_vm1, %v2735_v47  ;;  %v2750_v37 = vpack.c.bf16 %v8447_v22, %v8446_v63  ;;  %v8450_v47 = vld [vmem:[%s13752_s0 + $0x31a] sm:$0xff]  ;;  %v8511_v63 = vld [vmem:[%s13752_s0 + $0x150] sm:$0xff] }
 0x164   :  { %v8512_v22 = vld [vmem:[%s13752_s0 + $0x158] sm:$0xff] }
 0x166   :  { %9713 = vmatmul.mubr.msk.bf16.gmra.mrb[36].mxu0 %vm229_vm1, %v2741_v16 }
 0x167   :  { %9716 = vmatprep.mubr.msk.bf16.mxu0 %vm229_vm1, %v2742_v58 }
 0x16a   :  { %9507 = vmatmul.mubr.msk.bf16.gmra.mrb[28].mxu1 %vm229_vm1, %v2736_v48  ;;  %v8451_v48 = vld [vmem:[%s13752_s0 + $0x322] sm:$0xff] }
 0x16b   :  { %9510 = vmatprep.mubr.msk.bf16.mxu1 %vm229_vm1, %v1087_v53  ;;  %v2752_v12 = vpack.c.bf16 %v8451_v48, %v8450_v47  ;;  %v8502_v53 = vld [vmem:[%s13752_s0 + $0xe0] sm:$0xff]  ;;  %v8516_v48 = vld [vmem:[%s13752_s0 + $0x188] sm:$0xff] }
 0x16c   :  { %v8515_v47 = vld [vmem:[%s13752_s0 + $0x180] sm:$0xff] }
 0x16e   :  { %9717 = vmatmul.mubr.msk.bf16.gmra.mrb[40].mxu0 %vm229_vm1, %v2743_v41 }
 0x16f   :  { %9720 = vmatprep.mubr.msk.bf16.mxu0 %vm229_vm1, %v2744_v32 }
 0x172   :  { %9511 = vmatmul.mubr.msk.bf16.gmra.mrb[32].mxu1 %vm229_vm1, %v2738_v60  ;;  %v8488_v60 = vld [vmem:[%s13752_s0 + $0x38] sm:$0xff] }
 0x173   :  { %9514 = vmatprep.mubr.msk.bf16.mxu1 %vm229_vm1, %v2739_v24  ;;  %v3273_v19 = vpack.c.bf16 %v8488_v60, %v8487_v21  ;;  %v8491_v24 = vld [vmem:[%s13752_s0 + $0x60] sm:$0xff]  ;;  %v3288_v21 = vpack.c.bf16 %v8518_v33, %v8517_v18 }
 0x174   :  { %v8604_v33 = vld [vmem:[%s13752_s0 + $0x121] sm:$0xff] }
 0x176   :  { %9721 = vmatmul.mubr.msk.bf16.gmra.mrb[44].mxu0 %vm229_vm1, %v2745_v25 }
 0x177   :  { %9724 = vmatprep.mubr.msk.bf16.mxu0 %vm229_vm1, %v2746_v3 }
 0x17a   :  { %9515 = vmatmul.mubr.msk.bf16.gmra.mrb[36].mxu1 %vm229_vm1, %v2740_v40  ;;  %v8492_v40 = vld [vmem:[%s13752_s0 + $0x68] sm:$0xff] }
 0x17b   :  { %9518 = vmatprep.mubr.msk.bf16.mxu1 %vm229_vm1, %v2741_v16  ;;  %v3275_v54 = vpack.c.bf16 %v8492_v40, %v8491_v24  ;;  %v8493_v16 = vld [vmem:[%s13752_s0 + $0x78] sm:$0xff] }
 0x17c   :  { %v3276_v26 = vpack.c.bf16 %v8494_v8, %v8493_v16  ;;  %v8587_v24 = vld [vmem:[%s13752_s0 + $0x51] sm:$0xff] }
 0x17d   :  { %v3824_v8 = vpack.c.bf16 %v8587_v24, %v8586_v2  ;;  %v8609_v2 = vld [vmem:[%s13752_s0 + $0x159] sm:$0xff] }
 0x17e   :  { %9725 = vmatmul.mubr.msk.bf16.gmra.mrb[48].mxu0 %vm229_vm1, %v2747_v44 }
 0x17f   :  { %9728 = vmatprep.mubr.msk.bf16.mxu0 %vm229_vm1, %v2748_v50 }
 0x182   :  { %9519 = vmatmul.mubr.msk.bf16.gmra.mrb[40].mxu1 %vm229_vm1, %v2742_v58  ;;  %v8495_v58 = vld [vmem:[%s13752_s0 + $0x90] sm:$0xff] }
 0x183   :  { %9522 = vmatprep.mubr.msk.bf16.mxu1 %vm229_vm1, %v2743_v41  ;;  %v3277_v27 = vpack.c.bf16 %v8496_v9, %v8495_v58  ;;  %v8498_v41 = vld [vmem:[%s13752_s0 + $0xb0] sm:$0xff]  ;;  %v4504_v9 = vsel %vm326_vm0, %v12179_v14, 0 }
 0x184   :  { %v3278_v43 = vpack.c.bf16 %v8498_v41, %v8497_v11  ;;  %v8591_v11 = vld [vmem:[%s13752_s0 + $0x81] sm:$0xff] }
 0x186   :  { %9729 = vmatmul.mubr.msk.bf16.gmra.mrb[52].mxu0 %vm229_vm1, %v2749_v15 }
 0x187   :  { %9732 = vmatprep.mubr.msk.bf16.mxu0 %vm229_vm1, %v2750_v37 }
 0x18a   :  { %9523 = vmatmul.mubr.msk.bf16.gmra.mrb[44].mxu1 %vm229_vm1, %v2744_v32  ;;  %v8499_v32 = vld [vmem:[%s13752_s0 + $0xc0] sm:$0xff] }
 0x18b   :  { %9526 = vmatprep.mubr.msk.bf16.mxu1 %vm229_vm1, %v2745_v25  ;;  %v3279_v35 = vpack.c.bf16 %v8500_v42, %v8499_v32  ;;  %v3280_v25 = vpack.c.bf16 %v8502_v53, %v8501_v46  ;;  %v8593_v32 = vld [vmem:[%s13752_s0 + $0x99] sm:$0xff] }
 0x18e   :  { %9733 = vmatmul.mubr.msk.bf16.gmra.mrb[56].mxu0 %vm229_vm1, %v2751_v17 }
 0x18f   :  { %9736 = vmatprep.mubr.msk.bf16.mxu0 %vm229_vm1, %v2752_v12 }
 0x192   :  { %9527 = vmatmul.mubr.msk.bf16.gmra.mrb[48].mxu1 %vm229_vm1, %v2746_v3  ;;  %v3281_v3 = vpack.c.bf16 %v8504_v13, %v8503_v59  ;;  %v8594_v59 = vld [vmem:[%s13752_s0 + $0xa9] sm:$0xff]  ;;  %v8595_v13 = vld [vmem:[%s13752_s0 + $0xb1] sm:$0xff] }
 0x193   :  { %9530 = vmatprep.mubr.msk.bf16.mxu1 %vm229_vm1, %v2747_v44  ;;  %v3282_v44 = vpack.c.bf16 %v8506_v31, %v8505_v30  ;;  %v8597_v30 = vld [vmem:[%s13752_s0 + $0xc9] sm:$0xff] }
 0x196   :  { %9737 = vmatmul.mubr.msk.bf16.gmra.mrb[60].mxu0 %vm229_vm1, %v2753_v61 }
 0x197   :  { %9742 = vmatprep.mubr.msk.bf16.mxu0 %vm229_vm1, %v3273_v19 }
 0x19a   :  { %9531 = vmatmul.mubr.msk.bf16.gmra.mrb[52].mxu1 %vm229_vm1, %v2748_v50  ;;  %v3283_v50 = vpack.c.bf16 %v8508_v39, %v8507_v38  ;;  %v3828_v39 = vpack.c.bf16 %v8595_v13, %v8594_v59 }
 0x19b   :  { %9534 = vmatprep.mubr.msk.bf16.mxu1 %vm229_vm1, %v2749_v15  ;;  %v3284_v15 = vpack.c.bf16 %v8510_v56, %v8509_v51  ;;  %v8598_v51 = vld [vmem:[%s13752_s0 + $0xd9] sm:$0xff]  ;;  %v8599_v56 = vld [vmem:[%s13752_s0 + $0xe1] sm:$0xff] }
 0x19e   :  { %9743 = vmatmul.mubr.msk.bf16.vlgmr.msra.gmra.mrb[0].mxu0 %vm229_vm1, %v3274_v7  ;;  %v8588_v7 = vld [vmem:[%s13752_s0 + $0x61] sm:$0xff] }
 0x19f   :  { %9807 = vmatpush3.bf16.msra.mxu0 %v3954_v10  ;;  %9746 = vmatprep.mubr.msk.bf16.mxu0 %vm229_vm1, %v3275_v54  ;;  %v8589_v54 = vld [vmem:[%s13752_s0 + $0x69] sm:$0xff] }
 0x1a0   :  { %10859 = vmatprep.subr.msk.bf16.mxu0 %vm326_vm0, %v12179_v14  ;;  %v3825_v58 = vpack.c.bf16 %v8589_v54, %v8588_v7  ;;  %v8592_v14 = vld [vmem:[%s13752_s0 + $0x91] sm:$0xff] }
 0x1a1   :  { %v3827_v46 = vpack.c.bf16 %v8593_v32, %v8592_v14  ;;  %v8612_v14 = vld [vmem:[%s13752_s0 + $0x181] sm:$0xff]  ;;  %v8613_v32 = vld [vmem:[%s13752_s0 + $0x189] sm:$0xff] }
 0x1a2   :  { %9535 = vmatmul.mubr.msk.bf16.gmra.mrb[56].mxu1 %vm229_vm1, %v2750_v37  ;;  %v3285_v37 = vpack.c.bf16 %v8512_v22, %v8511_v63  ;;  %v8600_v22 = vld [vmem:[%s13752_s0 + $0xf1] sm:$0xff]  ;;  %v3837_v13 = vpack.c.bf16 %v8613_v32, %v8612_v14  ;;  %v8624_v14 = vld [vmem:[%s13752_s0 + $0x241] sm:$0xff]  ;;  %v8625_v32 = vld [vmem:[%s13752_s0 + $0x249] sm:$0xff] }
 0x1a3   :  { %9538 = vmatprep.mubr.msk.bf16.mxu1 %vm229_vm1, %v2751_v17  ;;  %v3286_v17 = vpack.c.bf16 %v8514_v28, %v8513_v4  ;;  %v3830_v28 = vpack.c.bf16 %v8599_v56, %v8598_v51  ;;  %v8616_v51 = vld [vmem:[%s13752_s0 + $0x1e1] sm:$0xff]  ;;  %v8617_v56 = vld [vmem:[%s13752_s0 + $0x1e9] sm:$0xff] }
 0x1a6   :  { %9747 = vmatmul.mubr.msk.bf16.gmra.mrb[4].mxu0 %vm229_vm1, %v3276_v26 }
 0x1a7   :  { %9750 = vmatprep.mubr.msk.bf16.mxu0 %vm229_vm1, %v3277_v27  ;;  %v8590_v27 = vld [vmem:[%s13752_s0 + $0x79] sm:$0xff] }
 0x1aa   :  { %9539 = vmatmul.mubr.msk.bf16.gmra.mrb[60].mxu1 %vm229_vm1, %v2752_v12  ;;  %v3287_v12 = vpack.c.bf16 %v8516_v48, %v8515_v47 }
 0x1ae   :  { %9751 = vmatmul.mubr.msk.bf16.gmra.mrb[8].mxu0 %vm229_vm1, %v3278_v43 }
 0x1af   :  { %9754 = vmatprep.mubr.msk.bf16.mxu0 %vm229_vm1, %v3279_v35  ;;  %v3826_v35 = vpack.c.bf16 %v8591_v11, %v8590_v27  ;;  %v8611_v27 = vld [vmem:[%s13752_s0 + $0x171] sm:$0xff] }
 0x1b6   :  { %9755 = vmatmul.mubr.msk.bf16.gmra.mrb[12].mxu0 %vm229_vm1, %v3280_v25 }
 0x1b7   :  { %9758 = vmatprep.mubr.msk.bf16.mxu0 %vm229_vm1, %v3281_v3  ;;  %v8596_v3 = vld [vmem:[%s13752_s0 + $0xc1] sm:$0xff] }
 0x1be   :  { %9759 = vmatmul.mubr.msk.bf16.gmra.mrb[16].mxu0 %vm229_vm1, %v3282_v44  ;;  %v3829_v44 = vpack.c.bf16 %v8597_v30, %v8596_v3  ;;  %v8614_v30 = vld [vmem:[%s13752_s0 + $0x199] sm:$0xff] }
 0x1bf   :  { %9762 = vmatprep.mubr.msk.bf16.mxu0 %vm229_vm1, %v3283_v50 }
 0x1c6   :  { %9763 = vmatmul.mubr.msk.bf16.gmra.mrb[20].mxu0 %vm229_vm1, %v3284_v15  ;;  %v8601_v15 = vld [vmem:[%s13752_s0 + $0xf9] sm:$0xff] }
 0x1c7   :  { %9766 = vmatprep.mubr.msk.bf16.mxu0 %vm229_vm1, %v3285_v37  ;;  %v3831_v47 = vpack.c.bf16 %v8601_v15, %v8600_v22 }
 0x1ce   :  { %9767 = vmatmul.mubr.msk.bf16.gmra.mrb[24].mxu0 %vm229_vm1, %v3286_v17  ;;  %v8602_v17 = vld [vmem:[%s13752_s0 + $0x109] sm:$0xff] }
 0x1cf   :  { %9770 = vmatprep.mubr.msk.bf16.mxu0 %vm229_vm1, %v3287_v12  ;;  %v8603_v12 = vld [vmem:[%s13752_s0 + $0x111] sm:$0xff] }
 0x1d6   :  { %9771 = vmatmul.mubr.msk.bf16.gmra.mrb[28].mxu0 %vm229_vm1, %v3288_v21  ;;  %v8605_v21 = vld [vmem:[%s13752_s0 + $0x129] sm:$0xff] }
 0x1d7   :  { %9774 = vmatprep.mubr.msk.bf16.mxu0 %vm229_vm1, %v11785_v62  ;;  %v12302_v62 = vpop.f32.mrb[0].mxu1 }
 0x1de   :  { %9775 = vmatmul.mubr.msk.bf16.gmra.mrb[32].mxu0 %vm229_vm1, %v11790_v20  ;;  %v12306_v20 = vpop.f32.mrb[1].mxu1 }
 0x1df   :  { %9778 = vmatprep.mubr.msk.bf16.mxu0 %vm229_vm1, %v11808_v6  ;;  %v8547_v6 = vld [vmem:[%s13752_s0 + $0x330] sm:$0xff] }
 0x1e6   :  { %9779 = vmatmul.mubr.msk.bf16.gmra.mrb[36].mxu0 %vm229_vm1, %v11813_v34  ;;  %v8548_v34 = vld [vmem:[%s13752_s0 + $0x338] sm:$0xff] }
 0x1e7   :  { %9782 = vmatprep.mubr.msk.bf16.mxu0 %vm229_vm1, %v11841_v52  ;;  %v12314_v52 = vpop.f32.mrb[2].mxu1 }
 0x1ee   :  { %9783 = vmatmul.mubr.msk.bf16.gmra.mrb[40].mxu0 %vm229_vm1, %v11846_v55  ;;  %v12316_v55 = vpop.f32.mrb[3].mxu1 }
 0x1ef   :  { %9786 = vmatprep.mubr.msk.bf16.mxu0 %vm229_vm1, %v11871_v36  ;;  %v3303_v36 = vpack.c.bf16 %v8548_v34, %v8547_v6 }
 0x1f6   :  { %9787 = vmatmul.mubr.msk.bf16.gmra.mrb[44].mxu0 %vm229_vm1, %v11882_v5  ;;  %v12320_v5 = vpop.f32.mrb[4].mxu1 }
 0x1f7   :  { %9790 = vmatprep.mubr.msk.bf16.mxu0 %vm229_vm1, %v11905_v23  ;;  %v8549_v23 = vld [vmem:[%s13752_s0 + $0x348] sm:$0xff] }
 0x1fe   :  { %9791 = vmatmul.mubr.msk.bf16.gmra.mrb[48].mxu0 %vm229_vm1, %v11916_v29  ;;  %v8550_v29 = vld [vmem:[%s13752_s0 + $0x350] sm:$0xff] }
 0x1ff   :  { %9794 = vmatprep.mubr.msk.bf16.mxu0 %vm229_vm1, %v11939_v49  ;;  %v12329_v49 = vpop.f32.mrb[5].mxu1  ;;  %v3304_v61 = vpack.c.bf16 %v8550_v29, %v8549_v23  ;;  %v3833_v23 = vpack.c.bf16 %v8605_v21, %v8604_v33  ;;  %v8619_v33 = vld [vmem:[%s13752_s0 + $0x201] sm:$0xff] }
 0x206   :  { %9795 = vmatmul.mubr.msk.bf16.gmra.mrb[52].mxu0 %vm229_vm1, %v11950_v0  ;;  %v8584_v0 = vld [vmem:[%s13752_s0 + $0x31] sm:$0xff] }
 0x207   :  { %9798 = vmatprep.mubr.msk.bf16.mxu0 %vm229_vm1, %v11973_v45  ;;  %v8585_v45 = vld [vmem:[%s13752_s0 + $0x39] sm:$0xff] }
 0x208   :  { %v3823_v19 = vpack.c.bf16 %v8585_v45, %v8584_v0  ;;  %v8606_v0 = vld [vmem:[%s13752_s0 + $0x139] sm:$0xff]  ;;  %v8607_v45 = vld [vmem:[%s13752_s0 + $0x141] sm:$0xff] }
 0x209   :  { %v3834_v54 = vpack.c.bf16 %v8607_v45, %v8606_v0 }
 0x20e   :  { %9799 = vmatmul.mubr.msk.bf16.gmra.mrb[56].mxu0 %vm229_vm1, %v11984_v57  ;;  %v12337_v57 = vpop.f32.mrb[6].mxu1 }
 0x20f   :  { %9802 = vmatprep.mubr.msk.bf16.mxu0 %vm229_vm1, %v3303_v36  ;;  %v12339_v60 = vpop.f32.mrb[7].mxu1  ;;  %v3832_v36 = vpack.c.bf16 %v8603_v12, %v8602_v17  ;;  %v8618_v12 = vld [vmem:[%s13752_s0 + $0x1f9] sm:$0xff] }
 0x210   :  { %v12342_v1 = vpop.f32.mrb[8].mxu1 }
 0x211   :  { %v12351_v40 = vpop.f32.mrb[9].mxu1 }
 0x212   :  { %v12359_v10 = vpop.f32.mrb[10].mxu1 }
 0x213   :  { %v12361_v16 = vpop.f32.mrb[11].mxu1 }
 0x216   :  { %9803 = vmatmul.mubr.msk.bf16.gmra.mrb[60].mxu0 %vm229_vm1, %v3304_v61 }
 0x217   :  { %9808 = vmatprep.mubr.msk.bf16.mxu0 %vm229_vm1, %v3823_v19  ;;  %v8608_v19 = vld [vmem:[%s13752_s0 + $0x151] sm:$0xff] }
 0x21d   :  { %v12366_v26 = vpop.f32.mrb[12].mxu1 }
 0x21e   :  { %9809 = vmatmul.mubr.msk.bf16.vlgmr.msra.gmra.mrb[0].mxu0 %vm229_vm1, %v3824_v8  ;;  %v12375_v41 = vpop.f32.mrb[13].mxu1  ;;  %v3835_v8 = vpack.c.bf16 %v8609_v2, %v8608_v19  ;;  %v3840_v19 = vpack.c.bf16 %v8619_v33, %v8618_v12  ;;  %v8628_v12 = vld [vmem:[%s13752_s0 + $0x271] sm:$0xff]  ;;  %v8629_v33 = vld [vmem:[%s13752_s0 + $0x279] sm:$0xff] }
 0x21f   :  { %9873 = vmatpush3.bf16.msra.mxu0 %v4504_v9  ;;  %9812 = vmatprep.mubr.msk.bf16.mxu0 %vm229_vm1, %v3825_v58  ;;  %v12383_v42 = vpop.f32.mrb[14].mxu1  ;;  %v8610_v9 = vld [vmem:[%s13752_s0 + $0x169] sm:$0xff] }
 0x220   :  { %v12385_v43 = vpop.f32.mrb[15].mxu1  ;;  %v3836_v59 = vpack.c.bf16 %v8611_v27, %v8610_v9  ;;  %v8623_v9 = vld [vmem:[%s13752_s0 + $0x231] sm:$0xff] }
 0x225   :  { %v12388_v53 = vpop.f32.mrb[16].mxu1 }
 0x226   :  { %9813 = vmatmul.mubr.msk.bf16.gmra.mrb[4].mxu0 %vm229_vm1, %v3826_v35  ;;  %v12397_v25 = vpop.f32.mrb[17].mxu1 }
 0x227   :  { %9816 = vmatprep.mubr.msk.bf16.mxu0 %vm229_vm1, %v3827_v46  ;;  %v12405_v31 = vpop.f32.mrb[18].mxu1 }
 0x228   :  { %v12407_v38 = vpop.f32.mrb[19].mxu1 }
 0x22d   :  { %v12410_v50 = vpop.f32.mrb[20].mxu1 }
 0x22e   :  { %9817 = vmatmul.mubr.msk.bf16.gmra.mrb[8].mxu0 %vm229_vm1, %v3828_v39  ;;  %v12419_v63 = vpop.f32.mrb[21].mxu1  ;;  %v8615_v39 = vld [vmem:[%s13752_s0 + $0x1a1] sm:$0xff] }
 0x22f   :  { %9820 = vmatprep.mubr.msk.bf16.mxu0 %vm229_vm1, %v3829_v44  ;;  %v12427_v37 = vpop.f32.mrb[22].mxu1 }
 0x230   :  { %v12429_v4 = vpop.f32.mrb[23].mxu1 }
 0x235   :  { %v12432_v48 = vpop.f32.mrb[24].mxu1 }
 0x236   :  { %9821 = vmatmul.mubr.msk.bf16.gmra.mrb[12].mxu0 %vm229_vm1, %v3830_v28  ;;  %v12441_v18 = vpop.f32.mrb[25].mxu1  ;;  %v3838_v28 = vpack.c.bf16 %v8615_v39, %v8614_v30  ;;  %v3843_v39 = vpack.c.bf16 %v8625_v32, %v8624_v14  ;;  %v8631_v14 = vld [vmem:[%s13752_s0 + $0x291] sm:$0xff] }
 0x237   :  { %9824 = vmatprep.mubr.msk.bf16.mxu0 %vm229_vm1, %v3831_v47  ;;  %v12449_v6 = vpop.f32.mrb[26].mxu1  ;;  %v3839_v47 = vpack.c.bf16 %v8617_v56, %v8616_v51  ;;  %v8626_v56 = vld [vmem:[%s13752_s0 + $0x259] sm:$0xff] }
 0x238   :  { %v12451_v34 = vpop.f32.mrb[27].mxu1 }
 0x23d   :  { %v12454_v29 = vpop.f32.mrb[28].mxu1 }
 0x23e   :  { %9825 = vmatmul.mubr.msk.bf16.gmra.mrb[16].mxu0 %vm229_vm1, %v3832_v36  ;;  %v12463_v61 = vpop.f32.mrb[29].mxu1  ;;  %v8620_v36 = vld [vmem:[%s13752_s0 + $0x211] sm:$0xff] }
 0x23f   :  { %9828 = vmatprep.mubr.msk.bf16.mxu0 %vm229_vm1, %v3833_v23  ;;  %v12471_v24 = vpop.f32.mrb[30].mxu1  ;;  %v8621_v23 = vld [vmem:[%s13752_s0 + $0x219] sm:$0xff] }
 0x240   :  { %v12473_v7 = vpop.f32.mrb[31].mxu1  ;;  %v3841_v2 = vpack.c.bf16 %v8621_v23, %v8620_v36 }
 0x245   :  { %v12476_v58 = vpop.f32.mrb[32].mxu1 }
 0x246   :  { %9829 = vmatmul.mubr.msk.bf16.gmra.mrb[20].mxu0 %vm229_vm1, %v3834_v54  ;;  %v12485_v11 = vpop.f32.mrb[33].mxu1 }
 0x247   :  { %9832 = vmatprep.mubr.msk.bf16.mxu0 %vm229_vm1, %v3835_v8  ;;  %v12493_v35 = vpop.f32.mrb[34].mxu1  ;;  %v8622_v8 = vld [vmem:[%s13752_s0 + $0x229] sm:$0xff] }
 0x248   :  { %v12495_v46 = vpop.f32.mrb[35].mxu1  ;;  %v3842_v30 = vpack.c.bf16 %v8623_v9, %v8622_v8  ;;  %v8630_v9 = vld [vmem:[%s13752_s0 + $0x289] sm:$0xff] }
 0x24d   :  { %v12498_v3 = vpop.f32.mrb[36].mxu1 }
 0x24e   :  { %9833 = vmatmul.mubr.msk.bf16.gmra.mrb[24].mxu0 %vm229_vm1, %v3836_v59  ;;  %v12507_v44 = vpop.f32.mrb[37].mxu1 }
 0x24f   :  { %9836 = vmatprep.mubr.msk.bf16.mxu0 %vm229_vm1, %v3837_v13  ;;  %v12515_v22 = vpop.f32.mrb[38].mxu1 }
 0x250   :  { %v12517_v15 = vpop.f32.mrb[39].mxu1 }
 0x255   :  { %v12520_v17 = vpop.f32.mrb[40].mxu1 }
 0x256   :  { %9837 = vmatmul.mubr.msk.bf16.gmra.mrb[28].mxu0 %vm229_vm1, %v3838_v28  ;;  %v12529_v21 = vpop.f32.mrb[41].mxu1  ;;  %v8627_v28 = vld [vmem:[%s13752_s0 + $0x261] sm:$0xff] }
 0x257   :  { %9840 = vmatprep.mubr.msk.bf16.mxu0 %vm229_vm1, %v3839_v47  ;;  %v12537_v0 = vpop.f32.mrb[42].mxu1 }
 0x258   :  { %v12539_v45 = vpop.f32.mrb[43].mxu1 }
 0x25d   :  { %v12542_v54 = vpop.f32.mrb[44].mxu1 }
 0x25e   :  { %9841 = vmatmul.mubr.msk.bf16.gmra.mrb[32].mxu0 %vm229_vm1, %v3840_v19  ;;  %v12551_v27 = vpop.f32.mrb[45].mxu1  ;;  %v3844_v19 = vpack.c.bf16 %v8627_v28, %v8626_v56 }
 0x25f   :  { %9844 = vmatprep.mubr.msk.bf16.mxu0 %vm229_vm1, %v3841_v2  ;;  %v12559_v59 = vpop.f32.mrb[46].mxu1  ;;  %v3845_v2 = vpack.c.bf16 %v8629_v33, %v8628_v12  ;;  %v3846_v12 = vpack.c.bf16 %v8631_v14, %v8630_v9  ;;  %v8636_v9 = vld [vmem:[%s13752_s0 + $0x2d1] sm:$0xff]  ;;  %v8637_v14 = vld [vmem:[%s13752_s0 + $0x2d9] sm:$0xff] }
 0x260   :  { %v12561_v13 = vpop.f32.mrb[47].mxu1 }
 0x265   :  { %v12564_v51 = vpop.f32.mrb[48].mxu1 }
 0x266   :  { %9845 = vmatmul.mubr.msk.bf16.gmra.mrb[36].mxu0 %vm229_vm1, %v3842_v30  ;;  %v12573_v47 = vpop.f32.mrb[49].mxu1  ;;  %v8632_v30 = vld [vmem:[%s13752_s0 + $0x2a1] sm:$0xff] }
 0x267   :  { %9848 = vmatprep.mubr.msk.bf16.mxu0 %vm229_vm1, %v3843_v39  ;;  %13766 = vst [vmem:[#allocation9_spill] sm:$0xff] %v12573_v47  ;;  %v12581_v36 = vpop.f32.mrb[50].mxu1  ;;  %v8633_v39 = vld [vmem:[%s13752_s0 + $0x2a9] sm:$0xff] }
 0x268   :  { %13767 = vst [vmem:[#allocation10_spill] sm:$0xff] %v12581_v36  ;;  %v12583_v23 = vpop.f32.mrb[51].mxu1  ;;  %v3847_v33 = vpack.c.bf16 %v8633_v39, %v8632_v30 }
 0x269   :  { %13768 = vst [vmem:[#allocation11_spill] sm:$0xff] %v12583_v23 }
 0x26d   :  { %v12586_v8 = vpop.f32.mrb[52].mxu1 }
 0x26e   :  { %9849 = vmatmul.mubr.msk.bf16.gmra.mrb[40].mxu0 %vm229_vm1, %v3844_v19  ;;  %13769 = vst [vmem:[#allocation12_spill] sm:$0xff] %v12586_v8  ;;  %v12595_v32 = vpop.f32.mrb[53].mxu1 }
 0x26f   :  { %9852 = vmatprep.mubr.msk.bf16.mxu0 %vm229_vm1, %v3845_v2  ;;  %13770 = vst [vmem:[#allocation13_spill] sm:$0xff] %v12595_v32  ;;  %v12603_v56 = vpop.f32.mrb[54].mxu1  ;;  %v8634_v2 = vld [vmem:[%s13752_s0 + $0x2b9] sm:$0xff]  ;;  %v8635_v32 = vld [vmem:[%s13752_s0 + $0x2c1] sm:$0xff] }
 0x270   :  { %13771 = vst [vmem:[#allocation14_spill] sm:$0xff] %v12603_v56  ;;  %v12605_v28 = vpop.f32.mrb[55].mxu1 }
 0x271   :  { %13772 = vst [vmem:[#allocation15_spill] sm:$0xff] %v12605_v28  ;;  %v8639_v28 = vld [vmem:[%s13752_s0 + $0x2f1] sm:$0xff] }
 0x275   :  { %v12608_v19 = vpop.f32.mrb[56].mxu1 }
 0x276   :  { %9853 = vmatmul.mubr.msk.bf16.gmra.mrb[44].mxu0 %vm229_vm1, %v3846_v12  ;;  %13773 = vst [vmem:[#allocation16_spill] sm:$0xff] %v12608_v19  ;;  %v12617_v8 = vpop.f32.mrb[57].mxu1  ;;  %v3848_v12 = vpack.c.bf16 %v8635_v32, %v8634_v2  ;;  %v8640_v32 = vld [vmem:[%s13752_s0 + $0x301] sm:$0xff]  ;;  %v8641_v2 = vld [vmem:[%s13752_s0 + $0x309] sm:$0xff] }
 0x277   :  { %9856 = vmatprep.mubr.msk.bf16.mxu0 %vm229_vm1, %v3847_v33  ;;  %13774 = vst [vmem:[#allocation17_spill] sm:$0xff] %v12617_v8  ;;  %v12625_v30 = vpop.f32.mrb[58].mxu1  ;;  %v3849_v33 = vpack.c.bf16 %v8637_v14, %v8636_v9  ;;  %v8638_v8 = vld [vmem:[%s13752_s0 + $0x2e9] sm:$0xff] }
 0x278   :  { %13775 = vst [vmem:[#allocation18_spill] sm:$0xff] %v12625_v30  ;;  %v12627_v39 = vpop.f32.mrb[59].mxu1 }
 0x279   :  { %13776 = vst [vmem:[#allocation19_spill] sm:$0xff] %v12627_v39 }
 0x27d   :  { %v12630_v19 = vpop.f32.mrb[60].mxu1 }
 0x27e   :  { %9857 = vmatmul.mubr.msk.bf16.gmra.mrb[48].mxu0 %vm229_vm1, %v3848_v12  ;;  %13777 = vst [vmem:[#allocation20_spill] sm:$0xff] %v12630_v19  ;;  %v12639_v56 = vpop.f32.mrb[61].mxu1  ;;  %v3850_v12 = vpack.c.bf16 %v8639_v28, %v8638_v8  ;;  %v8643_v19 = vld [vmem:[%s13752_s0 + $0x321] sm:$0xff]  ;;  %v8645_v8 = vld [vmem:[%s13752_s0 + $0x339] sm:$0xff] }
 0x27f   :  { %9860 = vmatprep.mubr.msk.bf16.mxu0 %vm229_vm1, %v3849_v33  ;;  %13778 = vst [vmem:[#allocation21_spill] sm:$0xff] %v12639_v56  ;;  %v12647_v9 = vpop.f32.mrb[62].mxu1  ;;  %v3851_v33 = vpack.c.bf16 %v8641_v2, %v8640_v32  ;;  %v8642_v56 = vld [vmem:[%s13752_s0 + $0x319] sm:$0xff]  ;;  %v8646_v2 = vld [vmem:[%s13752_s0 + $0x349] sm:$0xff] }
 0x280   :  { %13779 = vst [vmem:[#allocation22_spill] sm:$0xff] %v12647_v9  ;;  %v12649_v14 = vpop.f32.mrb[63].mxu1  ;;  %v8644_v9 = vld [vmem:[%s13752_s0 + $0x331] sm:$0xff]  ;;  %v3852_v28 = vpack.c.bf16 %v8643_v19, %v8642_v56  ;;  %v8682_v56 = vld [vmem:[%s13752_s0 + $0x3a] sm:$0xff] }
 0x281   :  { %13780 = vst [vmem:[#allocation23_spill] sm:$0xff] %v12649_v14  ;;  %v3853_v32 = vpack.c.bf16 %v8645_v8, %v8644_v9  ;;  %v8683_v8 = vld [vmem:[%s13752_s0 + $0x4a] sm:$0xff]  ;;  %v8779_v14 = vld [vmem:[%s13755_s3 + $0x4] sm:$0xf] }
 0x282   :  { %10860 = vmatprep.subr.msk.bf16.mxu1 %vm5367_vm4, %v8779_v14 }
 0x286   :  { %9861 = vmatmul.mubr.msk.bf16.gmra.mrb[52].mxu0 %vm229_vm1, %v3850_v12  ;;  %v8647_v12 = vld [vmem:[%s13752_s0 + $0x351] sm:$0xff] }
 0x287   :  { %9864 = vmatprep.mubr.msk.bf16.mxu0 %vm229_vm1, %v3851_v33  ;;  %v8681_v33 = vld [vmem:[%s13752_s0 + $0x32] sm:$0xff]  ;;  %v3854_v19 = vpack.c.bf16 %v8647_v12, %v8646_v2  ;;  %v8686_v2 = vld [vmem:[%s13752_s0 + $0x6a] sm:$0xff] }
 0x288   :  { %v4373_v9 = vpack.c.bf16 %v8682_v56, %v8681_v33  ;;  %v8687_v56 = vld [vmem:[%s13752_s0 + $0x7a] sm:$0xff] }
 0x28e   :  { %9865 = vmatmul.mubr.msk.bf16.gmra.mrb[56].mxu0 %vm229_vm1, %v3852_v28  ;;  %v8684_v28 = vld [vmem:[%s13752_s0 + $0x52] sm:$0xff] }
 0x28f   :  { %9868 = vmatprep.mubr.msk.bf16.mxu0 %vm229_vm1, %v3853_v32  ;;  %v8685_v32 = vld [vmem:[%s13752_s0 + $0x62] sm:$0xff]  ;;  %v4374_v12 = vpack.c.bf16 %v8684_v28, %v8683_v8  ;;  %v8690_v8 = vld [vmem:[%s13752_s0 + $0x9a] sm:$0xff] }
 0x290   :  { %v4375_v33 = vpack.c.bf16 %v8686_v2, %v8685_v32  ;;  %v8691_v2 = vld [vmem:[%s13752_s0 + $0xaa] sm:$0xff] }
 0x296   :  { %9869 = vmatmul.mubr.msk.bf16.gmra.mrb[60].mxu0 %vm229_vm1, %v3854_v19  ;;  %v8688_v19 = vld [vmem:[%s13752_s0 + $0x82] sm:$0xff] }
 0x297   :  { %9874 = vmatprep.mubr.msk.bf16.mxu0 %vm229_vm1, %v4373_v9  ;;  %v8689_v9 = vld [vmem:[%s13752_s0 + $0x92] sm:$0xff]  ;;  %v4376_v28 = vpack.c.bf16 %v8688_v19, %v8687_v56  ;;  %v8694_v56 = vld [vmem:[%s13752_s0 + $0xca] sm:$0xff] }
 0x298   :  { %v4377_v32 = vpack.c.bf16 %v8690_v8, %v8689_v9  ;;  %v8695_v8 = vld [vmem:[%s13752_s0 + $0xda] sm:$0xff] }
 0x29e   :  { %9875 = vmatmul.mubr.msk.bf16.vlgmr.msra.gmra.mrb[0].mxu0 %vm229_vm1, %v4374_v12  ;;  %v8692_v12 = vld [vmem:[%s13752_s0 + $0xb2] sm:$0xff] }
 0x29f   :  { %9878 = vmatprep.mubr.msk.bf16.mxu0 %vm229_vm1, %v4375_v33  ;;  %v8693_v33 = vld [vmem:[%s13752_s0 + $0xc2] sm:$0xff]  ;;  %v4378_v19 = vpack.c.bf16 %v8692_v12, %v8691_v2  ;;  %v8698_v2 = vld [vmem:[%s13752_s0 + $0xfa] sm:$0xff] }
 0x2a0   :  { %v4379_v9 = vpack.c.bf16 %v8694_v56, %v8693_v33  ;;  %v8699_v56 = vld [vmem:[%s13752_s0 + $0x10a] sm:$0xff] }
 0x2a6   :  { %9879 = vmatmul.mubr.msk.bf16.gmra.mrb[4].mxu0 %vm229_vm1, %v4376_v28  ;;  %v8696_v28 = vld [vmem:[%s13752_s0 + $0xe2] sm:$0xff] }
 0x2a7   :  { %9882 = vmatprep.mubr.msk.bf16.mxu0 %vm229_vm1, %v4377_v32  ;;  %v8697_v32 = vld [vmem:[%s13752_s0 + $0xf2] sm:$0xff]  ;;  %v4380_v12 = vpack.c.bf16 %v8696_v28, %v8695_v8  ;;  %v8702_v8 = vld [vmem:[%s13752_s0 + $0x12a] sm:$0xff] }
 0x2a8   :  { %v4381_v33 = vpack.c.bf16 %v8698_v2, %v8697_v32  ;;  %v8703_v2 = vld [vmem:[%s13752_s0 + $0x13a] sm:$0xff] }
 0x2ae   :  { %9883 = vmatmul.mubr.msk.bf16.gmra.mrb[8].mxu0 %vm229_vm1, %v4378_v19  ;;  %v8700_v19 = vld [vmem:[%s13752_s0 + $0x112] sm:$0xff] }
 0x2af   :  { %9886 = vmatprep.mubr.msk.bf16.mxu0 %vm229_vm1, %v4379_v9  ;;  %v8701_v9 = vld [vmem:[%s13752_s0 + $0x122] sm:$0xff]  ;;  %v4382_v28 = vpack.c.bf16 %v8700_v19, %v8699_v56  ;;  %v8706_v56 = vld [vmem:[%s13752_s0 + $0x15a] sm:$0xff] }
 0x2b0   :  { %v4383_v32 = vpack.c.bf16 %v8702_v8, %v8701_v9  ;;  %v8707_v8 = vld [vmem:[%s13752_s0 + $0x16a] sm:$0xff] }
 0x2b6   :  { %9887 = vmatmul.mubr.msk.bf16.gmra.mrb[12].mxu0 %vm229_vm1, %v4380_v12  ;;  %v8704_v12 = vld [vmem:[%s13752_s0 + $0x142] sm:$0xff] }
 0x2b7   :  { %9890 = vmatprep.mubr.msk.bf16.mxu0 %vm229_vm1, %v4381_v33  ;;  %v8705_v33 = vld [vmem:[%s13752_s0 + $0x152] sm:$0xff]  ;;  %v4384_v19 = vpack.c.bf16 %v8704_v12, %v8703_v2  ;;  %v8710_v2 = vld [vmem:[%s13752_s0 + $0x18a] sm:$0xff] }
 0x2b8   :  { %v4385_v9 = vpack.c.bf16 %v8706_v56, %v8705_v33  ;;  %v8711_v56 = vld [vmem:[%s13752_s0 + $0x19a] sm:$0xff] }
 0x2be   :  { %9891 = vmatmul.mubr.msk.bf16.gmra.mrb[16].mxu0 %vm229_vm1, %v4382_v28  ;;  %v8708_v28 = vld [vmem:[%s13752_s0 + $0x172] sm:$0xff] }
 0x2bf   :  { %9894 = vmatprep.mubr.msk.bf16.mxu0 %vm229_vm1, %v4383_v32  ;;  %v8709_v32 = vld [vmem:[%s13752_s0 + $0x182] sm:$0xff]  ;;  %v4386_v12 = vpack.c.bf16 %v8708_v28, %v8707_v8  ;;  %v8714_v8 = vld [vmem:[%s13752_s0 + $0x1ea] sm:$0xff] }
 0x2c0   :  { %v4387_v33 = vpack.c.bf16 %v8710_v2, %v8709_v32  ;;  %v8715_v2 = vld [vmem:[%s13752_s0 + $0x1fa] sm:$0xff] }
 0x2c6   :  { %9895 = vmatmul.mubr.msk.bf16.gmra.mrb[20].mxu0 %vm229_vm1, %v4384_v19  ;;  %v8712_v19 = vld [vmem:[%s13752_s0 + $0x1a2] sm:$0xff] }
 0x2c7   :  { %9898 = vmatprep.mubr.msk.bf16.mxu0 %vm229_vm1, %v4385_v9  ;;  %v8713_v9 = vld [vmem:[%s13752_s0 + $0x1e2] sm:$0xff]  ;;  %v4388_v28 = vpack.c.bf16 %v8712_v19, %v8711_v56  ;;  %v8718_v56 = vld [vmem:[%s13752_s0 + $0x21a] sm:$0xff] }
 0x2c8   :  { %v4389_v32 = vpack.c.bf16 %v8714_v8, %v8713_v9  ;;  %v8719_v8 = vld [vmem:[%s13752_s0 + $0x22a] sm:$0xff] }
 0x2ce   :  { %9899 = vmatmul.mubr.msk.bf16.gmra.mrb[24].mxu0 %vm229_vm1, %v4386_v12  ;;  %v8716_v12 = vld [vmem:[%s13752_s0 + $0x202] sm:$0xff] }
 0x2cf   :  { %9902 = vmatprep.mubr.msk.bf16.mxu0 %vm229_vm1, %v4387_v33  ;;  %v8717_v33 = vld [vmem:[%s13752_s0 + $0x212] sm:$0xff]  ;;  %v4390_v19 = vpack.c.bf16 %v8716_v12, %v8715_v2  ;;  %v8722_v2 = vld [vmem:[%s13752_s0 + $0x24a] sm:$0xff] }
 0x2d0   :  { %v4391_v9 = vpack.c.bf16 %v8718_v56, %v8717_v33  ;;  %v8723_v56 = vld [vmem:[%s13752_s0 + $0x25a] sm:$0xff] }
 0x2d6   :  { %9903 = vmatmul.mubr.msk.bf16.gmra.mrb[28].mxu0 %vm229_vm1, %v4388_v28  ;;  %v8720_v28 = vld [vmem:[%s13752_s0 + $0x232] sm:$0xff] }
 0x2d7   :  { %9906 = vmatprep.mubr.msk.bf16.mxu0 %vm229_vm1, %v4389_v32  ;;  %v8721_v32 = vld [vmem:[%s13752_s0 + $0x242] sm:$0xff]  ;;  %v4392_v12 = vpack.c.bf16 %v8720_v28, %v8719_v8  ;;  %v8726_v8 = vld [vmem:[%s13752_s0 + $0x27a] sm:$0xff] }
 0x2d8   :  { %v4393_v33 = vpack.c.bf16 %v8722_v2, %v8721_v32  ;;  %v8727_v2 = vld [vmem:[%s13752_s0 + $0x28a] sm:$0xff] }
 0x2de   :  { %9907 = vmatmul.mubr.msk.bf16.gmra.mrb[32].mxu0 %vm229_vm1, %v4390_v19  ;;  %v8724_v19 = vld [vmem:[%s13752_s0 + $0x262] sm:$0xff] }
 0x2df   :  { %9910 = vmatprep.mubr.msk.bf16.mxu0 %vm229_vm1, %v4391_v9  ;;  %v8725_v9 = vld [vmem:[%s13752_s0 + $0x272] sm:$0xff]  ;;  %v4394_v28 = vpack.c.bf16 %v8724_v19, %v8723_v56  ;;  %v8730_v56 = vld [vmem:[%s13752_s0 + $0x2aa] sm:$0xff] }
 0x2e0   :  { %v4395_v32 = vpack.c.bf16 %v8726_v8, %v8725_v9  ;;  %v8731_v8 = vld [vmem:[%s13752_s0 + $0x2ba] sm:$0xff] }
 0x2e6   :  { %9911 = vmatmul.mubr.msk.bf16.gmra.mrb[36].mxu0 %vm229_vm1, %v4392_v12  ;;  %v8728_v12 = vld [vmem:[%s13752_s0 + $0x292] sm:$0xff] }
 0x2e7   :  { %9914 = vmatprep.mubr.msk.bf16.mxu0 %vm229_vm1, %v4393_v33  ;;  %v8729_v33 = vld [vmem:[%s13752_s0 + $0x2a2] sm:$0xff]  ;;  %v4396_v19 = vpack.c.bf16 %v8728_v12, %v8727_v2  ;;  %v8734_v2 = vld [vmem:[%s13752_s0 + $0x2da] sm:$0xff] }
 0x2e8   :  { %v4397_v9 = vpack.c.bf16 %v8730_v56, %v8729_v33  ;;  %v8735_v56 = vld [vmem:[%s13752_s0 + $0x2ea] sm:$0xff] }
 0x2ee   :  { %9915 = vmatmul.mubr.msk.bf16.gmra.mrb[40].mxu0 %vm229_vm1, %v4394_v28  ;;  %v8732_v28 = vld [vmem:[%s13752_s0 + $0x2c2] sm:$0xff] }
 0x2ef   :  { %9918 = vmatprep.mubr.msk.bf16.mxu0 %vm229_vm1, %v4395_v32  ;;  %v8733_v32 = vld [vmem:[%s13752_s0 + $0x2d2] sm:$0xff]  ;;  %v4398_v12 = vpack.c.bf16 %v8732_v28, %v8731_v8  ;;  %v8738_v8 = vld [vmem:[%s13752_s0 + $0x30a] sm:$0xff] }
 0x2f0   :  { %v4399_v33 = vpack.c.bf16 %v8734_v2, %v8733_v32  ;;  %v8739_v2 = vld [vmem:[%s13752_s0 + $0x31a] sm:$0xff] }
 0x2f6   :  { %9919 = vmatmul.mubr.msk.bf16.gmra.mrb[44].mxu0 %vm229_vm1, %v4396_v19  ;;  %v8736_v19 = vld [vmem:[%s13752_s0 + $0x2f2] sm:$0xff] }
 0x2f7   :  { %9922 = vmatprep.mubr.msk.bf16.mxu0 %vm229_vm1, %v4397_v9  ;;  %v8737_v9 = vld [vmem:[%s13752_s0 + $0x302] sm:$0xff]  ;;  %v4400_v28 = vpack.c.bf16 %v8736_v19, %v8735_v56  ;;  %v8742_v56 = vld [vmem:[%s13752_s0 + $0x33a] sm:$0xff]  ;;  %v13762_v19 = vmov 0.0  }
 0x2f8   :  { %v4401_v32 = vpack.c.bf16 %v8738_v8, %v8737_v9  ;;  %5239 = vst.msk [vmem:[#allocation3 + $0x20] sm:$0xff] %vm4994_vm2, %v13762_v19  ;;  %5234 = vst.msk [vmem:[#allocation3] sm:$0xff] %vm4994_vm2, %v13762_v19 }
 0x2f9   :  { %5240 = vst.msk [vmem:[#allocation3 + $0x28] sm:$0x3] %vm5235_vm3, %v13762_v19  ;;  %5236 = vst.msk [vmem:[#allocation3 + $0x8] sm:$0x3] %vm5235_vm3, %v13762_v19 }
 0x2fa   :  { %5237 = vst.msk [vmem:[#allocation3 + $0x10] sm:$0xff] %vm4994_vm2, %v13762_v19  ;;  %5241 = vst.msk [vmem:[#allocation3 + $0x30] sm:$0xff] %vm4994_vm2, %v13762_v19 }
 0x2fb   :  { %5238 = vst.msk [vmem:[#allocation3 + $0x18] sm:$0x3] %vm5235_vm3, %v13762_v19  ;;  %5242 = vst.msk [vmem:[#allocation3 + $0x38] sm:$0x3] %vm5235_vm3, %v13762_v19 }
 0x2fc   :  { %5243 = vst.msk [vmem:[#allocation3 + $0x40] sm:$0xff] %vm4994_vm2, %v13762_v19  ;;  %5245 = vst.msk [vmem:[#allocation3 + $0x50] sm:$0xff] %vm4994_vm2, %v13762_v19 }
 0x2fd   :  { %5244 = vst.msk [vmem:[#allocation3 + $0x48] sm:$0x3] %vm5235_vm3, %v13762_v19  ;;  %5246 = vst.msk [vmem:[#allocation3 + $0x58] sm:$0x3] %vm5235_vm3, %v13762_v19 }
 0x2fe   :  { %9923 = vmatmul.mubr.msk.bf16.gmra.mrb[48].mxu0 %vm229_vm1, %v4398_v12  ;;  %v8740_v12 = vld [vmem:[%s13752_s0 + $0x322] sm:$0xff]  ;;  %5247 = vst.msk [vmem:[#allocation3 + $0x60] sm:$0xff] %vm4994_vm2, %v13762_v19  ;;  %5249 = vst.msk [vmem:[#allocation3 + $0x70] sm:$0xff] %vm4994_vm2, %v13762_v19 }
 0x2ff   :  { %9926 = vmatprep.mubr.msk.bf16.mxu0 %vm229_vm1, %v4399_v33  ;;  %v8741_v33 = vld [vmem:[%s13752_s0 + $0x332] sm:$0xff]  ;;  %5248 = vst.msk [vmem:[#allocation3 + $0x68] sm:$0x3] %vm5235_vm3, %v13762_v19  ;;  %5250 = vst.msk [vmem:[#allocation3 + $0x78] sm:$0x3] %vm5235_vm3, %v13762_v19  ;;  %v4402_v9 = vpack.c.bf16 %v8740_v12, %v8739_v2  ;;  %v5369_v2 = vsel %vm5367_vm4, %v8779_v14, 0 }
 0x300   :  { %5251 = vst.msk [vmem:[#allocation3 + $0x80] sm:$0xff] %vm4994_vm2, %v13762_v19  ;;  %5253 = vst.msk [vmem:[#allocation3 + $0x90] sm:$0xff] %vm4994_vm2, %v13762_v19  ;;  %v4403_v8 = vpack.c.bf16 %v8742_v56, %v8741_v33  ;;  %9939 = vmatpush3.bf16.msra.mxu1 %v5369_v2  ;;  %v12986_v33 = vld [vmem:[%s13754_s2] ss:$0 sm:$0xff] }
 0x301   :  { %5252 = vst.msk [vmem:[#allocation3 + $0x88] sm:$0x3] %vm5235_vm3, %v13762_v19  ;;  %5254 = vst.msk [vmem:[#allocation3 + $0x98] sm:$0x3] %vm5235_vm3, %v13762_v19 }
 0x302   :  { %5255 = vst.msk [vmem:[#allocation3 + $0xa0] sm:$0xff] %vm4994_vm2, %v13762_v19  ;;  %5257 = vst.msk [vmem:[#allocation3 + $0xb0] sm:$0xff] %vm4994_vm2, %v13762_v19 }
 0x303   :  { %5256 = vst.msk [vmem:[#allocation3 + $0xa8] sm:$0x3] %vm5235_vm3, %v13762_v19  ;;  %5258 = vst.msk [vmem:[#allocation3 + $0xb8] sm:$0x3] %vm5235_vm3, %v13762_v19 }
 0x304   :  { %5259 = vst.msk [vmem:[#allocation3 + $0xc0] sm:$0xff] %vm4994_vm2, %v13762_v19  ;;  %5261 = vst.msk [vmem:[#allocation3 + $0xd0] sm:$0xff] %vm4994_vm2, %v13762_v19 }
 0x305   :  { %5260 = vst.msk [vmem:[#allocation3 + $0xc8] sm:$0x3] %vm5235_vm3, %v13762_v19  ;;  %5262 = vst.msk [vmem:[#allocation3 + $0xd8] sm:$0x3] %vm5235_vm3, %v13762_v19 }
 0x306   :  { %9927 = vmatmul.mubr.msk.bf16.gmra.mrb[52].mxu0 %vm229_vm1, %v4400_v28  ;;  %5263 = vst.msk [vmem:[#allocation3 + $0xe0] sm:$0xff] %vm4994_vm2, %v13762_v19  ;;  %5265 = vst.msk [vmem:[#allocation3 + $0xf0] sm:$0xff] %vm4994_vm2, %v13762_v19  ;;  %v8743_v28 = vld [vmem:[%s13752_s0 + $0x34a] sm:$0xff] }
 0x307   :  { %9930 = vmatprep.mubr.msk.bf16.mxu0 %vm229_vm1, %v4401_v32  ;;  %5264 = vst.msk [vmem:[#allocation3 + $0xe8] sm:$0x3] %vm5235_vm3, %v13762_v19  ;;  %5266 = vst.msk [vmem:[#allocation3 + $0xf8] sm:$0x3] %vm5235_vm3, %v13762_v19  ;;  %v8744_v32 = vld [vmem:[%s13752_s0 + $0x352] sm:$0xff] }
 0x308   :  { %5267 = vst.msk [vmem:[#allocation3 + $0x100] sm:$0xff] %vm4994_vm2, %v13762_v19  ;;  %5269 = vst.msk [vmem:[#allocation3 + $0x110] sm:$0xff] %vm4994_vm2, %v13762_v19 }
 0x309   :  { %5268 = vst.msk [vmem:[#allocation3 + $0x108] sm:$0x3] %vm5235_vm3, %v13762_v19  ;;  %5270 = vst.msk [vmem:[#allocation3 + $0x118] sm:$0x3] %vm5235_vm3, %v13762_v19 }
 0x30a   :  { %5271 = vst.msk [vmem:[#allocation3 + $0x120] sm:$0xff] %vm4994_vm2, %v13762_v19  ;;  %5273 = vst.msk [vmem:[#allocation3 + $0x130] sm:$0xff] %vm4994_vm2, %v13762_v19 }
 0x30b   :  { %5272 = vst.msk [vmem:[#allocation3 + $0x128] sm:$0x3] %vm5235_vm3, %v13762_v19  ;;  %5274 = vst.msk [vmem:[#allocation3 + $0x138] sm:$0x3] %vm5235_vm3, %v13762_v19  ;;  %v4404_v19 = vpack.c.bf16 %v8744_v32, %v8743_v28 }
 0x30e   :  { %9931 = vmatmul.mubr.msk.bf16.gmra.mrb[56].mxu0 %vm229_vm1, %v4402_v9 }
 0x30f   :  { %9934 = vmatprep.mubr.msk.bf16.mxu0 %vm229_vm1, %v4403_v8 }
 0x316   :  { %9935 = vmatmul.mubr.msk.bf16.gmra.mrb[60].mxu0 %vm229_vm1, %v4404_v19 }
 0x371   :  { %v9876_v12 = vpop.f32.mrb[0].mxu0 }
 0x372   :  { %v10210_v56 = vadd.f32 %v9876_v12, %v12302_v62  ;;  %v4540_v9 = vpop.f32.mrb[1].mxu0 }
 0x373   :  { %v10211_v8 = vadd.f32 %v4540_v9, %v12306_v20  ;;  %v9877_v39 = vpop.f32.mrb[2].mxu0 }
 0x374   :  { %v4868_v28 = vadd.f32 %v10210_v56, %v12986_v33  ;;  %v10212_v32 = vadd.f32 %v9877_v39, %v12314_v52  ;;  %v4543_v19 = vpop.f32.mrb[3].mxu0  ;;  %v13001_v52 = vld [vmem:[%s13755_s3] sm:$0xf] }
 0x375   :  { %v4866_v14 = vadd.f32 %v10211_v8, %v12986_v33  ;;  %v10213_v2 = vadd.f32 %v4543_v19, %v12316_v55  ;;  %10861 = vmatprep.subr.msk.bf16.mxu1 %vm5367_vm4, %v13001_v52 }
 0x376   :  { %v4932_v30 = vmax.f32 %v4868_v28, 0.0  ;;  %v4869_v23 = vadd.f32 %v10212_v32, %v12986_v33 }
 0x377   :  { %v4930_v36 = vmax.f32 %v4866_v14, 0.0  ;;  %v4867_v47 = vadd.f32 %v10213_v2, %v12986_v33 }
 0x378   :  { %4997 = vst.msk [vmem:[#allocation2 + $0x10] sm:$0xff] %vm4994_vm2, %v4932_v30  ;;  %v4933_v62 = vmax.f32 %v4869_v23, 0.0 }
 0x379   :  { %4995 = vst.msk [vmem:[#allocation2] sm:$0xff] %vm4994_vm2, %v4930_v36  ;;  %v4931_v20 = vmax.f32 %v4867_v47, 0.0  ;;  %v9880_v12 = vpop.f32.mrb[4].mxu0 }
 0x37a   :  { %4998 = vst.msk [vmem:[#allocation2 + $0x18] sm:$0xff] %vm4994_vm2, %v4933_v62  ;;  %v10214_v55 = vadd.f32 %v9880_v12, %v12320_v5  ;;  %v4556_v39 = vpop.f32.mrb[5].mxu0 }
 0x37b   :  { %4996 = vst.msk [vmem:[#allocation2 + $0x8] sm:$0xff] %vm4994_vm2, %v4931_v20  ;;  %v10215_v23 = vadd.f32 %v4556_v39, %v12329_v49  ;;  %v9881_v36 = vpop.f32.mrb[6].mxu0 }
 0x37c   :  { %v4872_v47 = vadd.f32 %v10214_v55, %v12986_v33  ;;  %v10216_v30 = vadd.f32 %v9881_v36, %v12337_v57  ;;  %v4559_v56 = vpop.f32.mrb[7].mxu0 }
 0x37d   :  { %v4870_v9 = vadd.f32 %v10215_v23, %v12986_v33  ;;  %v10217_v8 = vadd.f32 %v4559_v56, %v12339_v60 }
 0x37e   :  { %v4936_v28 = vmax.f32 %v4872_v47, 0.0  ;;  %v4873_v5 = vadd.f32 %v10216_v30, %v12986_v33 }
 0x37f   :  { %v4934_v32 = vmax.f32 %v4870_v9, 0.0  ;;  %v4871_v19 = vadd.f32 %v10217_v8, %v12986_v33 }
 0x380   :  { %5001 = vst.msk [vmem:[#allocation2 + $0x30] sm:$0xff] %vm4994_vm2, %v4936_v28  ;;  %v4937_v14 = vmax.f32 %v4873_v5, 0.0 }
 0x381   :  { %4999 = vst.msk [vmem:[#allocation2 + $0x20] sm:$0xff] %vm4994_vm2, %v4934_v32  ;;  %v4935_v49 = vmax.f32 %v4871_v19, 0.0  ;;  %v9884_v2 = vpop.f32.mrb[8].mxu0  ;;  %v5139_v23 = vld [vmem:[#allocation2 + $0x10] ss:$2 sm:$0xff] }
 0x382   :  { %v5059_v62 = vld [vmem:[#allocation2] ss:$2 sm:$0xff]  ;;  %v5091_v57 = vld [vmem:[#allocation2 + $0x1] ss:$2 sm:$0xff]  ;;  %5002 = vst.msk [vmem:[#allocation2 + $0x38] sm:$0xff] %vm4994_vm2, %v4937_v14  ;;  %v10218_v20 = vadd.f32 %v9884_v2, %v12342_v1  ;;  %v4572_v60 = vpop.f32.mrb[9].mxu0 }
 0x383   :  { %v5122_v12 = vmax.f32 %v5059_v62, %v5091_v57  ;;  %5000 = vst.msk [vmem:[#allocation2 + $0x28] sm:$0xff] %vm4994_vm2, %v4935_v49  ;;  %v10219_v55 = vadd.f32 %v4572_v60, %v12351_v40  ;;  %v9885_v39 = vpop.f32.mrb[10].mxu0  ;;  %v5187_v28 = vld [vmem:[#allocation2 + $0x11] ss:$2 sm:$0xff] }
 0x384   :  { %v4876_v36 = vadd.f32 %v10218_v20, %v12986_v33  ;;  %v10220_v47 = vadd.f32 %v9885_v39, %v12359_v10  ;;  %v4575_v30 = vpop.f32.mrb[11].mxu0 }
 0x385   :  { %v5170_v56 = vmax.f32 %v5122_v12, %v5139_v23  ;;  %v4874_v9 = vadd.f32 %v10219_v55, %v12986_v33  ;;  %v10221_v8 = vadd.f32 %v4575_v30, %v12361_v16 }
 0x386   :  { %v4940_v1 = vmax.f32 %v4876_v36, 0.0  ;;  %v4877_v5 = vadd.f32 %v10220_v47, %v12986_v33 }
 0x387   :  { %v5218_v32 = vmax.f32 %v5170_v56, %v5187_v28  ;;  %v4938_v19 = vmax.f32 %v4874_v9, 0.0  ;;  %v4875_v40 = vadd.f32 %v10221_v8, %v12986_v33  ;;  %v5317_v28 = vld [vmem:[#allocation3 + $0x1] sm:$0xff] }
 0x388   :  { %5005 = vst.msk [vmem:[#allocation2 + $0x50] sm:$0xff] %vm4994_vm2, %v4940_v1  ;;  %v4941_v14 = vmax.f32 %v4877_v5, 0.0 }
 0x389   :  { %5276 = vst.msk [vmem:[#allocation3 + $0x11] sm:$0xff] %vm4994_vm2, %v5218_v32  ;;  %5003 = vst.msk [vmem:[#allocation2 + $0x40] sm:$0xff] %vm4994_vm2, %v4938_v19  ;;  %v4939_v10 = vmax.f32 %v4875_v40, 0.0  ;;  %v9888_v49 = vpop.f32.mrb[12].mxu0  ;;  %v5141_v55 = vld [vmem:[#allocation2 + $0x30] ss:$2 sm:$0xff] }
 0x38a   :  { %v5061_v2 = vld [vmem:[#allocation2 + $0x20] ss:$2 sm:$0xff]  ;;  %v5093_v62 = vld [vmem:[#allocation2 + $0x21] ss:$2 sm:$0xff]  ;;  %5006 = vst.msk [vmem:[#allocation2 + $0x58] sm:$0xff] %vm4994_vm2, %v4941_v14  ;;  %v10222_v16 = vadd.f32 %v9888_v49, %v12366_v26  ;;  %v4588_v57 = vpop.f32.mrb[13].mxu0 }
 0x38b   :  { %v5123_v20 = vmax.f32 %v5061_v2, %v5093_v62  ;;  %5004 = vst.msk [vmem:[#allocation2 + $0x48] sm:$0xff] %vm4994_vm2, %v4939_v10  ;;  %v10223_v60 = vadd.f32 %v4588_v57, %v12375_v41  ;;  %v9889_v12 = vpop.f32.mrb[14].mxu0  ;;  %v5189_v9 = vld [vmem:[#allocation2 + $0x31] ss:$2 sm:$0xff] }
 0x38c   :  { %v4880_v39 = vadd.f32 %v10222_v16, %v12986_v33  ;;  %v10224_v23 = vadd.f32 %v9889_v12, %v12383_v42  ;;  %v4591_v36 = vpop.f32.mrb[15].mxu0 }
 0x38d   :  { %v5171_v47 = vmax.f32 %v5123_v20, %v5141_v55  ;;  %v4878_v30 = vadd.f32 %v10223_v60, %v12986_v33  ;;  %v10225_v56 = vadd.f32 %v4591_v36, %v12385_v43 }
 0x38e   :  { %v4944_v26 = vmax.f32 %v4880_v39, 0.0  ;;  %v4881_v8 = vadd.f32 %v10224_v23, %v12986_v33 }
 0x38f   :  { %v5219_v1 = vmax.f32 %v5171_v47, %v5189_v9  ;;  %v4942_v5 = vmax.f32 %v4878_v30, 0.0  ;;  %v4879_v41 = vadd.f32 %v10225_v56, %v12986_v33 }
 0x390   :  { %5009 = vst.msk [vmem:[#allocation2 + $0x70] sm:$0xff] %vm4994_vm2, %v4944_v26  ;;  %v4945_v32 = vmax.f32 %v4881_v8, 0.0  ;;  %v13041_v19 = vld [vmem:[#allocation3 + $0x11] sm:$0xff] }
 0x391   :  { %5277 = vst.msk [vmem:[#allocation3 + $0x21] sm:$0xff] %vm4994_vm2, %v5219_v1  ;;  %5007 = vst.msk [vmem:[#allocation2 + $0x60] sm:$0xff] %vm4994_vm2, %v4942_v5  ;;  %v4943_v42 = vmax.f32 %v4879_v41, 0.0  ;;  %v9892_v43 = vpop.f32.mrb[16].mxu0  ;;  %v5333_v40 = vpack.c.bf16 %v13041_v19, %v5317_v28  ;;  %v5143_v20 = vld [vmem:[#allocation2 + $0x50] ss:$2 sm:$0xff] }
 0x392   :  { %v5063_v14 = vld [vmem:[#allocation2 + $0x40] ss:$2 sm:$0xff]  ;;  %v5095_v10 = vld [vmem:[#allocation2 + $0x41] ss:$2 sm:$0xff]  ;;  %5010 = vst.msk [vmem:[#allocation2 + $0x78] sm:$0xff] %vm4994_vm2, %v4945_v32  ;;  %v10226_v49 = vadd.f32 %v9892_v43, %v12388_v53  ;;  %v4604_v2 = vpop.f32.mrb[17].mxu0 }
 0x393   :  { %v5124_v62 = vmax.f32 %v5063_v14, %v5095_v10  ;;  %5008 = vst.msk [vmem:[#allocation2 + $0x68] sm:$0xff] %vm4994_vm2, %v4943_v42  ;;  %v10227_v16 = vadd.f32 %v4604_v2, %v12397_v25  ;;  %v9893_v57 = vpop.f32.mrb[18].mxu0  ;;  %9940 = vmatprep.mubr.msk.bf16.mxu1 %vm4994_vm2, %v5333_v40  ;;  %v5191_v36 = vld [vmem:[#allocation2 + $0x51] ss:$2 sm:$0xff] }
 0x394   :  { %v4884_v60 = vadd.f32 %v10226_v49, %v12986_v33  ;;  %v10228_v12 = vadd.f32 %v9893_v57, %v12405_v31  ;;  %v4607_v55 = vpop.f32.mrb[19].mxu0  ;;  %v13060_v31 = vld [vmem:[#allocation3 + $0x12] sm:$0xff] }
 0x395   :  { %v5172_v39 = vmax.f32 %v5124_v62, %v5143_v20  ;;  %v4882_v23 = vadd.f32 %v10227_v16, %v12986_v33  ;;  %v10229_v53 = vadd.f32 %v4607_v55, %v12407_v38 }
 0x396   :  { %v4948_v47 = vmax.f32 %v4884_v60, 0.0  ;;  %v4885_v30 = vadd.f32 %v10228_v12, %v12986_v33 }
 0x397   :  { %v5220_v56 = vmax.f32 %v5172_v39, %v5191_v36  ;;  %v4946_v25 = vmax.f32 %v4882_v23, 0.0  ;;  %v4883_v9 = vadd.f32 %v10229_v53, %v12986_v33 }
 0x398   :  { %5013 = vst.msk [vmem:[#allocation2 + $0x90] sm:$0xff] %vm4994_vm2, %v4948_v47  ;;  %v4949_v26 = vmax.f32 %v4885_v30, 0.0  ;;  %v13058_v8 = vld [vmem:[#allocation3 + $0x21] sm:$0xff] }
 0x399   :  { %v13062_v28 = vld [vmem:[#allocation3 + $0x22] sm:$0xff]  ;;  %5278 = vst.msk [vmem:[#allocation3 + $0x31] sm:$0xff] %vm4994_vm2, %v5220_v56  ;;  %5011 = vst.msk [vmem:[#allocation2 + $0x80] sm:$0xff] %vm4994_vm2, %v4946_v25  ;;  %v4947_v38 = vmax.f32 %v4883_v9, 0.0  ;;  %v9896_v1 = vpop.f32.mrb[20].mxu0  ;;  %v5493_v56 = vsel %vm5367_vm4, %v13001_v52, 0 }
 0x39a   :  { %v5065_v32 = vld [vmem:[#allocation2 + $0x60] ss:$2 sm:$0xff]  ;;  %v5097_v42 = vld [vmem:[#allocation2 + $0x61] ss:$2 sm:$0xff]  ;;  %5014 = vst.msk [vmem:[#allocation2 + $0x98] sm:$0xff] %vm4994_vm2, %v4949_v26  ;;  %v10230_v43 = vadd.f32 %v9896_v1, %v12410_v50  ;;  %v4620_v40 = vpop.f32.mrb[21].mxu0 }
 0x39b   :  { %v5125_v14 = vmax.f32 %v5065_v32, %v5097_v42  ;;  %5012 = vst.msk [vmem:[#allocation2 + $0x88] sm:$0xff] %vm4994_vm2, %v4947_v38  ;;  %v10231_v10 = vadd.f32 %v4620_v40, %v12419_v63  ;;  %v9897_v49 = vpop.f32.mrb[22].mxu0  ;;  %v5145_v2 = vld [vmem:[#allocation2 + $0x70] ss:$2 sm:$0xff]  ;;  %v5193_v55 = vld [vmem:[#allocation2 + $0x71] ss:$2 sm:$0xff] }
 0x39c   :  { %v4888_v62 = vadd.f32 %v10230_v43, %v12986_v33  ;;  %v10232_v16 = vadd.f32 %v9897_v49, %v12427_v37  ;;  %v4623_v57 = vpop.f32.mrb[23].mxu0  ;;  %v13094_v25 = vld [vmem:[%s13755_s3 + $0x8] sm:$0xf] }
 0x39d   :  { %v5173_v20 = vmax.f32 %v5125_v14, %v5145_v2  ;;  %v4886_v60 = vadd.f32 %v10231_v10, %v12986_v33  ;;  %v10233_v12 = vadd.f32 %v4623_v57, %v12429_v4 }
 0x39e   :  { %v4952_v50 = vmax.f32 %v4888_v62, 0.0  ;;  %v4889_v39 = vadd.f32 %v10232_v16, %v12986_v33 }
 0x39f   :  { %v5221_v23 = vmax.f32 %v5173_v20, %v5193_v55  ;;  %v4950_v53 = vmax.f32 %v4886_v60, 0.0  ;;  %v4887_v63 = vadd.f32 %v10233_v12, %v12986_v33 }
 0x3a0   :  { %5017 = vst.msk [vmem:[#allocation2 + $0xb0] sm:$0xff] %vm4994_vm2, %v4952_v50  ;;  %v4953_v36 = vmax.f32 %v4889_v39, 0.0  ;;  %v13081_v47 = vld [vmem:[#allocation3 + $0x31] sm:$0xff] }
 0x3a1   :  { %5279 = vst.msk [vmem:[#allocation3 + $0x41] sm:$0xff] %vm4994_vm2, %v5221_v23  ;;  %5015 = vst.msk [vmem:[#allocation2 + $0xa0] sm:$0xff] %vm4994_vm2, %v4950_v53  ;;  %v4951_v37 = vmax.f32 %v4887_v63, 0.0  ;;  %v9900_v30 = vpop.f32.mrb[24].mxu0  ;;  %v13087_v4 = vpack.c.bf16 %v13081_v47, %v13058_v8  ;;  %v5147_v52 = vld [vmem:[#allocation2 + $0x90] ss:$2 sm:$0xff] }
 0x3a2   :  { %v5067_v9 = vld [vmem:[#allocation2 + $0x80] ss:$2 sm:$0xff]  ;;  %v5099_v26 = vld [vmem:[#allocation2 + $0x81] ss:$2 sm:$0xff]  ;;  %5018 = vst.msk [vmem:[#allocation2 + $0xb8] sm:$0xff] %vm4994_vm2, %v4953_v36  ;;  %v10234_v38 = vadd.f32 %v9900_v30, %v12432_v48  ;;  %v4636_v1 = vpop.f32.mrb[25].mxu0 }
 0x3a3   :  { %v5126_v32 = vmax.f32 %v5067_v9, %v5099_v26  ;;  %5016 = vst.msk [vmem:[#allocation2 + $0xa8] sm:$0xff] %vm4994_vm2, %v4951_v37  ;;  %v10235_v42 = vadd.f32 %v4636_v1, %v12441_v18  ;;  %v9901_v43 = vpop.f32.mrb[26].mxu0  ;;  %9941 = vmatmul.mubr.msk.bf16.vlgmr.msra.gmra.mrb[64].mxu1 %vm4994_vm2, %v13087_v4  ;;  %v5195_v18 = vld [vmem:[#allocation2 + $0x91] ss:$2 sm:$0xff] }
 0x3a4   :  { %v4892_v40 = vadd.f32 %v10234_v38, %v12986_v33  ;;  %v10236_v14 = vadd.f32 %v9901_v43, %v12449_v6  ;;  %v4639_v10 = vpop.f32.mrb[27].mxu0  ;;  %9957 = vmatpush3.bf16.msra.mxu1 %v5493_v56  ;;  %v13113_v55 = vld [vmem:[#allocation3 + $0x32] sm:$0xff] }
 0x3a5   :  { %v5174_v49 = vmax.f32 %v5126_v32, %v5147_v52  ;;  %v4890_v48 = vadd.f32 %v10235_v42, %v12986_v33  ;;  %v10237_v2 = vadd.f32 %v4639_v10, %v12451_v34  ;;  %10862 = vmatprep.subr.msk.bf16.mxu1 %vm5367_vm4, %v13094_v25 }
 0x3a6   :  { %v4956_v62 = vmax.f32 %v4892_v40, 0.0  ;;  %v4893_v16 = vadd.f32 %v10236_v14, %v12986_v33 }
 0x3a7   :  { %v5222_v57 = vmax.f32 %v5174_v49, %v5195_v18  ;;  %v4954_v20 = vmax.f32 %v4890_v48, 0.0  ;;  %v4891_v60 = vadd.f32 %v10237_v2, %v12986_v33 }
 0x3a8   :  { %5021 = vst.msk [vmem:[#allocation2 + $0xd0] sm:$0xff] %vm4994_vm2, %v4956_v62  ;;  %v4957_v6 = vmax.f32 %v4893_v16, 0.0  ;;  %v13111_v12 = vld [vmem:[#allocation3 + $0x41] sm:$0xff] }
 0x3a9   :  { %v13115_v50 = vld [vmem:[#allocation3 + $0x42] sm:$0xff]  ;;  %5280 = vst.msk [vmem:[#allocation3 + $0x51] sm:$0xff] %vm4994_vm2, %v5222_v57  ;;  %5019 = vst.msk [vmem:[#allocation2 + $0xc0] sm:$0xff] %vm4994_vm2, %v4954_v20  ;;  %v4955_v34 = vmax.f32 %v4891_v60, 0.0  ;;  %v9904_v39 = vpop.f32.mrb[28].mxu0 }
 0x3aa   :  { %v5069_v63 = vld [vmem:[#allocation2 + $0xa0] ss:$2 sm:$0xff]  ;;  %v5101_v36 = vld [vmem:[#allocation2 + $0xa1] ss:$2 sm:$0xff]  ;;  %5022 = vst.msk [vmem:[#allocation2 + $0xd8] sm:$0xff] %vm4994_vm2, %v4957_v6  ;;  %v10238_v37 = vadd.f32 %v9904_v39, %v12454_v29  ;;  %v4652_v30 = vpop.f32.mrb[29].mxu0 }
 0x3ab   :  { %v5127_v56 = vmax.f32 %v5069_v63, %v5101_v36  ;;  %5020 = vst.msk [vmem:[#allocation2 + $0xc8] sm:$0xff] %vm4994_vm2, %v4955_v34  ;;  %v10239_v9 = vadd.f32 %v4652_v30, %v12463_v61  ;;  %v9905_v26 = vpop.f32.mrb[30].mxu0  ;;  %v5149_v38 = vld [vmem:[#allocation2 + $0xb0] ss:$2 sm:$0xff]  ;;  %v5197_v14 = vld [vmem:[#allocation2 + $0xb1] ss:$2 sm:$0xff] }
 0x3ac   :  { %v4896_v1 = vadd.f32 %v10238_v37, %v12986_v33  ;;  %v10240_v32 = vadd.f32 %v9905_v26, %v12471_v24  ;;  %v4655_v42 = vpop.f32.mrb[31].mxu0 }
 0x3ad   :  { %v5175_v43 = vmax.f32 %v5127_v56, %v5149_v38  ;;  %v4894_v52 = vadd.f32 %v10239_v9, %v12986_v33  ;;  %v10241_v40 = vadd.f32 %v4655_v42, %v12473_v7 }
 0x3ae   :  { %v4960_v29 = vmax.f32 %v4896_v1, 0.0  ;;  %v4897_v10 = vadd.f32 %v10240_v32, %v12986_v33 }
 0x3af   :  { %v5223_v49 = vmax.f32 %v5175_v43, %v5197_v14  ;;  %v4958_v48 = vmax.f32 %v4894_v52, 0.0  ;;  %v4895_v61 = vadd.f32 %v10241_v40, %v12986_v33 }
 0x3b0   :  { %5025 = vst.msk [vmem:[#allocation2 + $0xf0] sm:$0xff] %vm4994_vm2, %v4960_v29  ;;  %v4961_v2 = vmax.f32 %v4897_v10, 0.0  ;;  %v13134_v18 = vld [vmem:[#allocation3 + $0x51] sm:$0xff]  ;;  %v13373_v10 = vpack.c.bf16 %v13113_v55, %v13062_v28 }
 0x3b1   :  { %5281 = vst.msk [vmem:[#allocation3 + $0x61] sm:$0xff] %vm4994_vm2, %v5223_v49  ;;  %5023 = vst.msk [vmem:[#allocation2 + $0xe0] sm:$0xff] %vm4994_vm2, %v4958_v48  ;;  %v4959_v24 = vmax.f32 %v4895_v61, 0.0  ;;  %v9908_v62 = vpop.f32.mrb[32].mxu0  ;;  %v13140_v7 = vpack.c.bf16 %v13134_v18, %v13111_v12  ;;  %v5151_v63 = vld [vmem:[#allocation2 + $0xd0] ss:$2 sm:$0xff] }
 0x3b2   :  { %v5071_v16 = vld [vmem:[#allocation2 + $0xc0] ss:$2 sm:$0xff]  ;;  %v5103_v57 = vld [vmem:[#allocation2 + $0xc1] ss:$2 sm:$0xff]  ;;  %5026 = vst.msk [vmem:[#allocation2 + $0xf8] sm:$0xff] %vm4994_vm2, %v4961_v2  ;;  %v10242_v20 = vadd.f32 %v9908_v62, %v12476_v58  ;;  %v4668_v60 = vpop.f32.mrb[33].mxu0 }
 0x3b3   :  { %v5128_v6 = vmax.f32 %v5071_v16, %v5103_v57  ;;  %5024 = vst.msk [vmem:[#allocation2 + $0xe8] sm:$0xff] %vm4994_vm2, %v4959_v24  ;;  %v10243_v34 = vadd.f32 %v4668_v60, %v12485_v11  ;;  %v9909_v39 = vpop.f32.mrb[34].mxu0  ;;  %9944 = vmatprep.mubr.msk.bf16.mxu1 %vm4994_vm2, %v13140_v7  ;;  %v5199_v26 = vld [vmem:[#allocation2 + $0xd1] ss:$2 sm:$0xff] }
 0x3b4   :  { %v4900_v36 = vadd.f32 %v10242_v20, %v12986_v33  ;;  %v10244_v37 = vadd.f32 %v9909_v39, %v12493_v35  ;;  %v4671_v30 = vpop.f32.mrb[35].mxu0  ;;  %v13157_v35 = vld [vmem:[#allocation3 + $0x52] sm:$0xff] }
 0x3b5   :  { %v5176_v56 = vmax.f32 %v5128_v6, %v5151_v63  ;;  %v4898_v9 = vadd.f32 %v10243_v34, %v12986_v33  ;;  %v10245_v58 = vadd.f32 %v4671_v30, %v12495_v46  ;;  %v13378_v41 = vpack.c.bf16 %v13157_v35, %v13115_v50 }
 0x3b6   :  { %v4964_v38 = vmax.f32 %v4900_v36, 0.0  ;;  %v4901_v1 = vadd.f32 %v10244_v37, %v12986_v33 }
 0x3b7   :  { %v5224_v11 = vmax.f32 %v5176_v56, %v5199_v26  ;;  %v4962_v32 = vmax.f32 %v4898_v9, 0.0  ;;  %v4899_v42 = vadd.f32 %v10245_v58, %v12986_v33 }
 0x3b8   :  { %5029 = vst.msk [vmem:[#allocation2 + $0x110] sm:$0xff] %vm4994_vm2, %v4964_v38  ;;  %v4965_v43 = vmax.f32 %v4901_v1, 0.0  ;;  %v13155_v52 = vld [vmem:[#allocation3 + $0x61] sm:$0xff] }
 0x3b9   :  { %v13159_v40 = vld [vmem:[#allocation3 + $0x62] sm:$0xff]  ;;  %5282 = vst.msk [vmem:[#allocation3 + $0x71] sm:$0xff] %vm4994_vm2, %v5224_v11  ;;  %5027 = vst.msk [vmem:[#allocation2 + $0x100] sm:$0xff] %vm4994_vm2, %v4962_v32  ;;  %v4963_v46 = vmax.f32 %v4899_v42, 0.0  ;;  %v9912_v14 = vpop.f32.mrb[36].mxu0 }
 0x3ba   :  { %v5073_v49 = vld [vmem:[#allocation2 + $0xe0] ss:$2 sm:$0xff]  ;;  %v5105_v48 = vld [vmem:[#allocation2 + $0xe1] ss:$2 sm:$0xff]  ;;  %5030 = vst.msk [vmem:[#allocation2 + $0x118] sm:$0xff] %vm4994_vm2, %v4965_v43  ;;  %v10246_v61 = vadd.f32 %v9912_v14, %v12498_v3  ;;  %v4684_v2 = vpop.f32.mrb[37].mxu0 }
 0x3bb   :  { %v5129_v24 = vmax.f32 %v5073_v49, %v5105_v48  ;;  %5028 = vst.msk [vmem:[#allocation2 + $0x108] sm:$0xff] %vm4994_vm2, %v4963_v46  ;;  %v10247_v62 = vadd.f32 %v4684_v2, %v12507_v44  ;;  %v9913_v16 = vpop.f32.mrb[38].mxu0  ;;  %v5153_v57 = vld [vmem:[#allocation2 + $0xf0] ss:$2 sm:$0xff]  ;;  %v5201_v36 = vld [vmem:[#allocation2 + $0xf1] ss:$2 sm:$0xff] }
 0x3bc   :  { %v4904_v20 = vadd.f32 %v10246_v61, %v12986_v33  ;;  %v10248_v60 = vadd.f32 %v9913_v16, %v12515_v22  ;;  %v4687_v6 = vpop.f32.mrb[39].mxu0 }
 0x3bd   :  { %v5177_v34 = vmax.f32 %v5129_v24, %v5153_v57  ;;  %v4902_v39 = vadd.f32 %v10247_v62, %v12986_v33  ;;  %v10249_v63 = vadd.f32 %v4687_v6, %v12517_v15 }
 0x3be   :  { %v4968_v3 = vmax.f32 %v4904_v20, 0.0  ;;  %v4905_v37 = vadd.f32 %v10248_v60, %v12986_v33 }
 0x3bf   :  { %v5225_v30 = vmax.f32 %v5177_v34, %v5201_v36  ;;  %v4966_v56 = vmax.f32 %v4902_v39, 0.0  ;;  %v4903_v44 = vadd.f32 %v10249_v63, %v12986_v33 }
 0x3c0   :  { %5033 = vst.msk [vmem:[#allocation2 + $0x130] sm:$0xff] %vm4994_vm2, %v4968_v3  ;;  %v4969_v9 = vmax.f32 %v4905_v37, 0.0  ;;  %v13178_v58 = vld [vmem:[#allocation3 + $0x71] sm:$0xff] }
 0x3c1   :  { %5283 = vst.msk [vmem:[#allocation3 + $0x81] sm:$0xff] %vm4994_vm2, %v5225_v30  ;;  %5031 = vst.msk [vmem:[#allocation2 + $0x120] sm:$0xff] %vm4994_vm2, %v4966_v56  ;;  %v4967_v22 = vmax.f32 %v4903_v44, 0.0  ;;  %v9916_v26 = vpop.f32.mrb[40].mxu0  ;;  %v13184_v15 = vpack.c.bf16 %v13178_v58, %v13155_v52  ;;  %v5155_v14 = vld [vmem:[#allocation2 + $0x110] ss:$2 sm:$0xff] }
 0x3c2   :  { %v5075_v38 = vld [vmem:[#allocation2 + $0x100] ss:$2 sm:$0xff]  ;;  %v5107_v1 = vld [vmem:[#allocation2 + $0x101] ss:$2 sm:$0xff]  ;;  %5034 = vst.msk [vmem:[#allocation2 + $0x138] sm:$0xff] %vm4994_vm2, %v4969_v9  ;;  %v10250_v11 = vadd.f32 %v9916_v26, %v12520_v17  ;;  %v4700_v32 = vpop.f32.mrb[41].mxu0 }
 0x3c3   :  { %v5130_v42 = vmax.f32 %v5075_v38, %v5107_v1  ;;  %5032 = vst.msk [vmem:[#allocation2 + $0x128] sm:$0xff] %vm4994_vm2, %v4967_v22  ;;  %v10251_v43 = vadd.f32 %v4700_v32, %v12529_v21  ;;  %v9917_v46 = vpop.f32.mrb[42].mxu0  ;;  %9945 = vmatmul.mubr.msk.bf16.gmra.mrb[68].mxu1 %vm4994_vm2, %v13184_v15  ;;  %v5203_v62 = vld [vmem:[#allocation2 + $0x111] ss:$2 sm:$0xff] }
 0x3c4   :  { %v4908_v49 = vadd.f32 %v10250_v11, %v12986_v33  ;;  %v10252_v48 = vadd.f32 %v9917_v46, %v12537_v0  ;;  %v4703_v61 = vpop.f32.mrb[43].mxu0 }
 0x3c5   :  { %v5178_v2 = vmax.f32 %v5130_v42, %v5155_v14  ;;  %v4906_v24 = vadd.f32 %v10251_v43, %v12986_v33  ;;  %v10253_v17 = vadd.f32 %v4703_v61, %v12539_v45  ;;  %v5325_v42 = vld [vmem:[#allocation3 + $0xa1] sm:$0xff] }
 0x3c6   :  { %v4972_v16 = vmax.f32 %v4908_v49, 0.0  ;;  %v4909_v57 = vadd.f32 %v10252_v48, %v12986_v33 }
 0x3c7   :  { %v5226_v21 = vmax.f32 %v5178_v2, %v5203_v62  ;;  %v4970_v20 = vmax.f32 %v4906_v24, 0.0  ;;  %v4907_v60 = vadd.f32 %v10253_v17, %v12986_v33 }
 0x3c8   :  { %5037 = vst.msk [vmem:[#allocation2 + $0x150] sm:$0xff] %vm4994_vm2, %v4972_v16  ;;  %v4973_v6 = vmax.f32 %v4909_v57, 0.0  ;;  %v13781_v16 = vld [vmem:[#allocation9_spill] sm:$0xff] }
 0x3c9   :  { %5284 = vst.msk [vmem:[#allocation3 + $0xb1] sm:$0xff] %vm4994_vm2, %v5226_v21  ;;  %5035 = vst.msk [vmem:[#allocation2 + $0x140] sm:$0xff] %vm4994_vm2, %v4970_v20  ;;  %v4971_v0 = vmax.f32 %v4907_v60, 0.0  ;;  %v9920_v34 = vpop.f32.mrb[44].mxu0  ;;  %v5157_v56 = vld [vmem:[#allocation2 + $0x130] ss:$2 sm:$0xff] }
 0x3ca   :  { %v5077_v39 = vld [vmem:[#allocation2 + $0x120] ss:$2 sm:$0xff]  ;;  %v5109_v63 = vld [vmem:[#allocation2 + $0x121] ss:$2 sm:$0xff]  ;;  %5038 = vst.msk [vmem:[#allocation2 + $0x158] sm:$0xff] %vm4994_vm2, %v4973_v6  ;;  %v10254_v45 = vadd.f32 %v9920_v34, %v12542_v54  ;;  %v4716_v36 = vpop.f32.mrb[45].mxu0 }
 0x3cb   :  { %v5131_v3 = vmax.f32 %v5077_v39, %v5109_v63  ;;  %5036 = vst.msk [vmem:[#allocation2 + $0x148] sm:$0xff] %vm4994_vm2, %v4971_v0  ;;  %v10255_v37 = vadd.f32 %v4716_v36, %v12551_v27  ;;  %v9921_v30 = vpop.f32.mrb[46].mxu0  ;;  %v5205_v11 = vld [vmem:[#allocation2 + $0x131] ss:$2 sm:$0xff] }
 0x3cc   :  { %v4912_v44 = vadd.f32 %v10254_v45, %v12986_v33  ;;  %v10256_v9 = vadd.f32 %v9921_v30, %v12559_v59  ;;  %v4719_v22 = vpop.f32.mrb[47].mxu0  ;;  %v13782_v6 = vld [vmem:[#allocation10_spill] sm:$0xff]  ;;  %v13783_v45 = vld [vmem:[#allocation11_spill] sm:$0xff] }
 0x3cd   :  { %v5179_v26 = vmax.f32 %v5131_v3, %v5157_v56  ;;  %v4910_v38 = vadd.f32 %v10255_v37, %v12986_v33  ;;  %v10257_v1 = vadd.f32 %v4719_v22, %v12561_v13 }
 0x3ce   :  { %v4976_v54 = vmax.f32 %v4912_v44, 0.0  ;;  %v4913_v32 = vadd.f32 %v10256_v9, %v12986_v33 }
 0x3cf   :  { %v5227_v43 = vmax.f32 %v5179_v26, %v5205_v11  ;;  %v4974_v46 = vmax.f32 %v4910_v38, 0.0  ;;  %v4911_v27 = vadd.f32 %v10257_v1, %v12986_v33 }
 0x3d0   :  { %5041 = vst.msk [vmem:[#allocation2 + $0x170] sm:$0xff] %vm4994_vm2, %v4976_v54  ;;  %v4977_v14 = vmax.f32 %v4913_v32, 0.0  ;;  %v13212_v49 = vld [vmem:[#allocation3 + $0xb1] sm:$0xff] }
 0x3d1   :  { %5285 = vst.msk [vmem:[#allocation3 + $0xc1] sm:$0xff] %vm4994_vm2, %v5227_v43  ;;  %5039 = vst.msk [vmem:[#allocation2 + $0x160] sm:$0xff] %vm4994_vm2, %v4974_v46  ;;  %v4975_v59 = vmax.f32 %v4911_v27, 0.0  ;;  %v9924_v13 = vpop.f32.mrb[48].mxu0  ;;  %v5337_v48 = vpack.c.bf16 %v13212_v49, %v5325_v42  ;;  %v5159_v20 = vld [vmem:[#allocation2 + $0x150] ss:$2 sm:$0xff] }
 0x3d2   :  { %v5079_v61 = vld [vmem:[#allocation2 + $0x140] ss:$2 sm:$0xff]  ;;  %v5111_v2 = vld [vmem:[#allocation2 + $0x141] ss:$2 sm:$0xff]  ;;  %5042 = vst.msk [vmem:[#allocation2 + $0x178] sm:$0xff] %vm4994_vm2, %v4977_v14  ;;  %v10258_v24 = vadd.f32 %v9924_v13, %v12564_v51  ;;  %v4732_v17 = vpop.f32.mrb[49].mxu0 }
 0x3d3   :  { %v5132_v62 = vmax.f32 %v5079_v61, %v5111_v2  ;;  %5040 = vst.msk [vmem:[#allocation2 + $0x168] sm:$0xff] %vm4994_vm2, %v4975_v59  ;;  %v10259_v57 = vadd.f32 %v4732_v17, %v13781_v16  ;;  %v9925_v21 = vpop.f32.mrb[50].mxu0  ;;  %9948 = vmatprep.mubr.msk.bf16.mxu1 %vm4994_vm2, %v5337_v48  ;;  %v5207_v36 = vld [vmem:[#allocation2 + $0x151] ss:$2 sm:$0xff]  ;;  %v13785_v13 = vld [vmem:[#allocation13_spill] sm:$0xff] }
 0x3d4   :  { %v4916_v60 = vadd.f32 %v10258_v24, %v12986_v33  ;;  %v10260_v0 = vadd.f32 %v9925_v21, %v13782_v6  ;;  %v4735_v34 = vpop.f32.mrb[51].mxu0  ;;  %v13231_v26 = vld [vmem:[#allocation3 + $0xb2] sm:$0xff]  ;;  %v13784_v46 = vld [vmem:[#allocation12_spill] sm:$0xff]  ;;  %v13786_v17 = vld [vmem:[#allocation14_spill] sm:$0xff] }
 0x3d5   :  { %v5180_v39 = vmax.f32 %v5132_v62, %v5159_v20  ;;  %v4914_v63 = vadd.f32 %v10259_v57, %v12986_v33  ;;  %v10261_v51 = vadd.f32 %v4735_v34, %v13783_v45  ;;  %v13787_v20 = vld [vmem:[#allocation15_spill] sm:$0xff] }
 0x3d6   :  { %v4980_v3 = vmax.f32 %v4916_v60, 0.0  ;;  %v4917_v37 = vadd.f32 %v10260_v0, %v12986_v33 }
 0x3d7   :  { %v5228_v30 = vmax.f32 %v5180_v39, %v5207_v36  ;;  %v4978_v56 = vmax.f32 %v4914_v63, 0.0  ;;  %v4915_v44 = vadd.f32 %v10261_v51, %v12986_v33 }
 0x3d8   :  { %5045 = vst.msk [vmem:[#allocation2 + $0x190] sm:$0xff] %vm4994_vm2, %v4980_v3  ;;  %v4981_v9 = vmax.f32 %v4917_v37, 0.0  ;;  %v13229_v22 = vld [vmem:[#allocation3 + $0xc1] sm:$0xff] }
 0x3d9   :  { %v13233_v38 = vld [vmem:[#allocation3 + $0xc2] sm:$0xff]  ;;  %5286 = vst.msk [vmem:[#allocation3 + $0xd1] sm:$0xff] %vm4994_vm2, %v5228_v30  ;;  %5043 = vst.msk [vmem:[#allocation2 + $0x180] sm:$0xff] %vm4994_vm2, %v4978_v56  ;;  %v4979_v1 = vmax.f32 %v4915_v44, 0.0  ;;  %v9928_v11 = vpop.f32.mrb[52].mxu0 }
 0x3da   :  { %v5081_v42 = vld [vmem:[#allocation2 + $0x160] ss:$2 sm:$0xff]  ;;  %v5113_v43 = vld [vmem:[#allocation2 + $0x161] ss:$2 sm:$0xff]  ;;  %5046 = vst.msk [vmem:[#allocation2 + $0x198] sm:$0xff] %vm4994_vm2, %v4981_v9  ;;  %v10262_v27 = vadd.f32 %v9928_v11, %v13784_v46  ;;  %v4748_v14 = vpop.f32.mrb[53].mxu0 }
 0x3db   :  { %v5133_v59 = vmax.f32 %v5081_v42, %v5113_v43  ;;  %5044 = vst.msk [vmem:[#allocation2 + $0x188] sm:$0xff] %vm4994_vm2, %v4979_v1  ;;  %v10263_v48 = vadd.f32 %v4748_v14, %v13785_v13  ;;  %v9929_v61 = vpop.f32.mrb[54].mxu0  ;;  %v5161_v2 = vld [vmem:[#allocation2 + $0x170] ss:$2 sm:$0xff]  ;;  %v5209_v6 = vld [vmem:[#allocation2 + $0x171] ss:$2 sm:$0xff] }
 0x3dc   :  { %v4920_v24 = vadd.f32 %v10262_v27, %v12986_v33  ;;  %v10264_v62 = vadd.f32 %v9929_v61, %v13786_v17  ;;  %v4751_v16 = vpop.f32.mrb[55].mxu0  ;;  %v13788_v9 = vld [vmem:[#allocation16_spill] sm:$0xff]  ;;  %v13789_v43 = vld [vmem:[#allocation17_spill] sm:$0xff]  ;;  %v13790_v13 = vld [vmem:[#allocation18_spill] sm:$0xff] }
 0x3dd   :  { %v5181_v57 = vmax.f32 %v5133_v59, %v5161_v2  ;;  %v4918_v21 = vadd.f32 %v10263_v48, %v12986_v33  ;;  %v10265_v60 = vadd.f32 %v4751_v16, %v13787_v20  ;;  %v13791_v17 = vld [vmem:[#allocation19_spill] sm:$0xff] }
 0x3de   :  { %v4984_v0 = vmax.f32 %v4920_v24, 0.0  ;;  %v4921_v34 = vadd.f32 %v10264_v62, %v12986_v33 }
 0x3df   :  { %v5229_v39 = vmax.f32 %v5181_v57, %v5209_v6  ;;  %v4982_v63 = vmax.f32 %v4918_v21, 0.0  ;;  %v4919_v45 = vadd.f32 %v10265_v60, %v12986_v33 }
 0x3e0   :  { %5049 = vst.msk [vmem:[#allocation2 + $0x1b0] sm:$0xff] %vm4994_vm2, %v4984_v0  ;;  %v4985_v51 = vmax.f32 %v4921_v34, 0.0  ;;  %v13252_v36 = vld [vmem:[#allocation3 + $0xd1] sm:$0xff] }
 0x3e1   :  { %5287 = vst.msk [vmem:[#allocation3 + $0xe1] sm:$0xff] %vm4994_vm2, %v5229_v39  ;;  %5047 = vst.msk [vmem:[#allocation2 + $0x1a0] sm:$0xff] %vm4994_vm2, %v4982_v63  ;;  %v4983_v3 = vmax.f32 %v4919_v45, 0.0  ;;  %v9932_v37 = vpop.f32.mrb[56].mxu0  ;;  %v13258_v30 = vpack.c.bf16 %v13252_v36, %v13229_v22  ;;  %v5163_v14 = vld [vmem:[#allocation2 + $0x190] ss:$2 sm:$0xff] }
 0x3e2   :  { %v5083_v56 = vld [vmem:[#allocation2 + $0x180] ss:$2 sm:$0xff]  ;;  %v5115_v44 = vld [vmem:[#allocation2 + $0x181] ss:$2 sm:$0xff]  ;;  %5050 = vst.msk [vmem:[#allocation2 + $0x1b8] sm:$0xff] %vm4994_vm2, %v4985_v51  ;;  %v10266_v1 = vadd.f32 %v9932_v37, %v13788_v9  ;;  %v4764_v11 = vpop.f32.mrb[57].mxu0 }
 0x3e3   :  { %v5134_v42 = vmax.f32 %v5083_v56, %v5115_v44  ;;  %5048 = vst.msk [vmem:[#allocation2 + $0x1a8] sm:$0xff] %vm4994_vm2, %v4983_v3  ;;  %v10267_v46 = vadd.f32 %v4764_v11, %v13789_v43  ;;  %v9933_v27 = vpop.f32.mrb[58].mxu0  ;;  %9949 = vmatmul.mubr.msk.bf16.gmra.mrb[72].mxu1 %vm4994_vm2, %v13258_v30  ;;  %v5211_v16 = vld [vmem:[#allocation2 + $0x191] ss:$2 sm:$0xff]  ;;  %v13793_v43 = vld [vmem:[#allocation21_spill] sm:$0xff] }
 0x3e4   :  { %v4924_v59 = vadd.f32 %v10266_v1, %v12986_v33  ;;  %v10268_v48 = vadd.f32 %v9933_v27, %v13790_v13  ;;  %v4767_v61 = vpop.f32.mrb[59].mxu0  ;;  %v13275_v39 = vld [vmem:[#allocation3 + $0xd2] sm:$0xff]  ;;  %v13792_v9 = vld [vmem:[#allocation20_spill] sm:$0xff]  ;;  %v13794_v13 = vld [vmem:[#allocation22_spill] sm:$0xff] }
 0x3e5   :  { %v5182_v2 = vmax.f32 %v5134_v42, %v5163_v14  ;;  %v4922_v24 = vadd.f32 %v10267_v46, %v12986_v33  ;;  %v10269_v62 = vadd.f32 %v4767_v61, %v13791_v17  ;;  %v13795_v17 = vld [vmem:[#allocation23_spill] sm:$0xff]  ;;  %v13397_v54 = vpack.c.bf16 %v13275_v39, %v13233_v38 }
 0x3e6   :  { %v4988_v57 = vmax.f32 %v4924_v59, 0.0  ;;  %v4925_v21 = vadd.f32 %v10268_v48, %v12986_v33 }
 0x3e7   :  { %v5230_v20 = vmax.f32 %v5182_v2, %v5211_v16  ;;  %v4986_v60 = vmax.f32 %v4922_v24, 0.0  ;;  %v4923_v6 = vadd.f32 %v10269_v62, %v12986_v33  ;;  %13796 = vst [vmem:[#allocation9_spill] sm:$0xff] %v13397_v54 }
 0x3e8   :  { %5053 = vst.msk [vmem:[#allocation2 + $0x1d0] sm:$0xff] %vm4994_vm2, %v4988_v57  ;;  %v4989_v0 = vmax.f32 %v4925_v21, 0.0  ;;  %v13273_v34 = vld [vmem:[#allocation3 + $0xe1] sm:$0xff] }
 0x3e9   :  { %v13277_v63 = vld [vmem:[#allocation3 + $0xe2] sm:$0xff]  ;;  %5288 = vst.msk [vmem:[#allocation3 + $0xf1] sm:$0xff] %vm4994_vm2, %v5230_v20  ;;  %5051 = vst.msk [vmem:[#allocation2 + $0x1c0] sm:$0xff] %vm4994_vm2, %v4986_v60  ;;  %v4987_v45 = vmax.f32 %v4923_v6, 0.0  ;;  %v9936_v51 = vpop.f32.mrb[60].mxu0 }
 0x3ea   :  { %v5085_v56 = vld [vmem:[#allocation2 + $0x1a0] ss:$2 sm:$0xff]  ;;  %v5117_v44 = vld [vmem:[#allocation2 + $0x1a1] ss:$2 sm:$0xff]  ;;  %5054 = vst.msk [vmem:[#allocation2 + $0x1d8] sm:$0xff] %vm4994_vm2, %v4989_v0  ;;  %v10270_v1 = vadd.f32 %v9936_v51, %v13792_v9  ;;  %v4780_v11 = vpop.f32.mrb[61].mxu0 }
 0x3eb   :  { %v5135_v42 = vmax.f32 %v5085_v56, %v5117_v44  ;;  %5052 = vst.msk [vmem:[#allocation2 + $0x1c8] sm:$0xff] %vm4994_vm2, %v4987_v45  ;;  %v10271_v46 = vadd.f32 %v4780_v11, %v13793_v43  ;;  %v9937_v27 = vpop.f32.mrb[62].mxu0  ;;  %v5165_v14 = vld [vmem:[#allocation2 + $0x1b0] ss:$2 sm:$0xff]  ;;  %v5213_v16 = vld [vmem:[#allocation2 + $0x1b1] ss:$2 sm:$0xff] }
 0x3ec   :  { %v4928_v59 = vadd.f32 %v10270_v1, %v12986_v33  ;;  %v10272_v48 = vadd.f32 %v9937_v27, %v13794_v13  ;;  %v4783_v61 = vpop.f32.mrb[63].mxu0  ;;  %v5592_v13 = vld [vmem:[#allocation3 + $0x2] sm:$0xff] }
 0x3ed   :  { %v5183_v2 = vmax.f32 %v5135_v42, %v5165_v14  ;;  %v4926_v24 = vadd.f32 %v10271_v46, %v12986_v33  ;;  %v10273_v62 = vadd.f32 %v4783_v61, %v13795_v17 }
 0x3ee   :  { %v4992_v57 = vmax.f32 %v4928_v59, 0.0  ;;  %v4929_v21 = vadd.f32 %v10272_v48, %v12986_v33  ;;  %v8814_v59 = vld [vmem:[%s13755_s3 + $0x10] sm:$0xf] }
 0x3ef   :  { %v5231_v20 = vmax.f32 %v5183_v2, %v5213_v16  ;;  %v4990_v60 = vmax.f32 %v4926_v24, 0.0  ;;  %v4927_v6 = vadd.f32 %v10273_v62, %v12986_v33  ;;  %v5975_v5 = vsel %vm5367_vm4, %v8814_v59, 0 }
 0x3f0   :  { %5057 = vst.msk [vmem:[#allocation2 + $0x1f0] sm:$0xff] %vm4994_vm2, %v4992_v57  ;;  %v4993_v0 = vmax.f32 %v4929_v21, 0.0  ;;  %v13296_v45 = vld [vmem:[#allocation3 + $0xf1] sm:$0xff]  ;;  %v5292_v57 = vld [vmem:[#allocation3] sm:$0xff] }
 0x3f1   :  { %5289 = vst.msk [vmem:[#allocation3 + $0x101] sm:$0xff] %vm4994_vm2, %v5231_v20  ;;  %5055 = vst.msk [vmem:[#allocation2 + $0x1e0] sm:$0xff] %vm4994_vm2, %v4990_v60  ;;  %v4991_v51 = vmax.f32 %v4927_v6, 0.0  ;;  %v13302_v56 = vpack.c.bf16 %v13296_v45, %v13273_v34  ;;  %v5167_v33 = vld [vmem:[#allocation2 + $0x1d0] ss:$2 sm:$0xff] }
 0x3f2   :  { %v5087_v44 = vld [vmem:[#allocation2 + $0x1c0] ss:$2 sm:$0xff]  ;;  %v5119_v9 = vld [vmem:[#allocation2 + $0x1c1] ss:$2 sm:$0xff]  ;;  %5058 = vst.msk [vmem:[#allocation2 + $0x1f8] sm:$0xff] %vm4994_vm2, %v4993_v0  ;;  %v13310_v27 = vld [vmem:[#allocation3 + $0xf2] sm:$0xff] }
 0x3f3   :  { %v5136_v1 = vmax.f32 %v5087_v44, %v5119_v9  ;;  %5056 = vst.msk [vmem:[#allocation2 + $0x1e8] sm:$0xff] %vm4994_vm2, %v4991_v51  ;;  %9952 = vmatprep.mubr.msk.bf16.mxu1 %vm4994_vm2, %v13302_v56  ;;  %v5215_v42 = vld [vmem:[#allocation2 + $0x1d1] ss:$2 sm:$0xff]  ;;  %v5294_v44 = vld [vmem:[#allocation3 + $0x20] sm:$0xff] }
 0x3f4   :  { %v13319_v21 = vld [vmem:[#allocation3 + $0x10] sm:$0xff] }
 0x3f5   :  { %v5184_v11 = vmax.f32 %v5136_v1, %v5167_v33  ;;  %v5308_v6 = vpack.c.bf16 %v13319_v21, %v5292_v57  ;;  %v13332_v0 = vld [vmem:[#allocation3 + $0x30] sm:$0xff]  ;;  %v5296_v1 = vld [vmem:[#allocation3 + $0x40] sm:$0xff]  ;;  %v5643_v33 = vsel %vm5367_vm4, %v13094_v25, 0 }
 0x3f6   :  { %v13334_v51 = vld [vmem:[#allocation3 + $0x50] sm:$0xff]  ;;  %v13337_v9 = vpack.c.bf16 %v13332_v0, %v5294_v44  ;;  %v5298_v25 = vld [vmem:[#allocation3 + $0x60] sm:$0xff]  ;;  %v5775_v23 = vpack.c.bf16 %v5296_v1, %v13332_v0 }
 0x3f7   :  { %v5232_v43 = vmax.f32 %v5184_v11, %v5215_v42  ;;  %v13342_v11 = vpack.c.bf16 %v13334_v51, %v5296_v1  ;;  %v8805_v42 = vld [vmem:[%s13755_s3 + $0xc] sm:$0xf]  ;;  %v8832_v1 = vld [vmem:[%s13755_s3 + $0x18] sm:$0xf] }
 0x3f8   :  { %v13308_v46 = vld [vmem:[#allocation3 + $0x101] sm:$0xff]  ;;  %v5809_v53 = vsel %vm5367_vm4, %v8805_v42, 0 }
 0x3f9   :  { %v13312_v14 = vld [vmem:[#allocation3 + $0x102] sm:$0xff]  ;;  %5290 = vst.msk [vmem:[#allocation3 + $0x111] sm:$0xff] %vm4994_vm2, %v5232_v43  ;;  %v5169_v24 = vld [vmem:[#allocation2 + $0x1f0] ss:$2 sm:$0xff]  ;;  %v5217_v62 = vld [vmem:[#allocation2 + $0x1f1] ss:$2 sm:$0xff] }
 0x3fa   :  { %v5089_v48 = vld [vmem:[#allocation2 + $0x1e0] ss:$2 sm:$0xff]  ;;  %v5121_v61 = vld [vmem:[#allocation2 + $0x1e1] ss:$2 sm:$0xff]  ;;  %v5299_v43 = vld [vmem:[#allocation3 + $0x70] sm:$0xff] }
 0x3fb   :  { %v5137_v2 = vmax.f32 %v5089_v48, %v5121_v61  ;;  %v5300_v48 = vld [vmem:[#allocation3 + $0xa0] sm:$0xff]  ;;  %v5301_v61 = vld [vmem:[#allocation3 + $0xb0] sm:$0xff] }
 0x3fc   :  { %v5306_v37 = vld [vmem:[#allocation3 + $0x100] sm:$0xff] }
 0x3fd   :  { %v5185_v17 = vmax.f32 %v5137_v2, %v5169_v24  ;;  %v13352_v2 = vpack.c.bf16 %v5299_v43, %v5298_v25  ;;  %v5312_v24 = vpack.c.bf16 %v5301_v61, %v5300_v48 }
 0x3ff   :  { %v5233_v16 = vmax.f32 %v5185_v17, %v5217_v62  ;;  %v5303_v17 = vld [vmem:[#allocation3 + $0xd0] sm:$0xff] }
 0x400   :  { %v13321_v20 = vld [vmem:[#allocation3 + $0x111] sm:$0xff] }
 0x401   :  { %5291 = vst.msk [vmem:[#allocation3 + $0x121] sm:$0xff] %vm4994_vm2, %v5233_v16  ;;  %v13326_v60 = vpack.c.bf16 %v13321_v20, %v13308_v46  ;;  %v5305_v62 = vld [vmem:[#allocation3 + $0xf0] sm:$0xff]  ;;  %v5302_v16 = vld [vmem:[#allocation3 + $0xc0] sm:$0xff] }
 0x402   :  { %v13357_v57 = vpack.c.bf16 %v5303_v17, %v5302_v16  ;;  %v5307_v48 = vld [vmem:[#allocation3 + $0x110] sm:$0xff]  ;;  %v5780_v0 = vpack.c.bf16 %v5306_v37, %v5305_v62 }
 0x403   :  { %9953 = vmatmul.mubr.msk.bf16.gmra.mrb[76].mxu1 %vm4994_vm2, %v13326_v60  ;;  %v13365_v32 = vpack.c.bf16 %v5307_v48, %v5306_v37  ;;  %v13799_v37 = vpack.c.bf16 %v13111_v12, %v13081_v47  ;;  %v13802_v47 = vpack.c.bf16 %v13273_v34, %v13252_v36  ;;  %v13803_v12 = vpack.c.bf16 %v13308_v46, %v13296_v45  ;;  %v6272_v46 = vld [vmem:[#allocation3 + $0x130] sm:$0xff] }
 0x404   :  { %9958 = vmatprep.mubr.msk.bf16.mxu1 %vm4994_vm2, %v5308_v6  ;;  %v5304_v6 = vld [vmem:[#allocation3 + $0xe0] sm:$0xff]  ;;  %v13805_v36 = vpack.c.bf16 %v13115_v50, %v13113_v55  ;;  %v13806_v34 = vpack.c.bf16 %v13159_v40, %v13157_v35  ;;  %v13807_v45 = vpack.c.bf16 %v13233_v38, %v13231_v26  ;;  %v13808_v55 = vpack.c.bf16 %v13277_v63, %v13275_v39  ;;  %v6264_v39 = vld [vmem:[#allocation3 + $0x90] sm:$0xff] }
 0x405   :  { %v13809_v50 = vpack.c.bf16 %v13312_v14, %v13310_v27  ;;  %v8850_v38 = vld [vmem:[%s13755_s3 + $0x20] sm:$0xf] }
 0x408   :  { %v6105_v35 = vld [vmem:[#allocation3 + $0x122] sm:$0xff] }
 0x40b   :  { %9959 = vmatmul.mubr.msk.bf16.vlgmr.msra.gmra.mrb[64].mxu1 %vm4994_vm2, %v13337_v9 }
 0x40c   :  { %9962 = vmatprep.mubr.msk.bf16.mxu1 %vm4994_vm2, %v13342_v11  ;;  %9975 = vmatpush3.bf16.msra.mxu1 %v5643_v33  ;;  %v13359_v33 = vpack.c.bf16 %v5305_v62, %v5304_v6 }
 0x40d   :  { %10863 = vmatprep.subr.msk.bf16.mxu1 %vm5367_vm4, %v8805_v42 }
 0x413   :  { %9963 = vmatmul.mubr.msk.bf16.gmra.mrb[68].mxu1 %vm4994_vm2, %v13352_v2 }
 0x414   :  { %9966 = vmatprep.mubr.msk.bf16.mxu1 %vm4994_vm2, %v5312_v24  ;;  %v5608_v24 = vpack.c.bf16 %v13060_v31, %v5592_v13  ;;  %v5599_v13 = vld [vmem:[#allocation3 + $0x72] sm:$0xff] }
 0x415   :  { %v13389_v42 = vpack.c.bf16 %v5599_v13, %v13159_v40 }
 0x41b   :  { %9967 = vmatmul.mubr.msk.bf16.gmra.mrb[72].mxu1 %vm4994_vm2, %v13357_v57 }
 0x41c   :  { %9970 = vmatprep.mubr.msk.bf16.mxu1 %vm4994_vm2, %v13359_v33 }
 0x423   :  { %9971 = vmatmul.mubr.msk.bf16.gmra.mrb[76].mxu1 %vm4994_vm2, %v13365_v32 }
 0x424   :  { %9976 = vmatprep.mubr.msk.bf16.mxu1 %vm4994_vm2, %v5608_v24  ;;  %v5600_v24 = vld [vmem:[#allocation3 + $0xa2] sm:$0xff] }
 0x425   :  { %v5612_v3 = vpack.c.bf16 %v13231_v26, %v5600_v24  ;;  %v5607_v24 = vld [vmem:[#allocation3 + $0x112] sm:$0xff] }
 0x426   :  { %v13408_v29 = vpack.c.bf16 %v5607_v24, %v13312_v14  ;;  %v6113_v40 = vpack.c.bf16 %v6105_v35, %v5607_v24  ;;  %v6640_v14 = vsel %vm5367_vm4, %v8850_v38, 0 }
 0x42b   :  { %9977 = vmatmul.mubr.msk.bf16.vlgmr.msra.gmra.mrb[64].mxu1 %vm4994_vm2, %v13373_v10 }
 0x42c   :  { %9980 = vmatprep.mubr.msk.bf16.mxu1 %vm4994_vm2, %v13378_v41  ;;  %9993 = vmatpush3.bf16.msra.mxu1 %v5809_v53  ;;  %v13401_v53 = vpack.c.bf16 %v13310_v27, %v13277_v63 }
 0x42d   :  { %10864 = vmatprep.subr.msk.bf16.mxu1 %vm5367_vm4, %v8814_v59  ;;  %v5779_v59 = vpack.c.bf16 %v5304_v6, %v5303_v17 }
 0x42e   :  { %13797 = vst [vmem:[#allocation10_spill] sm:$0xff] %v13401_v53 }
 0x433   :  { %9981 = vmatmul.mubr.msk.bf16.gmra.mrb[68].mxu1 %vm4994_vm2, %v13389_v42 }
 0x434   :  { %9984 = vmatprep.mubr.msk.bf16.mxu1 %vm4994_vm2, %v5612_v3  ;;  %v5774_v3 = vpack.c.bf16 %v5294_v44, %v13319_v21  ;;  %v5765_v21 = vld [vmem:[#allocation3 + $0x80] sm:$0xff] }
 0x435   :  { %v5777_v44 = vpack.c.bf16 %v5765_v21, %v5299_v43  ;;  %v13800_v43 = vpack.c.bf16 %v13155_v52, %v13134_v18  ;;  %v5939_v18 = vld [vmem:[#allocation3 + $0x121] sm:$0xff]  ;;  %v6276_v63 = vpack.c.bf16 %v6264_v39, %v5765_v21 }
 0x436   :  { %v5947_v52 = vpack.c.bf16 %v5939_v18, %v13321_v20  ;;  %v13810_v20 = vmov 0.0  }
 0x43b   :  { %9985 = vmatmul.mubr.msk.bf16.gmra.mrb[72].mxu1 %vm4994_vm2, %v13397_v54  ;;  %v5776_v54 = vpack.c.bf16 %v5298_v25, %v13334_v51  ;;  %v5773_v51 = vld [vmem:[#allocation3 + $0x120] sm:$0xff] }
 0x43c   :  { %9988 = vmatprep.mubr.msk.bf16.mxu1 %vm4994_vm2, %v13401_v53  ;;  %v8823_v53 = vld [vmem:[%s13755_s3 + $0x14] sm:$0xf]  ;;  %v6280_v27 = vpack.c.bf16 %v6272_v46, %v5773_v51  ;;  %v13550_v25 = vld [vmem:[%s13756_s4] ss:$0 sm:$0xff] }
 0x443   :  { %9989 = vmatmul.mubr.msk.bf16.gmra.mrb[76].mxu1 %vm4994_vm2, %v13408_v29 }
 0x444   :  { %9994 = vmatprep.mubr.msk.bf16.mxu1 %vm4994_vm2, %v5774_v3  ;;  %v5778_v3 = vpack.c.bf16 %v5302_v16, %v5301_v61  ;;  %v13801_v61 = vpack.c.bf16 %v13229_v22, %v13212_v49  ;;  %v6308_v49 = vsel %vm5367_vm4, %v8832_v1, 0  ;;  %v8841_v22 = vld [vmem:[%s13755_s3 + $0x1c] sm:$0xf] }
 0x445   :  { %v6474_v26 = vsel %vm5367_vm4, %v8841_v22, 0 }
 0x44b   :  { %9995 = vmatmul.mubr.msk.bf16.vlgmr.msra.gmra.mrb[64].mxu1 %vm4994_vm2, %v5775_v23  ;;  %v5781_v23 = vpack.c.bf16 %v5773_v51, %v5307_v48 }
 0x44c   :  { %9998 = vmatprep.mubr.msk.bf16.mxu1 %vm4994_vm2, %v5776_v54  ;;  %10011 = vmatpush3.bf16.msra.mxu1 %v5975_v5  ;;  %v13798_v5 = vpack.c.bf16 %v13058_v8, %v13041_v19  ;;  %v6141_v54 = vsel %vm5367_vm4, %v8823_v53, 0  ;;  %v5931_v19 = vld [vmem:[#allocation3 + $0x81] sm:$0xff] }
 0x44d   :  { %10865 = vmatprep.subr.msk.bf16.mxu1 %vm5367_vm4, %v8823_v53  ;;  %v5943_v8 = vpack.c.bf16 %v5931_v19, %v13178_v58  ;;  %v13804_v58 = vpack.c.bf16 %v13062_v28, %v13060_v31  ;;  %v6097_v31 = vld [vmem:[#allocation3 + $0x82] sm:$0xff] }
 0x44e   :  { %v6109_v28 = vpack.c.bf16 %v6097_v31, %v5599_v13 }
 0x453   :  { %9999 = vmatmul.mubr.msk.bf16.gmra.mrb[68].mxu1 %vm4994_vm2, %v5777_v44 }
 0x454   :  { %10002 = vmatprep.mubr.msk.bf16.mxu1 %vm4994_vm2, %v5778_v3 }
 0x45b   :  { %10003 = vmatmul.mubr.msk.bf16.gmra.mrb[72].mxu1 %vm4994_vm2, %v5779_v59 }
 0x45c   :  { %10006 = vmatprep.mubr.msk.bf16.mxu1 %vm4994_vm2, %v5780_v0 }
 0x463   :  { %10007 = vmatmul.mubr.msk.bf16.gmra.mrb[76].mxu1 %vm4994_vm2, %v5781_v23 }
 0x464   :  { %10012 = vmatprep.mubr.msk.bf16.mxu1 %vm4994_vm2, %v13798_v5 }
 0x46b   :  { %10013 = vmatmul.mubr.msk.bf16.vlgmr.msra.gmra.mrb[64].mxu1 %vm4994_vm2, %v13799_v37 }
 0x46c   :  { %10016 = vmatprep.mubr.msk.bf16.mxu1 %vm4994_vm2, %v13800_v43  ;;  %10029 = vmatpush3.bf16.msra.mxu1 %v6141_v54 }
 0x46d   :  { %10866 = vmatprep.subr.msk.bf16.mxu1 %vm5367_vm4, %v8832_v1 }
 0x473   :  { %10017 = vmatmul.mubr.msk.bf16.gmra.mrb[68].mxu1 %vm4994_vm2, %v5943_v8 }
 0x474   :  { %10020 = vmatprep.mubr.msk.bf16.mxu1 %vm4994_vm2, %v13801_v61 }
 0x47b   :  { %10021 = vmatmul.mubr.msk.bf16.gmra.mrb[72].mxu1 %vm4994_vm2, %v13802_v47 }
 0x47c   :  { %10024 = vmatprep.mubr.msk.bf16.mxu1 %vm4994_vm2, %v13803_v12 }
 0x483   :  { %10025 = vmatmul.mubr.msk.bf16.gmra.mrb[76].mxu1 %vm4994_vm2, %v5947_v52 }
 0x484   :  { %10030 = vmatprep.mubr.msk.bf16.mxu1 %vm4994_vm2, %v13804_v58 }
 0x48b   :  { %10031 = vmatmul.mubr.msk.bf16.vlgmr.msra.gmra.mrb[64].mxu1 %vm4994_vm2, %v13805_v36 }
 0x48c   :  { %10034 = vmatprep.mubr.msk.bf16.mxu1 %vm4994_vm2, %v13806_v34  ;;  %10047 = vmatpush3.bf16.msra.mxu1 %v6308_v49 }
 0x48d   :  { %10867 = vmatprep.subr.msk.bf16.mxu1 %vm5367_vm4, %v8841_v22 }
 0x493   :  { %10035 = vmatmul.mubr.msk.bf16.gmra.mrb[68].mxu1 %vm4994_vm2, %v6109_v28 }
 0x494   :  { %10038 = vmatprep.mubr.msk.bf16.mxu1 %vm4994_vm2, %v13807_v45 }
 0x49b   :  { %10039 = vmatmul.mubr.msk.bf16.gmra.mrb[72].mxu1 %vm4994_vm2, %v13808_v55 }
 0x49c   :  { %10042 = vmatprep.mubr.msk.bf16.mxu1 %vm4994_vm2, %v13809_v50 }
 0x4a3   :  { %10043 = vmatmul.mubr.msk.bf16.gmra.mrb[76].mxu1 %vm4994_vm2, %v6113_v40 }
 0x4a4   :  { %10048 = vmatprep.mubr.msk.bf16.mxu1 %vm4994_vm2, %v13337_v9  ;;  %v6430_v9 = vld [vmem:[#allocation3 + $0x91] sm:$0xff] }
 0x4ab   :  { %10049 = vmatmul.mubr.msk.bf16.vlgmr.msra.gmra.mrb[64].mxu1 %vm4994_vm2, %v13342_v11 }
 0x4ac   :  { %10052 = vmatprep.mubr.msk.bf16.mxu1 %vm4994_vm2, %v13352_v2  ;;  %10065 = vmatpush3.bf16.msra.mxu1 %v6474_v26 }
 0x4ad   :  { %10868 = vmatprep.subr.msk.bf16.mxu1 %vm5367_vm4, %v8850_v38 }
 0x4b3   :  { %10053 = vmatmul.mubr.msk.bf16.gmra.mrb[68].mxu1 %vm4994_vm2, %v6276_v63 }
 0x4b4   :  { %10056 = vmatprep.mubr.msk.bf16.mxu1 %vm4994_vm2, %v13357_v57 }
 0x4bb   :  { %10057 = vmatmul.mubr.msk.bf16.gmra.mrb[72].mxu1 %vm4994_vm2, %v13359_v33 }
 0x4bc   :  { %10060 = vmatprep.mubr.msk.bf16.mxu1 %vm4994_vm2, %v13365_v32  ;;  %v6442_v32 = vpack.c.bf16 %v6430_v9, %v5931_v19 }
 0x4c3   :  { %10061 = vmatmul.mubr.msk.bf16.gmra.mrb[76].mxu1 %vm4994_vm2, %v6280_v27 }
 0x4c4   :  { %10066 = vmatprep.mubr.msk.bf16.mxu1 %vm4994_vm2, %v13087_v4  ;;  %v6438_v4 = vld [vmem:[#allocation3 + $0x131] sm:$0xff] }
 0x4cb   :  { %10067 = vmatmul.mubr.msk.bf16.vlgmr.msra.gmra.mrb[64].mxu1 %vm4994_vm2, %v13140_v7  ;;  %v6446_v7 = vpack.c.bf16 %v6438_v4, %v5939_v18 }
 0x4cc   :  { %10070 = vmatprep.mubr.msk.bf16.mxu1 %vm4994_vm2, %v13184_v15  ;;  %10083 = vmatpush3.bf16.msra.mxu1 %v6640_v14  ;;  %v6596_v15 = vld [vmem:[#allocation3 + $0x92] sm:$0xff] }
 0x4cd   :  { %10100 = vmatprep.subr.bf16.mxu1 %v13810_v20 }
 0x4d3   :  { %10071 = vmatmul.mubr.msk.bf16.gmra.mrb[68].mxu1 %vm4994_vm2, %v6442_v32 }
 0x4d4   :  { %10074 = vmatprep.mubr.msk.bf16.mxu1 %vm4994_vm2, %v13258_v30  ;;  %v6608_v30 = vpack.c.bf16 %v6596_v15, %v6097_v31 }
 0x4db   :  { %10075 = vmatmul.mubr.msk.bf16.gmra.mrb[72].mxu1 %vm4994_vm2, %v13302_v56  ;;  %v13811_v56 = vld [vmem:[#allocation9_spill] sm:$0xff] }
 0x4dc   :  { %10078 = vmatprep.mubr.msk.bf16.mxu1 %vm4994_vm2, %v13326_v60  ;;  %v13812_v60 = vld [vmem:[#allocation10_spill] sm:$0xff] }
 0x4e3   :  { %10079 = vmatmul.mubr.msk.bf16.gmra.mrb[76].mxu1 %vm4994_vm2, %v6446_v7 }
 0x4e4   :  { %10084 = vmatprep.mubr.msk.bf16.mxu1 %vm4994_vm2, %v13373_v10  ;;  %v6604_v10 = vld [vmem:[#allocation3 + $0x132] sm:$0xff] }
 0x4e5   :  { %v6612_v11 = vpack.c.bf16 %v6604_v10, %v6105_v35 }
 0x4eb   :  { %10085 = vmatmul.mubr.msk.bf16.vlgmr.msra.gmra.mrb[64].mxu1 %vm4994_vm2, %v13378_v41  ;;  %v10872_v41 = vld [vmem:[%s13757_s5 + $0x8] sm:$0xff]  }
 0x4ec   :  { %10088 = vmatprep.mubr.msk.bf16.mxu1 %vm4994_vm2, %v13389_v42  ;;  %10101 = vmatpush3.bf16.msra.mxu1 %v10872_v41 }
 0x4ed   :  { %10106 = vmatprep.subr.bf16.mxu1 %v13810_v20 }
 0x4f3   :  { %10089 = vmatmul.mubr.msk.bf16.gmra.mrb[68].mxu1 %vm4994_vm2, %v6608_v30 }
 0x4f4   :  { %10092 = vmatprep.mubr.msk.bf16.mxu1 %vm4994_vm2, %v13811_v56 }
 0x4fb   :  { %10093 = vmatmul.mubr.msk.bf16.gmra.mrb[72].mxu1 %vm4994_vm2, %v13812_v60 }
 0x4fc   :  { %10096 = vmatprep.mubr.msk.bf16.mxu1 %vm4994_vm2, %v13408_v29 }
 0x503   :  { %10097 = vmatmul.mubr.msk.bf16.gmra.mrb[76].mxu1 %vm4994_vm2, %v6612_v11 }
 0x504   :  { %10102 = vmatprep.mubr.msk.bf16.mxu1 %vm10921_vm5, %v13810_v20 }
 0x5be   :  { %v10086_v29 = vpop.f32.mrb[64].mxu1 }
 0x5bf   :  { %v6764_v2 = vadd.f32 %v10086_v29, %v13550_v25  ;;  %v6676_v17 = vpop.f32.mrb[65].mxu1 }
 0x5c0   :  { %v6762_v62 = vadd.f32 %v13550_v25, %v6676_v17  ;;  %v10087_v16 = vpop.f32.mrb[66].mxu1 }
 0x5c1   :  { %v6780_v57 = vmax.f32 %v6764_v2, 0.0  ;;  %v6765_v6 = vadd.f32 %v10087_v16, %v13550_v25  ;;  %v6679_v33 = vpop.f32.mrb[67].mxu1 }
 0x5c2   :  { %v6778_v48 = vmax.f32 %v6762_v62, 0.0  ;;  %v6763_v13 = vadd.f32 %v13550_v25, %v6679_v33 }
 0x5c3   :  { %6797 = vst.msk [vmem:[#allocation4 + $0x10] sm:$0xff] %vm6794_vm6, %v6780_v57  ;;  %v6781_v42 = vmax.f32 %v6765_v6, 0.0 }
 0x5c4   :  { %6795 = vst.msk [vmem:[#allocation4] sm:$0xff] %vm6794_vm6, %v6778_v48  ;;  %v6779_v53 = vmax.f32 %v6763_v13, 0.0 }
 0x5c5   :  { %6798 = vst.msk [vmem:[#allocation4 + $0x18] sm:$0xff] %vm6794_vm6, %v6781_v42 }
 0x5c6   :  { %6796 = vst.msk [vmem:[#allocation4 + $0x8] sm:$0xff] %vm6794_vm6, %v6779_v53  ;;  %v10090_v24 = vpop.f32.mrb[68].mxu1 }
 0x5c7   :  { %v6768_v21 = vadd.f32 %v10090_v24, %v13550_v25  ;;  %v6692_v44 = vpop.f32.mrb[69].mxu1 }
 0x5c8   :  { %v10091_v3 = vpop.f32.mrb[70].mxu1  ;;  %v6766_v5 = vadd.f32 %v13550_v25, %v6692_v44 }
 0x5c9   :  { %v6784_v59 = vmax.f32 %v6768_v21, 0.0  ;;  %v6695_v0 = vpop.f32.mrb[71].mxu1  ;;  %v6769_v54 = vadd.f32 %v10091_v3, %v13550_v25 }
 0x5ca   :  { %v6813_v51 = vld [vmem:[#allocation4 + $0x10] ss:$2 sm:$0xf]  ;;  %v6829_v23 = vld [vmem:[#allocation4 + $0x11] ss:$2 sm:$0xf]  ;;  %v6767_v1 = vadd.f32 %v13550_v25, %v6695_v0 }
 0x5cb   :  { %v6843_v37 = vmax.f32 %v6813_v51, %v6829_v23  ;;  %v6811_v43 = vld [vmem:[#allocation4] ss:$2 sm:$0xf]  ;;  %v6827_v19 = vld [vmem:[#allocation4 + $0x1] ss:$2 sm:$0xf] }
 0x5cc   :  { %6801 = vst.msk [vmem:[#allocation4 + $0x30] sm:$0xff] %vm6794_vm6, %v6784_v59  ;;  %v6842_v8 = vmax.f32 %v6811_v43, %v6827_v19  ;;  %v6853_v61 = vld [vmem:[#allocation4 + $0x18] ss:$2 sm:$0xf]  ;;  %v6782_v58 = vmax.f32 %v6766_v5, 0.0  ;;  %v6785_v49 = vmax.f32 %v6769_v54, 0.0 }
 0x5cd   :  { %v6867_v47 = vmax.f32 %v6843_v37, %v6853_v61  ;;  %v6877_v12 = vld [vmem:[#allocation4 + $0x19] ss:$2 sm:$0xf]  ;;  %v6851_v18 = vld [vmem:[#allocation4 + $0x8] ss:$2 sm:$0xf] }
 0x5ce   :  { %v6866_v52 = vmax.f32 %v6842_v8, %v6851_v18  ;;  %v6783_v22 = vmax.f32 %v6767_v1, 0.0  ;;  %v10094_v36 = vpop.f32.mrb[72].mxu1  ;;  %v6875_v31 = vld [vmem:[#allocation4 + $0x9] ss:$2 sm:$0xf]  ;;  %6799 = vst.msk [vmem:[#allocation4 + $0x20] sm:$0xff] %vm6794_vm6, %v6782_v58 }
 0x5cf   :  { %v6891_v34 = vmax.f32 %v6867_v47, %v6877_v12  ;;  %v6772_v28 = vadd.f32 %v10094_v36, %v13550_v25  ;;  %v6708_v45 = vpop.f32.mrb[73].mxu1  ;;  %6802 = vst.msk [vmem:[#allocation4 + $0x38] sm:$0xff] %vm6794_vm6, %v6785_v49 }
 0x5d0   :  { %v6890_v55 = vmax.f32 %v6866_v52, %v6875_v31  ;;  %6800 = vst.msk [vmem:[#allocation4 + $0x28] sm:$0xff] %vm6794_vm6, %v6783_v22  ;;  %v6770_v50 = vadd.f32 %v13550_v25, %v6708_v45  ;;  %v10095_v35 = vpop.f32.mrb[74].mxu1 }
 0x5d1   :  { %6900 = vst.msk [vmem:[#allocation5 + $0x4] sm:$0xf] %vm6898_vm7, %v6891_v34  ;;  %v6788_v40 = vmax.f32 %v6772_v28, 0.0  ;;  %v6773_v26 = vadd.f32 %v10095_v35, %v13550_v25  ;;  %v6711_v38 = vpop.f32.mrb[75].mxu1 }
 0x5d2   :  { %6899 = vst.msk [vmem:[#allocation5] sm:$0xf] %vm6898_vm7, %v6890_v55  ;;  %v6771_v46 = vadd.f32 %v13550_v25, %v6711_v38  ;;  %v6786_v27 = vmax.f32 %v6770_v50, 0.0 }
 0x5d3   :  { %v6817_v39 = vld [vmem:[#allocation4 + $0x30] ss:$2 sm:$0xf]  ;;  %v6833_v63 = vld [vmem:[#allocation4 + $0x31] ss:$2 sm:$0xf] }
 0x5d4   :  { %6805 = vst.msk [vmem:[#allocation4 + $0x50] sm:$0xff] %vm6794_vm6, %v6788_v40  ;;  %v6789_v14 = vmax.f32 %v6773_v26, 0.0  ;;  %v6787_v9 = vmax.f32 %v6771_v46, 0.0  ;;  %v6845_v32 = vmax.f32 %v6817_v39, %v6833_v63  ;;  %6803 = vst.msk [vmem:[#allocation4 + $0x40] sm:$0xff] %vm6794_vm6, %v6786_v27 }
 0x5d5   :  { %v6815_v7 = vld [vmem:[#allocation4 + $0x20] ss:$2 sm:$0xf]  ;;  %v6831_v15 = vld [vmem:[#allocation4 + $0x21] ss:$2 sm:$0xf] }
 0x5d6   :  { %6806 = vst.msk [vmem:[#allocation4 + $0x58] sm:$0xff] %vm6794_vm6, %v6789_v14  ;;  %6804 = vst.msk [vmem:[#allocation4 + $0x48] sm:$0xff] %vm6794_vm6, %v6787_v9  ;;  %v10098_v4 = vpop.f32.mrb[76].mxu1  ;;  %v6844_v56 = vmax.f32 %v6815_v7, %v6831_v15  ;;  %v6857_v60 = vld [vmem:[#allocation4 + $0x38] ss:$2 sm:$0xf] }
 0x5d7   :  { %v6776_v30 = vadd.f32 %v10098_v4, %v13550_v25  ;;  %v6869_v10 = vmax.f32 %v6845_v32, %v6857_v60  ;;  %v6881_v11 = vld [vmem:[#allocation4 + $0x39] ss:$2 sm:$0xf]  ;;  %v6855_v41 = vld [vmem:[#allocation4 + $0x28] ss:$2 sm:$0xf] }
 0x5d8   :  { %v6868_v29 = vmax.f32 %v6844_v56, %v6855_v41  ;;  %v6879_v16 = vld [vmem:[#allocation4 + $0x29] ss:$2 sm:$0xf]  ;;  %v6724_v33 = vpop.f32.mrb[77].mxu1  ;;  %v10873_v7 = vld [vmem:[%s13757_s5] sm:$0xff]  }
 0x5d9   :  { %v6893_v62 = vmax.f32 %v6869_v10, %v6881_v11  ;;  %v6792_v6 = vmax.f32 %v6776_v30, 0.0  ;;  %v6774_v53 = vadd.f32 %v13550_v25, %v6724_v33  ;;  %v10099_v23 = vpop.f32.mrb[78].mxu1  ;;  %v6913_v18 = vld [vmem:[#allocation5 + $0x1] sm:$0x1]  ;;  %v6907_v63 = vld [vmem:[#allocation5] sm:$0x1] }
 0x5da   :  { %v6892_v48 = vmax.f32 %v6868_v29, %v6879_v16  ;;  %v6777_v1 = vadd.f32 %v10099_v23, %v13550_v25  ;;  %v6727_v37 = vpop.f32.mrb[79].mxu1  ;;  %v6915_v31 = vpack.c.bf16 %v6913_v18, %v6913_v18  ;;  %v6909_v15 = vpack.c.bf16 %v6907_v63, %v6907_v63  ;;  %v7033_v11 = vld [vmem:[#allocation5 + $0x2] sm:$0x1]  ;;  %v7354_v63 = vld [vmem:[#allocation5 + $0x7] sm:$0x1] }
 0x5db   :  { %v6821_v2 = vld [vmem:[#allocation4 + $0x50] ss:$2 sm:$0xf]  ;;  %v6837_v17 = vld [vmem:[#allocation4 + $0x51] ss:$2 sm:$0xf]  ;;  %v6775_v19 = vadd.f32 %v13550_v25, %v6727_v37 }
 0x5dc   :  { %v6847_v57 = vmax.f32 %v6821_v2, %v6837_v17  ;;  %v6819_v13 = vld [vmem:[#allocation4 + $0x40] ss:$2 sm:$0xf]  ;;  %v6835_v42 = vld [vmem:[#allocation4 + $0x41] ss:$2 sm:$0xf]  ;;  %v6922_v27 = vunpack.c.l.b16 %v6915_v31  ;;  %v6979_v10 = vunpack.c.l.b16 %v6909_v15 }
 0x5dd   :  { %6902 = vst.msk [vmem:[#allocation5 + $0xc] sm:$0xf] %vm6898_vm7, %v6893_v62  ;;  %v6846_v24 = vmax.f32 %v6819_v13, %v6835_v42  ;;  %v6861_v21 = vld [vmem:[#allocation4 + $0x58] ss:$2 sm:$0xf]  ;;  %v6790_v51 = vmax.f32 %v6774_v53, 0.0  ;;  %v7035_v62 = vpack.c.bf16 %v7033_v11, %v7033_v11 }
 0x5de   :  { %6809 = vst.msk [vmem:[#allocation4 + $0x70] sm:$0xff] %vm6794_vm6, %v6792_v6  ;;  %v6871_v44 = vmax.f32 %v6847_v57, %v6861_v21  ;;  %v6859_v3 = vld [vmem:[#allocation4 + $0x48] ss:$2 sm:$0xf]  ;;  %v6793_v8 = vmax.f32 %v6777_v1, 0.0  ;;  %v6791_v61 = vmax.f32 %v6775_v19, 0.0 }
 0x5df   :  { %6901 = vst.msk [vmem:[#allocation5 + $0x8] sm:$0xf] %vm6898_vm7, %v6892_v48  ;;  %v6885_v59 = vld [vmem:[#allocation4 + $0x59] ss:$2 sm:$0xf]  ;;  %v6870_v0 = vmax.f32 %v6846_v24, %v6859_v3  ;;  %v10874_v17 = vld [vmem:[%s13757_s5 + $0x10] sm:$0xff]   ;;  %v7042_v33 = vunpack.c.l.b16 %v7035_v62 }
 0x5e0   :  { %v6895_v5 = vmax.f32 %v6871_v44, %v6885_v59  ;;  %v6883_v54 = vld [vmem:[#allocation4 + $0x49] ss:$2 sm:$0xf]  ;;  %6807 = vst.msk [vmem:[#allocation4 + $0x60] sm:$0xff] %vm6794_vm6, %v6790_v51  ;;  %6810 = vst.msk [vmem:[#allocation4 + $0x78] sm:$0xff] %vm6794_vm6, %v6793_v8  ;;  %v10875_v24 = vld [vmem:[%s13757_s5 + $0x18] sm:$0xff]  }
 0x5e1   :  { %v6894_v43 = vmax.f32 %v6870_v0, %v6883_v54  ;;  %6808 = vst.msk [vmem:[#allocation4 + $0x68] sm:$0xff] %vm6794_vm6, %v6791_v61  ;;  %v7097_v48 = vld [vmem:[#allocation5 + $0x3] sm:$0x1]  ;;  %v7162_v51 = vld [vmem:[#allocation5 + $0x4] sm:$0x1] }
 0x5e2   :  { %6904 = vst.msk [vmem:[#allocation5 + $0x14] sm:$0xf] %vm6898_vm7, %v6895_v5  ;;  %v7099_v21 = vpack.c.bf16 %v7097_v48, %v7097_v48  ;;  %v10876_v1 = vld [vmem:[%s13757_s5 + $0x20] sm:$0xff]   ;;  %v7164_v37 = vpack.c.bf16 %v7162_v51, %v7162_v51 }
 0x5e3   :  { %6903 = vst.msk [vmem:[#allocation5 + $0x10] sm:$0xf] %vm6898_vm7, %v6894_v43  ;;  %v7290_v31 = vld [vmem:[#allocation5 + $0x6] sm:$0x1] }
 0x5e4   :  { %v7106_v0 = vunpack.c.l.b16 %v7099_v21  ;;  %v7171_v61 = vunpack.c.l.b16 %v7164_v37 }
 0x5e5   :  { %v6825_v47 = vld [vmem:[#allocation4 + $0x70] ss:$2 sm:$0xf]  ;;  %v6841_v12 = vld [vmem:[#allocation4 + $0x71] ss:$2 sm:$0xf] }
 0x5e6   :  { %v6849_v52 = vmax.f32 %v6825_v47, %v6841_v12  ;;  %v7226_v47 = vld [vmem:[#allocation5 + $0x5] sm:$0x1] }
 0x5e7   :  { %v6823_v58 = vld [vmem:[#allocation4 + $0x60] ss:$2 sm:$0xf]  ;;  %v6839_v49 = vld [vmem:[#allocation4 + $0x61] ss:$2 sm:$0xf] }
 0x5e8   :  { %v6848_v22 = vmax.f32 %v6823_v58, %v6839_v49  ;;  %v6865_v25 = vld [vmem:[#allocation4 + $0x78] ss:$2 sm:$0xf]  ;;  %v6863_v50 = vld [vmem:[#allocation4 + $0x68] ss:$2 sm:$0xf]  ;;  %v7228_v49 = vpack.c.bf16 %v7226_v47, %v7226_v47 }
 0x5e9   :  { %v6873_v55 = vmax.f32 %v6849_v52, %v6865_v25  ;;  %v6889_v35 = vld [vmem:[#allocation4 + $0x79] ss:$2 sm:$0xf]  ;;  %v6887_v39 = vld [vmem:[#allocation4 + $0x69] ss:$2 sm:$0xf] }
 0x5ea   :  { %v6914_v36 = vld [vmem:[#allocation5 + $0x11] sm:$0x1]  ;;  %v6908_v34 = vld [vmem:[#allocation5 + $0x10] sm:$0x1]  ;;  %v6872_v40 = vmax.f32 %v6848_v22, %v6863_v50  ;;  %v7034_v32 = vld [vmem:[#allocation5 + $0x12] sm:$0x1]  ;;  %v7235_v25 = vunpack.c.l.b16 %v7228_v49 }
 0x5eb   :  { %v6916_v28 = vpack.c.bf16 %v6914_v36, %v6914_v36  ;;  %v6910_v45 = vpack.c.bf16 %v6908_v34, %v6908_v34  ;;  %v6897_v38 = vmax.f32 %v6873_v55, %v6889_v35  ;;  %v7036_v60 = vpack.c.bf16 %v7034_v32, %v7034_v32  ;;  %v7098_v2 = vld [vmem:[#allocation5 + $0x13] sm:$0x1]  ;;  %v7163_v53 = vld [vmem:[#allocation5 + $0x14] sm:$0x1]  ;;  %v7227_v54 = vld [vmem:[#allocation5 + $0x15] sm:$0x1] }
 0x5ec   :  { %v6896_v46 = vmax.f32 %v6872_v40, %v6887_v39  ;;  %v7100_v6 = vpack.c.bf16 %v7098_v2, %v7098_v2  ;;  %v7165_v59 = vpack.c.bf16 %v7163_v53, %v7163_v53  ;;  %v7229_v8 = vpack.c.bf16 %v7227_v54, %v7227_v54  ;;  %v7291_v52 = vld [vmem:[#allocation5 + $0x16] sm:$0x1]  ;;  %v10877_v58 = vld [vmem:[%s13757_s5 + $0x28] sm:$0xff]   ;;  %v7355_v55 = vld [vmem:[#allocation5 + $0x17] sm:$0x1] }
 0x5ed   :  { %v6923_v26 = vunpack.c.l.b16 %v6916_v28  ;;  %v6980_v9 = vunpack.c.l.b16 %v6910_v45  ;;  %6906 = vst.msk [vmem:[#allocation5 + $0x1c] sm:$0xf] %vm6898_vm7, %v6897_v38  ;;  %v7043_v29 = vunpack.c.l.b16 %v7036_v60  ;;  %v7293_v34 = vpack.c.bf16 %v7291_v52, %v7291_v52  ;;  %v10878_v50 = vld [vmem:[%s13757_s5 + $0x30] sm:$0xff]  }
 0x5ee   :  { %6905 = vst.msk [vmem:[#allocation5 + $0x18] sm:$0xf] %vm6898_vm7, %v6896_v46  ;;  %v7107_v42 = vunpack.c.l.b16 %v7100_v6  ;;  %v7172_v5 = vunpack.c.l.b16 %v7165_v59  ;;  %v7236_v18 = vunpack.c.l.b16 %v7229_v8  ;;  %v7292_v35 = vpack.c.bf16 %v7290_v31, %v7290_v31 }
 0x5ef   :  { %v6924_v14 = vrot.slane %v6923_v26, 7  ;;  %v6981_v56 = vrot.slane %v6980_v9, 7  ;;  %v7044_v57 = vrot.slane %v7043_v29, 7  ;;  %v7300_v45 = vunpack.c.l.b16 %v7293_v34  ;;  %v10879_v9 = vld [vmem:[%s13757_s5 + $0x38] sm:$0xff]  }
 0x5f0   :  { %v7108_v3 = vrot.slane %v7107_v42, 7  ;;  %v7173_v19 = vrot.slane %v7172_v5, 7  ;;  %v7237_v36 = vrot.slane %v7236_v18, 7  ;;  %v7357_v38 = vpack.c.bf16 %v7355_v55, %v7355_v55 }
 0x5f1   :  { %v6926_v4 = vsel %vm6925_vm8, %v6924_v14, %v6922_v27  ;;  %v6982_v41 = vsel %vm6925_vm8, %v6981_v56, %v6979_v10  ;;  %v7045_v13 = vsel %vm6925_vm8, %v7044_v57, %v7042_v33  ;;  %v7301_v26 = vrot.slane %v7300_v45, 7  ;;  %v7419_v56 = vld [vmem:[#allocation5 + $0x8] sm:$0x1]  ;;  %v7483_v57 = vld [vmem:[#allocation5 + $0x9] sm:$0x1] }
 0x5f2   :  { %v6927_v30 = vpack.c.b16 %v6926_v4, %v6926_v4  ;;  %v6983_v16 = vpack.c.b16 %v6982_v41, %v6982_v41  ;;  %v7046_v44 = vpack.c.b16 %v7045_v13, %v7045_v13  ;;  %v7109_v23 = vsel %vm6925_vm8, %v7108_v3, %v7106_v0  ;;  %v10880_v41 = vld [vmem:[%s13757_s5 + $0x40] sm:$0xff]   ;;  %v10881_v13 = vld [vmem:[%s13757_s5 + $0x48] sm:$0xff]  }
 0x5f3   :  { %v7110_v43 = vpack.c.b16 %v7109_v23, %v7109_v23  ;;  %v7174_v12 = vsel %vm6925_vm8, %v7173_v19, %v7171_v61  ;;  %v7238_v28 = vsel %vm6925_vm8, %v7237_v36, %v7235_v25  ;;  %v7299_v39 = vunpack.c.l.b16 %v7292_v35  ;;  %v7547_v3 = vld [vmem:[#allocation5 + $0xa] sm:$0x1]  ;;  %v10882_v23 = vld [vmem:[%s13757_s5 + $0x50] sm:$0xff]   ;;  %v7611_v19 = vld [vmem:[#allocation5 + $0xb] sm:$0x1] }
 0x5f4   :  { %10103 = vmatmul.mubr.msk.bf16.vlgmr.msra.gmra.mrb[80].mxu1 %vm6794_vm6, %v6927_v30  ;;  %v7175_v22 = vpack.c.b16 %v7174_v12, %v7174_v12  ;;  %v7239_v40 = vpack.c.b16 %v7238_v28, %v7238_v28  ;;  %v7364_v27 = vunpack.c.l.b16 %v7357_v38  ;;  %v7356_v32 = vpack.c.bf16 %v7354_v63, %v7354_v63  ;;  %v7677_v47 = vld [vmem:[#allocation5 + $0x1c] sm:$0x1]  ;;  %v7676_v36 = vld [vmem:[#allocation5 + $0xc] sm:$0x1]  ;;  %v7741_v31 = vld [vmem:[#allocation5 + $0x1d] sm:$0x1] }
 0x5f5   :  { %10107 = vmatpush3.bf16.msra.mxu1 %v10873_v7  ;;  %10108 = vmatprep.mubr.msk.bf16.mxu1 %vm10921_vm5, %v13810_v20  ;;  %v7302_v46 = vsel %vm6925_vm8, %v7301_v26, %v7299_v39  ;;  %v7420_v14 = vld [vmem:[#allocation5 + $0x18] sm:$0x1]  ;;  %v7484_v11 = vld [vmem:[#allocation5 + $0x19] sm:$0x1]  ;;  %v7421_v29 = vpack.c.bf16 %v7419_v56, %v7419_v56  ;;  %v7548_v48 = vld [vmem:[#allocation5 + $0x1a] sm:$0x1]  ;;  %v7485_v42 = vpack.c.bf16 %v7483_v57, %v7483_v57 }
 0x5f6   :  { %10112 = vmatprep.subr.bf16.mxu1 %v13810_v20  ;;  %v7303_v4 = vpack.c.b16 %v7302_v46, %v7302_v46  ;;  %v7365_v7 = vrot.slane %v7364_v27, 7  ;;  %v7422_v15 = vpack.c.bf16 %v7420_v14, %v7420_v14  ;;  %v7363_v30 = vunpack.c.l.b16 %v7356_v32  ;;  %v7612_v51 = vld [vmem:[#allocation5 + $0x1b] sm:$0x1]  ;;  %v10884_v28 = vld [vmem:[%s13757_s5 + $0x60] sm:$0xff]   ;;  %v7740_v26 = vld [vmem:[#allocation5 + $0xd] sm:$0x1] }
 0x5f7   :  { %v7486_v62 = vpack.c.bf16 %v7484_v11, %v7484_v11  ;;  %v7550_v21 = vpack.c.bf16 %v7548_v48, %v7548_v48  ;;  %v7549_v5 = vpack.c.bf16 %v7547_v3, %v7547_v3  ;;  %v7614_v37 = vpack.c.bf16 %v7612_v51, %v7612_v51  ;;  %v10883_v12 = vld [vmem:[%s13757_s5 + $0x58] sm:$0xff]   ;;  %v10885_v46 = vld [vmem:[%s13757_s5 + $0x68] sm:$0xff]  }
 0x5f8   :  { %v7366_v60 = vsel %vm6925_vm8, %v7365_v7, %v7363_v30  ;;  %v7429_v10 = vunpack.c.l.b16 %v7422_v15  ;;  %v7613_v18 = vpack.c.bf16 %v7611_v19, %v7611_v19  ;;  %v7679_v49 = vpack.c.bf16 %v7677_v47, %v7677_v47  ;;  %v7805_v63 = vld [vmem:[#allocation5 + $0x1e] sm:$0x1]  ;;  %v7804_v7 = vld [vmem:[#allocation5 + $0xe] sm:$0x1]  ;;  %v7869_v56 = vld [vmem:[#allocation5 + $0x1f] sm:$0x1] }
 0x5f9   :  { %v7367_v2 = vpack.c.b16 %v7366_v60, %v7366_v60  ;;  %v7493_v33 = vunpack.c.l.b16 %v7486_v62  ;;  %v7557_v0 = vunpack.c.l.b16 %v7550_v21  ;;  %v7621_v61 = vunpack.c.l.b16 %v7614_v37  ;;  %v10886_v60 = vld [vmem:[%s13757_s5 + $0x70] sm:$0xff]   ;;  %v10887_v57 = vld [vmem:[%s13757_s5 + $0x78] sm:$0xff]   ;;  %v10889_v21 = vld [vmem:[%s13759_s7 + $0x8] sm:$0xff]  }
 0x5fa   :  { %v7686_v25 = vunpack.c.l.b16 %v7679_v49  ;;  %v7678_v45 = vpack.c.bf16 %v7676_v36, %v7676_v36  ;;  %v7743_v35 = vpack.c.bf16 %v7741_v31, %v7741_v31  ;;  %v7742_v27 = vpack.c.bf16 %v7740_v26, %v7740_v26 }
 0x5fb   :  { %v7807_v32 = vpack.c.bf16 %v7805_v63, %v7805_v63 }
 0x5fc   :  { %10109 = vmatmul.mubr.msk.bf16.vlgmr.msra.gmra.mrb[84].mxu1 %vm6794_vm6, %v6983_v16  ;;  %v7428_v16 = vunpack.c.l.b16 %v7421_v29  ;;  %v7750_v39 = vunpack.c.l.b16 %v7743_v35  ;;  %v7871_v29 = vpack.c.bf16 %v7869_v56, %v7869_v56 }
 0x5fd   :  { %10113 = vmatpush3.bf16.msra.mxu1 %v10874_v17  ;;  %10114 = vmatprep.mubr.msk.bf16.mxu1 %vm10921_vm5, %v13810_v20  ;;  %v7430_v17 = vrot.slane %v7429_v10, 7  ;;  %v7814_v30 = vunpack.c.l.b16 %v7807_v32  ;;  %v7806_v10 = vpack.c.bf16 %v7804_v7, %v7804_v7 }
 0x5fe   :  { %10118 = vmatprep.subr.bf16.mxu1 %v13810_v20 }
 0x5ff   :  { %v7431_v6 = vsel %vm6925_vm8, %v7430_v17, %v7428_v16  ;;  %v7868_v17 = vld [vmem:[#allocation5 + $0xf] sm:$0x1]  ;;  %v7878_v16 = vunpack.c.l.b16 %v7871_v29 }
 0x600   :  { %v7432_v53 = vpack.c.b16 %v7431_v6, %v7431_v6  ;;  %v7870_v6 = vpack.c.bf16 %v7868_v17, %v7868_v17 }
 0x601   :  { %v7879_v48 = vrot.slane %v7878_v16, 7 }
 0x604   :  { %10115 = vmatmul.mubr.msk.bf16.vlgmr.msra.gmra.mrb[88].mxu1 %vm6794_vm6, %v7046_v44  ;;  %v7492_v44 = vunpack.c.l.b16 %v7485_v42 }
 0x605   :  { %10119 = vmatpush3.bf16.msra.mxu1 %v10875_v24  ;;  %10120 = vmatprep.mubr.msk.bf16.mxu1 %vm10921_vm5, %v13810_v20  ;;  %v7494_v24 = vrot.slane %v7493_v33, 7 }
 0x606   :  { %10124 = vmatprep.subr.bf16.mxu1 %v13810_v20 }
 0x607   :  { %v7495_v59 = vsel %vm6925_vm8, %v7494_v24, %v7492_v44  ;;  %v10888_v24 = vld [vmem:[%s13759_s7] sm:$0xff]   ;;  %v10890_v44 = vld [vmem:[%s13759_s7 + $0x10] sm:$0xff]  }
 0x608   :  { %v7496_v54 = vpack.c.b16 %v7495_v59, %v7495_v59 }
 0x60c   :  { %10121 = vmatmul.mubr.msk.bf16.vlgmr.msra.gmra.mrb[92].mxu1 %vm6794_vm6, %v7110_v43  ;;  %v7556_v43 = vunpack.c.l.b16 %v7549_v5 }
 0x60d   :  { %10125 = vmatpush3.bf16.msra.mxu1 %v10876_v1  ;;  %10126 = vmatprep.mubr.msk.bf16.mxu1 %vm10921_vm5, %v13810_v20  ;;  %v7558_v1 = vrot.slane %v7557_v0, 7  ;;  %v10891_v0 = vld [vmem:[%s13759_s7 + $0x18] sm:$0xff]  }
 0x60e   :  { %10130 = vmatprep.subr.bf16.mxu1 %v13810_v20 }
 0x60f   :  { %v7559_v8 = vsel %vm6925_vm8, %v7558_v1, %v7556_v43 }
 0x610   :  { %v7560_v52 = vpack.c.b16 %v7559_v8, %v7559_v8 }
 0x614   :  { %10127 = vmatmul.mubr.msk.bf16.vlgmr.msra.gmra.mrb[96].mxu1 %vm6794_vm6, %v7175_v22  ;;  %v7620_v22 = vunpack.c.l.b16 %v7613_v18 }
 0x615   :  { %10131 = vmatpush3.bf16.msra.mxu1 %v10877_v58  ;;  %10132 = vmatprep.mubr.msk.bf16.mxu1 %vm10921_vm5, %v13810_v20  ;;  %v7622_v58 = vrot.slane %v7621_v61, 7 }
 0x616   :  { %10136 = vmatprep.subr.bf16.mxu1 %v13810_v20 }
 0x617   :  { %v7623_v34 = vsel %vm6925_vm8, %v7622_v58, %v7620_v22 }
 0x618   :  { %v7624_v55 = vpack.c.b16 %v7623_v34, %v7623_v34 }
 0x61c   :  { %10133 = vmatmul.mubr.msk.bf16.vlgmr.msra.gmra.mrb[100].mxu1 %vm6794_vm6, %v7239_v40  ;;  %v7685_v40 = vunpack.c.l.b16 %v7678_v45 }
 0x61d   :  { %10137 = vmatpush3.bf16.msra.mxu1 %v10878_v50  ;;  %10138 = vmatprep.mubr.msk.bf16.mxu1 %vm10921_vm5, %v13810_v20  ;;  %v7687_v50 = vrot.slane %v7686_v25, 7 }
 0x61e   :  { %10142 = vmatprep.subr.bf16.mxu1 %v13810_v20 }
 0x61f   :  { %v7688_v38 = vsel %vm6925_vm8, %v7687_v50, %v7685_v40 }
 0x620   :  { %v7689_v14 = vpack.c.b16 %v7688_v38, %v7688_v38 }
 0x624   :  { %10139 = vmatmul.mubr.msk.bf16.vlgmr.msra.gmra.mrb[104].mxu1 %vm6794_vm6, %v7303_v4  ;;  %v7749_v4 = vunpack.c.l.b16 %v7742_v27 }
 0x625   :  { %10143 = vmatpush3.bf16.msra.mxu1 %v10879_v9  ;;  %10144 = vmatprep.mubr.msk.bf16.mxu1 %vm10921_vm5, %v13810_v20  ;;  %v7751_v9 = vrot.slane %v7750_v39, 7 }
 0x626   :  { %10148 = vmatprep.subr.bf16.mxu1 %v13810_v20 }
 0x627   :  { %v7752_v15 = vsel %vm6925_vm8, %v7751_v9, %v7749_v4 }
 0x628   :  { %v7753_v11 = vpack.c.b16 %v7752_v15, %v7752_v15 }
 0x62c   :  { %10145 = vmatmul.mubr.msk.bf16.vlgmr.msra.gmra.mrb[108].mxu1 %vm6794_vm6, %v7367_v2  ;;  %v7813_v2 = vunpack.c.l.b16 %v7806_v10 }
 0x62d   :  { %10149 = vmatpush3.bf16.msra.mxu1 %v10880_v41  ;;  %10150 = vmatprep.mubr.msk.bf16.mxu1 %vm10921_vm5, %v13810_v20  ;;  %v7815_v41 = vrot.slane %v7814_v30, 7 }
 0x62e   :  { %10154 = vmatprep.subr.bf16.mxu1 %v13810_v20 }
 0x62f   :  { %v7816_v62 = vsel %vm6925_vm8, %v7815_v41, %v7813_v2 }
 0x630   :  { %v7817_v33 = vpack.c.b16 %v7816_v62, %v7816_v62 }
 0x634   :  { %10151 = vmatmul.mubr.msk.bf16.vlgmr.msra.gmra.mrb[112].mxu1 %vm6794_vm6, %v7432_v53 }
 0x635   :  { %10155 = vmatpush3.bf16.msra.mxu1 %v10881_v13  ;;  %10156 = vmatprep.mubr.msk.bf16.mxu1 %vm10921_vm5, %v13810_v20  ;;  %v7877_v13 = vunpack.c.l.b16 %v7870_v6 }
 0x636   :  { %10160 = vmatprep.subr.bf16.mxu1 %v13810_v20 }
 0x637   :  { %v7880_v42 = vsel %vm6925_vm8, %v7879_v48, %v7877_v13 }
 0x638   :  { %v7881_v53 = vpack.c.b16 %v7880_v42, %v7880_v42 }
 0x63c   :  { %10157 = vmatmul.mubr.msk.bf16.vlgmr.msra.gmra.mrb[116].mxu1 %vm6794_vm6, %v7496_v54 }
 0x63d   :  { %10161 = vmatpush3.bf16.msra.mxu1 %v10882_v23  ;;  %10162 = vmatprep.mubr.msk.bf16.mxu1 %vm10921_vm5, %v13810_v20 }
 0x63e   :  { %10166 = vmatprep.subr.bf16.mxu1 %v13810_v20 }
 0x644   :  { %10163 = vmatmul.mubr.msk.bf16.vlgmr.msra.gmra.mrb[120].mxu1 %vm6794_vm6, %v7560_v52 }
 0x645   :  { %10167 = vmatpush3.bf16.msra.mxu1 %v10883_v12  ;;  %10168 = vmatprep.mubr.msk.bf16.mxu1 %vm10921_vm5, %v13810_v20 }
 0x646   :  { %10172 = vmatprep.subr.bf16.mxu1 %v13810_v20 }
 0x64c   :  { %10169 = vmatmul.mubr.msk.bf16.vlgmr.msra.gmra.mrb[124].mxu1 %vm6794_vm6, %v7624_v55 }
 0x64d   :  { %10173 = vmatpush3.bf16.msra.mxu1 %v10884_v28  ;;  %10174 = vmatprep.mubr.msk.bf16.mxu1 %vm10921_vm5, %v13810_v20 }
 0x64e   :  { %10178 = vmatprep.subr.bf16.mxu1 %v13810_v20 }
 0x654   :  { %10175 = vmatmul.mubr.msk.bf16.vlgmr.msra.gmra.mrb[128].mxu1 %vm6794_vm6, %v7689_v14 }
 0x655   :  { %10179 = vmatpush3.bf16.msra.mxu1 %v10885_v46  ;;  %10180 = vmatprep.mubr.msk.bf16.mxu1 %vm10921_vm5, %v13810_v20 }
 0x656   :  { %10184 = vmatprep.subr.bf16.mxu1 %v13810_v20 }
 0x65c   :  { %10181 = vmatmul.mubr.msk.bf16.vlgmr.msra.gmra.mrb[132].mxu1 %vm6794_vm6, %v7753_v11 }
 0x65d   :  { %10185 = vmatpush3.bf16.msra.mxu1 %v10886_v60  ;;  %10186 = vmatprep.mubr.msk.bf16.mxu1 %vm10921_vm5, %v13810_v20 }
 0x65e   :  { %10190 = vmatprep.subr.bf16.mxu1 %v13810_v20 }
 0x664   :  { %10187 = vmatmul.mubr.msk.bf16.vlgmr.msra.gmra.mrb[136].mxu1 %vm6794_vm6, %v7817_v33 }
 0x665   :  { %10191 = vmatpush3.bf16.msra.mxu1 %v10887_v57  ;;  %10192 = vmatprep.mubr.msk.bf16.mxu1 %vm10921_vm5, %v13810_v20 }
 0x666   :  { %10196 = vmatprep.subr.bf16.mxu1 %v13810_v20 }
 0x66c   :  { %10193 = vmatmul.mubr.msk.bf16.vlgmr.msra.gmra.mrb[140].mxu1 %vm6794_vm6, %v7881_v53 }
 0x66d   :  { %10204 = vmatprep.mubr.msk.bf16.mxu1 %vm10921_vm5, %v13810_v20  ;;  %10197 = vmatpush3.bf16.msra.mxu1 %v10888_v24 }
 0x66e   :  { %10198 = vmatprep.subr.bf16.mxu1 %v13810_v20 }
 0x671   :  { %10199 = vmatpush3.bf16.msra.mxu1 %v10889_v21 }
 0x672   :  { %10200 = vmatprep.subr.bf16.mxu1 %v13810_v20 }
 0x675   :  { %10201 = vmatpush3.bf16.msra.mxu1 %v10890_v44 }
 0x676   :  { %10202 = vmatprep.subr.bf16.mxu1 %v13810_v20 }
 0x679   :  { %10203 = vmatpush3.bf16.msra.mxu1 %v10891_v0 }
 0x6c7   :  { %v6971_v3 = vpop.f32.mrb[80].mxu1 }
 0x6c8   :  { %v10104_v59 = vpop.f32.mrb[81].mxu1 }
 0x6c9   :  { %v6974_v51 = vpop.f32.mrb[82].mxu1 }
 0x6ca   :  { %v10105_v23 = vpop.f32.mrb[83].mxu1 }
 0x6cf   :  { %v7027_v5 = vpop.f32.mrb[84].mxu1 }
 0x6d0   :  { %v7028_v54 = vadd.f32 %v7027_v5, %v6971_v3  ;;  %v10110_v1 = vpop.f32.mrb[85].mxu1 }
 0x6d1   :  { %v7030_v37 = vpop.f32.mrb[86].mxu1 }
 0x6d2   :  { %v10111_v43 = vpop.f32.mrb[87].mxu1 }
 0x6d7   :  { %v7090_v19 = vpop.f32.mrb[88].mxu1 }
 0x6d8   :  { %v7096_v8 = vadd.f32 %v7090_v19, %v7028_v54  ;;  %v10116_v61 = vpop.f32.mrb[89].mxu1 }
 0x6d9   :  { %v7093_v47 = vpop.f32.mrb[90].mxu1  ;;  %v8922_v61 = vld [vmem:[%s13758_s6] ss:$0 sm:$0xff]  ;;  %s10922_s6 = smov [#allocation6]  }
 0x6da   :  { %v10117_v12 = vpop.f32.mrb[91].mxu1 }
 0x6df   :  { %v7154_v18 = vpop.f32.mrb[92].mxu1 }
 0x6e0   :  { %v7160_v52 = vadd.f32 %v7154_v18, %v7096_v8  ;;  %v10122_v58 = vpop.f32.mrb[93].mxu1 }
 0x6e1   :  { %v7157_v49 = vpop.f32.mrb[94].mxu1 }
 0x6e2   :  { %v10123_v22 = vpop.f32.mrb[95].mxu1 }
 0x6e7   :  { %v7219_v36 = vpop.f32.mrb[96].mxu1 }
 0x6e8   :  { %v7225_v34 = vadd.f32 %v7219_v36, %v7160_v52  ;;  %v10128_v20 = vpop.f32.mrb[97].mxu1  ;;  %v8923_v36 = vld [vmem:[%s13760_s8] ss:$0 sm:$0xff]  ;;  %s8044_s8 = sshll.u32 %s10922_s6, 4  ;;  %s8045_s8 = int_to_ptr.vmem [resolvable:$true] %s8044_s8 }
 0x6e9   :  { %v7222_v25 = vpop.f32.mrb[98].mxu1  ;;  %s10896_s20 = scalar_lea.vmem %s8045_s8, 32  ;;  %p10901_p1 = scmp.lt.s32.totalorder %s8045_s8, %s8045_s8 }
 0x6ea   :  { %v10129_v31 = vpop.f32.mrb[99].mxu1  ;;  %p10897_p0 = scmp.ne.s32.totalorder %s8045_s8, %s10896_s20  ;;  %p10902_p2 = scmp.lt.s32.totalorder %s10896_s20, %s10896_s20 }
 0x6ec   :  { %p10903_p3 = por %p10902_p2, %p10901_p1 }
 0x6ee   :  { %p10904_p4 = pnand %p10903_p3, %p10897_p0 }
 0x6ef   :  { %v7283_v28 = vpop.f32.mrb[100].mxu1 }
 0x6f0   :  { %v7289_v45 = vadd.f32 %v7283_v28, %v7225_v34  ;;  %v10134_v55 = vpop.f32.mrb[101].mxu1 }
 0x6f1   :  { %v7286_v50 = vpop.f32.mrb[102].mxu1 }
 0x6f2   :  { %v10135_v35 = vpop.f32.mrb[103].mxu1 }
 0x6f7   :  { %v7347_v40 = vpop.f32.mrb[104].mxu1 }
 0x6f8   :  { %v7353_v26 = vadd.f32 %v7347_v40, %v7289_v45  ;;  %v10140_v38 = vpop.f32.mrb[105].mxu1 }
 0x6f9   :  { %v7350_v39 = vpop.f32.mrb[106].mxu1 }
 0x6fa   :  { %v10141_v63 = vpop.f32.mrb[107].mxu1 }
 0x6ff   :  { %v7411_v46 = vpop.f32.mrb[108].mxu1 }
 0x700   :  { %v7417_v27 = vadd.f32 %v7411_v46, %v7353_v26  ;;  %v10146_v14 = vpop.f32.mrb[109].mxu1 }
 0x701   :  { %v7414_v9 = vpop.f32.mrb[110].mxu1 }
 0x702   :  { %v10147_v32 = vpop.f32.mrb[111].mxu1 }
 0x707   :  { %v7476_v4 = vpop.f32.mrb[112].mxu1 }
 0x708   :  { %v7482_v7 = vadd.f32 %v7476_v4, %v7417_v27  ;;  %v10152_v15 = vpop.f32.mrb[113].mxu1 }
 0x709   :  { %v7479_v30 = vpop.f32.mrb[114].mxu1 }
 0x70a   :  { %v10153_v56 = vpop.f32.mrb[115].mxu1 }
 0x70f   :  { %v7540_v60 = vpop.f32.mrb[116].mxu1 }
 0x710   :  { %v7546_v10 = vadd.f32 %v7540_v60, %v7482_v7  ;;  %v10158_v11 = vpop.f32.mrb[117].mxu1 }
 0x711   :  { %v7543_v41 = vpop.f32.mrb[118].mxu1 }
 0x712   :  { %v10159_v29 = vpop.f32.mrb[119].mxu1 }
 0x717   :  { %v7604_v2 = vpop.f32.mrb[120].mxu1 }
 0x718   :  { %v7610_v17 = vadd.f32 %v7604_v2, %v7546_v10  ;;  %v10164_v62 = vpop.f32.mrb[121].mxu1 }
 0x719   :  { %v7607_v16 = vpop.f32.mrb[122].mxu1 }
 0x71a   :  { %v10165_v57 = vpop.f32.mrb[123].mxu1 }
 0x71f   :  { %v7668_v6 = vpop.f32.mrb[124].mxu1 }
 0x720   :  { %v7674_v33 = vadd.f32 %v7668_v6, %v7610_v17  ;;  %v10170_v48 = vpop.f32.mrb[125].mxu1 }
 0x721   :  { %v7671_v13 = vpop.f32.mrb[126].mxu1 }
 0x722   :  { %v10171_v42 = vpop.f32.mrb[127].mxu1 }
 0x727   :  { %v7733_v53 = vpop.f32.mrb[128].mxu1 }
 0x728   :  { %v7739_v24 = vadd.f32 %v7733_v53, %v7674_v33  ;;  %v10176_v21 = vpop.f32.mrb[129].mxu1 }
 0x729   :  { %v7736_v44 = vpop.f32.mrb[130].mxu1 }
 0x72a   :  { %v10177_v3 = vpop.f32.mrb[131].mxu1 }
 0x72f   :  { %v7797_v59 = vpop.f32.mrb[132].mxu1 }
 0x730   :  { %v7803_v0 = vadd.f32 %v7797_v59, %v7739_v24  ;;  %v10182_v51 = vpop.f32.mrb[133].mxu1 }
 0x731   :  { %v7800_v23 = vpop.f32.mrb[134].mxu1 }
 0x732   :  { %v10183_v5 = vpop.f32.mrb[135].mxu1 }
 0x737   :  { %v7861_v54 = vpop.f32.mrb[136].mxu1 }
 0x738   :  { %v7867_v1 = vadd.f32 %v7861_v54, %v7803_v0  ;;  %v10188_v37 = vpop.f32.mrb[137].mxu1 }
 0x739   :  { %v7864_v43 = vpop.f32.mrb[138].mxu1 }
 0x73a   :  { %v10189_v19 = vpop.f32.mrb[139].mxu1 }
 0x73f   :  { %v7925_v8 = vpop.f32.mrb[140].mxu1 }
 0x740   :  { %v7931_v47 = vadd.f32 %v7925_v8, %v7867_v1  ;;  %v10194_v12 = vpop.f32.mrb[141].mxu1 }
 0x741   :  { %v7928_v18 = vpop.f32.mrb[142].mxu1 }
 0x742   :  { %v7939_v52 = vadd.f32 %v8922_v61, %v7931_v47  ;;  %v10195_v58 = vpop.f32.mrb[143].mxu1 }
 0x744   :  { %v7940_v49 = vmax.f32 %v7939_v52, 0.0 }
 0x746   :  { %v7941_v22 = vpack.c.bf16 %v7940_v49, %v7940_v49 }
 0x748   :  { %10205 = vmatmul.mubr.msk.bf16.vlgmr.msra.gmra.mrb[144].mxu1 %vm7981_vm9, %v7941_v22 }
 0x81b   :  { %v8019_v34 = vpop.f32.mrb[144].mxu1 }
 0x81c   :  { %v8020_v20 = vadd.f32 %v8923_v36, %v8019_v34  ;;  %v10206_v25 = vpop.f32.mrb[145].mxu1 }
 0x81d   :  { %v8022_v31 = vpop.f32.mrb[146].mxu1 }
 0x81e   :  { %v10207_v28 = vpop.f32.mrb[147].mxu1  ;;  %v8026_v45 = vsel %vm8025_vm10, %v8020_v20, -inf }
 0x81f   :  { %8027 = vmax.xlane.f32.xlu0 %v8026_v45 }
 0x8ac   :  { %v8028_v55 = vpop.xlane.xlu0 %8027 }
 0x8ad   :  { %v8029_v50 = vsub.f32 %v8020_v20, %v8028_v55 }
 0x8af   :  { %v8030_v35 = vmul.f32 1.442695, %v8029_v50 }
 0x8b1   :  { %10892 = vpow2.f32 %v8030_v35 }
 0x8bb   :  { %v10893_v40 = vpop.eup %10892 }
 0x8bc   :  { %v8032_v26 = vsel %vm8025_vm10, %v10893_v40, 0.0 }
 0x8bd   :  { %8033 = vadd.xlane.f32.xlu0 %v8032_v26 }
 0x94a   :  { %v8034_v38 = vpop.xlane.xlu0 %8033 }
 0x94b   :  { %10894 = vrcp.f32 %v8034_v38 }
 0x955   :  { %v10895_v39 = vpop.eup %10894 }
 0x956   :  { %v8036_v63 = vmul.f32 %v10895_v39, %v10893_v40 }
 0x958   :  { %8037 = vst.msk [vmem:[#allocation6] sm:$0x3] %vm8025_vm10, %v8036_v63 }
 0x959   :  { %10907 = shalt.err (!%p10904_p4)
}
 0x95a   :  { %s10908_s23 = scalar_lea.hbm %s13761_s9, 32 }
 0x95b   :  { %p10909_p5 = scmp.ne.s32.totalorder %s13761_s9, %s10908_s23  ;;  %p10912_p6 = scmp.lt.u32.totalorder %s10908_s23, %s13761_s9 }
 0x95d   :  { %p10914_p7 = pnand %p10912_p6, %p10909_p5 }
 0x95f   :  { %10917 = shalt.err (!%p10914_p7)
}
 0x960   :  { %8047 = dma.vmem_to_hbm [thread:$0]  %s8045_s8, 32, %s13761_s9, [#allocation7]  }
 0x961   :  { %10918 = dma.done.wait [#allocation7], 32  }
 0x962   :  { %10919 = vsyncadd [#allocation7], 4294967264 }
 0x963   :  { %8051 = vsyncpa [#allocation7], 1 }

</bundles_post_ra>
